<compile_context>
chip_gen: v6e
topology: v6e:2x2x1
jax: 0.10.0
libtpu: 0.0.40
codegen_flags: <defaults>
</compile_context>

<pallas_src>
import functools

import jax
import jax.numpy as jnp
from jax.experimental import pallas as pl
from jax.experimental.pallas import tpu as pltpu

LANES = 128     # lane-dense width for the fc stages / final logits
K = 5           # conv kernel size
H_IN = 28       # input spatial size implied by fc1 = Linear(16*4*4, 120)
OH1 = H_IN - K + 1          # 24
PH1 = OH1 // 2              # 12
OH2 = PH1 - K + 1           # 8
PH2 = OH2 // 2              # 4
CIN = 3
C1P = 8                     # conv1 out channels padded 6 -> 8
C2 = 16                     # conv2 out channels (exact)


# ------------------------------ fused kernel -------------------------------


def _lenet2_kernel(xcol_ref, w1_ref, b1_ref, w2_ref, b2_ref,
                   wf1_ref, bf1_ref, wf2_ref, bf2_ref, wf3_ref, bf3_ref,
                   o_ref, y1_ref, h1_ref, y2_ref):
    BT = y1_ref.shape[0]                      # batch tile
    M2 = BT * OH2 * OH2

    # ---- conv1: ONE im2col matmul, all 25 taps accumulated in the MXU ----
    # xcol_ref: (BT*24*24, 75) bf16, w1_ref: (75, 8) bf16
    y1 = jnp.dot(xcol_ref[...], w1_ref[...],
                 preferred_element_type=jnp.float32)              # (BT*576, 8)
    y1_ref[...] = y1.reshape(BT, OH1, OH1, C1P)

    # ---- pool1 (2x2 / stride 2) + bias + relu (pool/bias/relu commute) ----
    p = jnp.maximum(
        jnp.maximum(y1_ref[:, pl.ds(0, PH1, 2), pl.ds(0, PH1, 2), :],
                    y1_ref[:, pl.ds(0, PH1, 2), pl.ds(1, PH1, 2), :]),
        jnp.maximum(y1_ref[:, pl.ds(1, PH1, 2), pl.ds(0, PH1, 2), :],
                    y1_ref[:, pl.ds(1, PH1, 2), pl.ds(1, PH1, 2), :]))
    h1_ref[...] = jnp.maximum(p + b1_ref[...], 0.0)               # (BT,12,12,8)

    # ---- conv2: 25 tap matmuls, accumulated in registers, stored once ----
    acc2 = jnp.zeros((M2, C2), jnp.float32)
    for idx in range(K * K):
        kh, kw = divmod(idx, K)
        slab = h1_ref[:, pl.ds(kh, OH2), pl.ds(kw, OH2), :]       # (BT,8,8,8)
        lhs = slab.reshape(M2, C1P).astype(jnp.bfloat16)
        acc2 = acc2 + jnp.dot(lhs, w2_ref[idx],
                              preferred_element_type=jnp.float32)  # (M2,16)
    y2_ref[...] = acc2.reshape(BT, OH2, OH2, C2)

    # ---- pool2 + bias + relu fused with the fc1 contraction ----
    a = jnp.zeros((BT, LANES), jnp.float32)
    for s in range(PH2 * PH2):
        ph, pw = divmod(s, PH2)
        v = jnp.maximum(
            jnp.maximum(y2_ref[:, 2 * ph, 2 * pw, :],
                        y2_ref[:, 2 * ph, 2 * pw + 1, :]),
            jnp.maximum(y2_ref[:, 2 * ph + 1, 2 * pw, :],
                        y2_ref[:, 2 * ph + 1, 2 * pw + 1, :]))
        v = jnp.maximum(v + b2_ref[...], 0.0)                     # (BT,16)
        a = a + jnp.dot(v.astype(jnp.bfloat16), wf1_ref[s],
                        preferred_element_type=jnp.float32)       # (BT,128)

    # ---- fc1 relu, fc2 relu, fc3 (all lane-dense 128-wide) ----
    a = jnp.maximum(a + bf1_ref[...], 0.0)
    a = jnp.maximum(
        jnp.dot(a.astype(jnp.bfloat16), wf2_ref[...],
                preferred_element_type=jnp.float32) + bf2_ref[...], 0.0)
    o_ref[0] = (jnp.dot(a.astype(jnp.bfloat16), wf3_ref[...],
                        preferred_element_type=jnp.float32) + bf3_ref[...])


# --------------------------- parameter preparation -------------------------


def _pad_to(a, shape):
    return jnp.pad(a, [(0, t - s) for s, t in zip(a.shape, shape)])


def init_params(key, num_classes=9):
    # identical parameter shapes / layouts as the PyTorch module
    ks = jax.random.split(key, 10)
    s = 0.1
    return {
        "conv1_w": s * jax.random.normal(ks[0], (6, 3, 5, 5), jnp.float32),
        "conv1_b": s * jax.random.normal(ks[1], (6,), jnp.float32),
        "conv2_w": s * jax.random.normal(ks[2], (16, 6, 5, 5), jnp.float32),
        "conv2_b": s * jax.random.normal(ks[3], (16,), jnp.float32),
        "fc1_w": s * jax.random.normal(ks[4], (120, 16 * 4 * 4), jnp.float32),
        "fc1_b": s * jax.random.normal(ks[5], (120,), jnp.float32),
        "fc2_w": s * jax.random.normal(ks[6], (84, 120), jnp.float32),
        "fc2_b": s * jax.random.normal(ks[7], (84,), jnp.float32),
        "fc3_w": s * jax.random.normal(ks[8], (num_classes, 84), jnp.float32),
        "fc3_b": s * jax.random.normal(ks[9], (num_classes,), jnp.float32),
    }


def prepare_params(params):
    """One-time prep (init time): transpose to matmul layouts, pad only where
    required, cast matmul weights to bf16 (single-pass MXU, half the HBM)."""
    nc = params["fc3_w"].shape[0]
    w1 = params["conv1_w"]     # (6, 3, 5, 5)  OIHW
    w2 = params["conv2_w"]     # (16, 6, 5, 5)
    f1 = params["fc1_w"]       # (120, 256), torch flatten index = c*16 + h*4 + w

    # conv1 im2col weight: rows ordered (kh, kw, cin) to match the wrapper's
    # patch extraction; out channels padded 6 -> 8.
    w1p = jnp.transpose(w1, (2, 3, 1, 0)).reshape(K * K * CIN, 6)
    w1p = _pad_to(w1p, (K * K * CIN, C1P)).astype(jnp.bfloat16)

    # conv2 per-tap weights: (kh*5+kw, cin 6->8, cout 16)
    w2p = jnp.transpose(w2, (2, 3, 1, 0)).reshape(K * K, 6, C2)
    w2p = _pad_to(w2p, (K * K, C1P, C2)).astype(jnp.bfloat16)

    # fc1 regrouped per pooled spatial position: (h*4+w, c(16), out 120->128)
    wf1p = jnp.transpose(f1.reshape(120, 16, PH2, PH2),
                         (2, 3, 1, 0)).reshape(PH2 * PH2, 16, 120)
    wf1p = _pad_to(wf1p, (PH2 * PH2, 16, LANES)).astype(jnp.bfloat16)

    prep = {
        "w1p": w1p,
        "b1p": _pad_to(params["conv1_b"].reshape(1, 6), (1, C1P)),
        "w2p": w2p,
        "b2p": params["conv2_b"].reshape(1, C2),
        "wf1p": wf1p,
        "bf1p": _pad_to(params["fc1_b"].reshape(1, 120), (1, LANES)),
        "wf2p": _pad_to(params["fc2_w"].T, (LANES, LANES)).astype(jnp.bfloat16),
        "bf2p": _pad_to(params["fc2_b"].reshape(1, 84), (1, LANES)),
        "wf3p": _pad_to(params["fc3_w"].T, (LANES, LANES)).astype(jnp.bfloat16),
        "bf3p": _pad_to(params["fc3_b"].reshape(1, nc), (1, LANES)),
    }
    return prep, nc


# --------------------------------- forward ---------------------------------


@functools.partial(jax.jit, static_argnames=("num_classes",))
def lenet2_forward(prep, x, *, num_classes=9):
    """x: (B, 3, 28, 28) NCHW float32 -> logits (B, num_classes)."""
    B = x.shape[0]
    assert x.shape[1:] == (CIN, H_IN, H_IN), x.shape

    # batch tile / grid: >=2 grid steps whenever B >= 2 (megacore on v7x,
    # DMA/compute pipelining everywhere), tile capped at 8 samples.
    bt = max(1, min(8, B // 2))
    nb = -(-B // bt)
    b_pad = nb * bt
    if b_pad != B:
        x = jnp.pad(x, ((0, b_pad - B), (0, 0), (0, 0), (0, 0)))

    # conv1 im2col in the wrapper (XLA): (B*24*24, 75) bf16.  Columns are
    # ordered (kh, kw, cin) to match w1p.  This bf16 patch matrix is smaller
    # in (tiled) HBM than a lane-padded NHWC input would be and lets the
    # kernel do conv1 as a single MXU dot.
    xn = jnp.transpose(x, (0, 2, 3, 1))                            # (Bp,28,28,3)
    cols = [xn[:, kh:kh + OH1, kw:kw + OH1, :]
            for kh in range(K) for kw in range(K)]
    xcol = jnp.concatenate(cols, axis=-1)                          # (Bp,24,24,75)
    xcol = xcol.reshape(b_pad * OH1 * OH1, K * K * CIN).astype(jnp.bfloat16)

    m_tile = bt * OH1 * OH1

    out = pl.pallas_call(
        _lenet2_kernel,
        out_shape=jax.ShapeDtypeStruct((nb, bt, LANES), jnp.float32),
        grid=(nb,),
        in_specs=[
            pl.BlockSpec((m_tile, K * K * CIN), lambda b: (b, 0)),     # xcol
            pl.BlockSpec((K * K * CIN, C1P), lambda b: (0, 0)),        # w1p
            pl.BlockSpec((1, C1P), lambda b: (0, 0)),                  # b1p
            pl.BlockSpec((K * K, C1P, C2), lambda b: (0, 0, 0)),       # w2p
            pl.BlockSpec((1, C2), lambda b: (0, 0)),                   # b2p
            pl.BlockSpec((PH2 * PH2, 16, LANES), lambda b: (0, 0, 0)),  # wf1p
            pl.BlockSpec((1, LANES), lambda b: (0, 0)),                # bf1p
            pl.BlockSpec((LANES, LANES), lambda b: (0, 0)),            # wf2p
            pl.BlockSpec((1, LANES), lambda b: (0, 0)),                # bf2p
            pl.BlockSpec((LANES, LANES), lambda b: (0, 0)),            # wf3p
            pl.BlockSpec((1, LANES), lambda b: (0, 0)),                # bf3p
        ],
        out_specs=pl.BlockSpec((1, bt, LANES), lambda b: (b, 0, 0)),
        scratch_shapes=[
            pltpu.VMEM((bt, OH1, OH1, C1P), jnp.float32),   # conv1 pre-activation
            pltpu.VMEM((bt, PH1, PH1, C1P), jnp.float32),   # pooled conv1 act.
            pltpu.VMEM((bt, OH2, OH2, C2), jnp.float32),    # conv2 pre-activation
        ],
        compiler_params=pltpu.CompilerParams(
            dimension_semantics=("parallel",)),
    )(xcol, prep["w1p"], prep["b1p"], prep["w2p"], prep["b2p"],
      prep["wf1p"], prep["bf1p"], prep["wf2p"], prep["bf2p"],
      prep["wf3p"], prep["bf3p"])

    return out.reshape(nb * bt, LANES)[:B, :num_classes]


# ------------------------------ pure-JAX reference -------------------------


def lenet2_reference(params, x):
    dn = ("NCHW", "OIHW", "NCHW")

    def conv(x, w, b):
        y = jax.lax.conv_general_dilated(x, w, (1, 1), "VALID",
                                         dimension_numbers=dn)
        return y + b.reshape(1, -1, 1, 1)

    def pool(x):
        return jax.lax.reduce_window(x, -jnp.inf, jax.lax.max,
                                     (1, 1, 2, 2), (1, 1, 2, 2), "VALID")

    x = pool(jax.nn.relu(conv(x, params["conv1_w"], params["conv1_b"])))
    x = pool(jax.nn.relu(conv(x, params["conv2_w"], params["conv2_b"])))
    x = x.reshape(x.shape[0], -1)
    x = jax.nn.relu(x @ params["fc1_w"].T + params["fc1_b"])
    x = jax.nn.relu(x @ params["fc2_w"].T + params["fc2_b"])
    return x @ params["fc3_w"].T + params["fc3_b"]


if __name__ == "__main__":
    key = jax.random.PRNGKey(0)
    pkey, xkey = jax.random.split(key)
    params = init_params(pkey, num_classes=9)
    prep, nc = prepare_params(params)

    # batch=2; 28x28 spatial is dictated by the module (fc1 expects 16*4*4)
    x = jax.random.normal(xkey, (2, 3, 28, 28), jnp.float32)

    out = jax.block_until_ready(lenet2_forward(prep, x, num_classes=nc))
    ref = jax.block_until_ready(lenet2_reference(params, x))

    assert out.shape == (2, 9), out.shape
    err = float(jnp.max(jnp.abs(out - ref)))
    # Tolerance 5e-2: the kernel runs every matmul with bf16 operands
    # (single-pass MXU) while the reference is f32, so ~0.3% relative rounding
    # per layer is expected.  Layout/indexing bugs would produce O(1) errors,
    # which this check still catches.
    assert err < 5e-2, f"mismatch vs reference, max abs err = {err}"

    print("KERNEL_OK")
</pallas_src>

<mosaic_0001>
module attributes {stable_mosaic.version = 11 : i64} {
  func.func @_lenet2_kernel(%arg0: i32, %arg1: memref<576x75xbf16, #tpu.memory_space<vmem>>, %arg2: memref<75x8xbf16, #tpu.memory_space<vmem>>, %arg3: memref<1x8xf32, #tpu.memory_space<vmem>>, %arg4: memref<25x8x16xbf16, #tpu.memory_space<vmem>>, %arg5: memref<1x16xf32, #tpu.memory_space<vmem>>, %arg6: memref<16x16x128xbf16, #tpu.memory_space<vmem>>, %arg7: memref<1x128xf32, #tpu.memory_space<vmem>>, %arg8: memref<128x128xbf16, #tpu.memory_space<vmem>>, %arg9: memref<1x128xf32, #tpu.memory_space<vmem>>, %arg10: memref<128x128xbf16, #tpu.memory_space<vmem>>, %arg11: memref<1x128xf32, #tpu.memory_space<vmem>>, %arg12: memref<1x1x128xf32, #tpu.memory_space<vmem>>, %arg13: memref<1x24x24x8xf32, #tpu.memory_space<vmem>>, %arg14: memref<1x12x12x8xf32, #tpu.memory_space<vmem>>, %arg15: memref<1x8x8x16xf32, #tpu.memory_space<vmem>>) attributes {dimension_semantics = [#tpu.dimension_semantics<parallel>], iteration_bounds = array<i64: 2>, scalar_prefetch = 0 : i64, scratch_operands = 3 : i64, tpu.core_type = #tpu.core_type<tc>, window_params = [{transform_indices = @transform_0, window_bounds = array<i64: 576, 75>}, {pipeline_mode = #tpu.pipeline_mode<synchronous>, transform_indices = @transform_1, window_bounds = array<i64: 75, 8>}, {pipeline_mode = #tpu.pipeline_mode<synchronous>, transform_indices = @transform_2, window_bounds = array<i64: 1, 8>}, {pipeline_mode = #tpu.pipeline_mode<synchronous>, transform_indices = @transform_3, window_bounds = array<i64: 25, 8, 16>}, {pipeline_mode = #tpu.pipeline_mode<synchronous>, transform_indices = @transform_4, window_bounds = array<i64: 1, 16>}, {pipeline_mode = #tpu.pipeline_mode<synchronous>, transform_indices = @transform_5, window_bounds = array<i64: 16, 16, 128>}, {pipeline_mode = #tpu.pipeline_mode<synchronous>, transform_indices = @transform_6, window_bounds = array<i64: 1, 128>}, {pipeline_mode = #tpu.pipeline_mode<synchronous>, transform_indices = @transform_7, window_bounds = array<i64: 128, 128>}, {pipeline_mode = #tpu.pipeline_mode<synchronous>, transform_indices = @transform_8, window_bounds = array<i64: 1, 128>}, {pipeline_mode = #tpu.pipeline_mode<synchronous>, transform_indices = @transform_9, window_bounds = array<i64: 128, 128>}, {pipeline_mode = #tpu.pipeline_mode<synchronous>, transform_indices = @transform_10, window_bounds = array<i64: 1, 128>}, {transform_indices = @transform_11, window_bounds = array<i64: 1, 1, 128>}]} {
    %c0 = arith.constant 0 : index
    %c0_0 = arith.constant 0 : index
    %0 = vector.load %arg1[%c0, %c0_0] : memref<576x75xbf16, #tpu.memory_space<vmem>>, vector<576x75xbf16>
    %c0_1 = arith.constant 0 : index
    %c0_2 = arith.constant 0 : index
    %1 = vector.load %arg2[%c0_1, %c0_2] : memref<75x8xbf16, #tpu.memory_space<vmem>>, vector<75x8xbf16>
    %cst = arith.constant dense<0.000000e+00> : vector<576x8xf32>
    %2 = tpu.matmul %0, %1, %cst {dimension_numbers = #tpu.dot_dimension_numbers<[1], [0], [0], [1], [0, 0, 1, 1], [], []>} : vector<576x75xbf16>, vector<75x8xbf16>, vector<576x8xf32> -> vector<576x8xf32>
    %3 = vector.shape_cast %2 : vector<576x8xf32> to vector<1x24x24x8xf32>
    %c0_3 = arith.constant 0 : index
    %c0_4 = arith.constant 0 : index
    %c0_5 = arith.constant 0 : index
    %c0_6 = arith.constant 0 : index
    %4 = vector.load %arg13[%c0_3, %c0_4, %c0_5, %c0_6] : memref<1x24x24x8xf32, #tpu.memory_space<vmem>>, vector<1x24x24x8xf32>
    tpu.vector_store %arg13[%c0_3, %c0_4, %c0_5, %c0_6], %3 {strides = array<i32>} : memref<1x24x24x8xf32, #tpu.memory_space<vmem>>, vector<1x24x24x8xf32>,
    %c0_7 = arith.constant 0 : index
    %c0_8 = arith.constant 0 : index
    %c0_9 = arith.constant 0 : index
    %c0_10 = arith.constant 0 : index
    %5 = tpu.strided_load %arg13[%c0_7, %c0_8, %c0_9, %c0_10] {strides = array<i32: 1, 2, 2, 1>} : memref<1x24x24x8xf32, #tpu.memory_space<vmem>>, vector<1x12x12x8xf32>
    %c0_11 = arith.constant 0 : index
    %c0_12 = arith.constant 0 : index
    %c1 = arith.constant 1 : index
    %c0_13 = arith.constant 0 : index
    %6 = tpu.strided_load %arg13[%c0_11, %c0_12, %c1, %c0_13] {strides = array<i32: 1, 2, 2, 1>} : memref<1x24x24x8xf32, #tpu.memory_space<vmem>>, vector<1x12x12x8xf32>
    %7 = arith.maximumf %5, %6 : vector<1x12x12x8xf32>
    %c0_14 = arith.constant 0 : index
    %c1_15 = arith.constant 1 : index
    %c0_16 = arith.constant 0 : index
    %c0_17 = arith.constant 0 : index
    %8 = tpu.strided_load %arg13[%c0_14, %c1_15, %c0_16, %c0_17] {strides = array<i32: 1, 2, 2, 1>} : memref<1x24x24x8xf32, #tpu.memory_space<vmem>>, vector<1x12x12x8xf32>
    %c0_18 = arith.constant 0 : index
    %c1_19 = arith.constant 1 : index
    %c1_20 = arith.constant 1 : index
    %c0_21 = arith.constant 0 : index
    %9 = tpu.strided_load %arg13[%c0_18, %c1_19, %c1_20, %c0_21] {strides = array<i32: 1, 2, 2, 1>} : memref<1x24x24x8xf32, #tpu.memory_space<vmem>>, vector<1x12x12x8xf32>
    %10 = arith.maximumf %8, %9 : vector<1x12x12x8xf32>
    %11 = arith.maximumf %7, %10 : vector<1x12x12x8xf32>
    %c0_22 = arith.constant 0 : index
    %c0_23 = arith.constant 0 : index
    %12 = vector.load %arg3[%c0_22, %c0_23] : memref<1x8xf32, #tpu.memory_space<vmem>>, vector<1x8xf32>
    %13 = vector.shape_cast %12 : vector<1x8xf32> to vector<1x1x1x8xf32>
    %14 = vector.broadcast %13 : vector<1x1x1x8xf32> to vector<1x12x12x8xf32>
    %15 = arith.addf %11, %14 : vector<1x12x12x8xf32>
    %cst_24 = arith.constant 0.000000e+00 : f32
    %16 = vector.broadcast %cst_24 : f32 to vector<1x12x12x8xf32>
    %17 = arith.maximumf %15, %16 : vector<1x12x12x8xf32>
    %c0_25 = arith.constant 0 : index
    %c0_26 = arith.constant 0 : index
    %c0_27 = arith.constant 0 : index
    %c0_28 = arith.constant 0 : index
    %18 = vector.load %arg14[%c0_25, %c0_26, %c0_27, %c0_28] : memref<1x12x12x8xf32, #tpu.memory_space<vmem>>, vector<1x12x12x8xf32>
    tpu.vector_store %arg14[%c0_25, %c0_26, %c0_27, %c0_28], %17 {strides = array<i32>} : memref<1x12x12x8xf32, #tpu.memory_space<vmem>>, vector<1x12x12x8xf32>,
    %cst_29 = arith.constant 0.000000e+00 : f32
    %19 = vector.broadcast %cst_29 : f32 to vector<64x16xf32>
    %c0_30 = arith.constant 0 : index
    %c0_31 = arith.constant 0 : index
    %c0_32 = arith.constant 0 : index
    %c0_33 = arith.constant 0 : index
    %20 = vector.load %arg14[%c0_30, %c0_31, %c0_32, %c0_33] : memref<1x12x12x8xf32, #tpu.memory_space<vmem>>, vector<1x8x8x8xf32>
    %21 = vector.shape_cast %20 : vector<1x8x8x8xf32> to vector<64x8xf32>
    %22 = arith.truncf %21 : vector<64x8xf32> to vector<64x8xbf16>
    %c0_34 = arith.constant 0 : index
    %c0_35 = arith.constant 0 : index
    %c0_36 = arith.constant 0 : index
    %23 = vector.load %arg4[%c0_34, %c0_35, %c0_36] : memref<25x8x16xbf16, #tpu.memory_space<vmem>>, vector<1x8x16xbf16>
    %24 = vector.shape_cast %23 : vector<1x8x16xbf16> to vector<8x16xbf16>
    %cst_37 = arith.constant dense<0.000000e+00> : vector<64x16xf32>
    %25 = tpu.matmul %22, %24, %cst_37 {dimension_numbers = #tpu.dot_dimension_numbers<[1], [0], [0], [1], [0, 0, 1, 1], [], []>} : vector<64x8xbf16>, vector<8x16xbf16>, vector<64x16xf32> -> vector<64x16xf32>
    %26 = arith.addf %19, %25 : vector<64x16xf32>
    %c0_38 = arith.constant 0 : index
    %c0_39 = arith.constant 0 : index
    %c1_40 = arith.constant 1 : index
    %c0_41 = arith.constant 0 : index
    %27 = vector.load %arg14[%c0_38, %c0_39, %c1_40, %c0_41] : memref<1x12x12x8xf32, #tpu.memory_space<vmem>>, vector<1x8x8x8xf32>
    %28 = vector.shape_cast %27 : vector<1x8x8x8xf32> to vector<64x8xf32>
    %29 = arith.truncf %28 : vector<64x8xf32> to vector<64x8xbf16>
    %c1_42 = arith.constant 1 : index
    %c0_43 = arith.constant 0 : index
    %c0_44 = arith.constant 0 : index
    %30 = vector.load %arg4[%c1_42, %c0_43, %c0_44] : memref<25x8x16xbf16, #tpu.memory_space<vmem>>, vector<1x8x16xbf16>
    %31 = vector.shape_cast %30 : vector<1x8x16xbf16> to vector<8x16xbf16>
    %cst_45 = arith.constant dense<0.000000e+00> : vector<64x16xf32>
    %32 = tpu.matmul %29, %31, %cst_45 {dimension_numbers = #tpu.dot_dimension_numbers<[1], [0], [0], [1], [0, 0, 1, 1], [], []>} : vector<64x8xbf16>, vector<8x16xbf16>, vector<64x16xf32> -> vector<64x16xf32>
    %33 = arith.addf %26, %32 : vector<64x16xf32>
    %c0_46 = arith.constant 0 : index
    %c0_47 = arith.constant 0 : index
    %c2 = arith.constant 2 : index
    %c0_48 = arith.constant 0 : index
    %34 = vector.load %arg14[%c0_46, %c0_47, %c2, %c0_48] : memref<1x12x12x8xf32, #tpu.memory_space<vmem>>, vector<1x8x8x8xf32>
    %35 = vector.shape_cast %34 : vector<1x8x8x8xf32> to vector<64x8xf32>
    %36 = arith.truncf %35 : vector<64x8xf32> to vector<64x8xbf16>
    %c2_49 = arith.constant 2 : index
    %c0_50 = arith.constant 0 : index
    %c0_51 = arith.constant 0 : index
    %37 = vector.load %arg4[%c2_49, %c0_50, %c0_51] : memref<25x8x16xbf16, #tpu.memory_space<vmem>>, vector<1x8x16xbf16>
    %38 = vector.shape_cast %37 : vector<1x8x16xbf16> to vector<8x16xbf16>
    %cst_52 = arith.constant dense<0.000000e+00> : vector<64x16xf32>
    %39 = tpu.matmul %36, %38, %cst_52 {dimension_numbers = #tpu.dot_dimension_numbers<[1], [0], [0], [1], [0, 0, 1, 1], [], []>} : vector<64x8xbf16>, vector<8x16xbf16>, vector<64x16xf32> -> vector<64x16xf32>
    %40 = arith.addf %33, %39 : vector<64x16xf32>
    %c0_53 = arith.constant 0 : index
    %c0_54 = arith.constant 0 : index
    %c3 = arith.constant 3 : index
    %c0_55 = arith.constant 0 : index
    %41 = vector.load %arg14[%c0_53, %c0_54, %c3, %c0_55] : memref<1x12x12x8xf32, #tpu.memory_space<vmem>>, vector<1x8x8x8xf32>
    %42 = vector.shape_cast %41 : vector<1x8x8x8xf32> to vector<64x8xf32>
    %43 = arith.truncf %42 : vector<64x8xf32> to vector<64x8xbf16>
    %c3_56 = arith.constant 3 : index
    %c0_57 = arith.constant 0 : index
    %c0_58 = arith.constant 0 : index
    %44 = vector.load %arg4[%c3_56, %c0_57, %c0_58] : memref<25x8x16xbf16, #tpu.memory_space<vmem>>, vector<1x8x16xbf16>
    %45 = vector.shape_cast %44 : vector<1x8x16xbf16> to vector<8x16xbf16>
    %cst_59 = arith.constant dense<0.000000e+00> : vector<64x16xf32>
    %46 = tpu.matmul %43, %45, %cst_59 {dimension_numbers = #tpu.dot_dimension_numbers<[1], [0], [0], [1], [0, 0, 1, 1], [], []>} : vector<64x8xbf16>, vector<8x16xbf16>, vector<64x16xf32> -> vector<64x16xf32>
    %47 = arith.addf %40, %46 : vector<64x16xf32>
    %c0_60 = arith.constant 0 : index
    %c0_61 = arith.constant 0 : index
    %c4 = arith.constant 4 : index
    %c0_62 = arith.constant 0 : index
    %48 = vector.load %arg14[%c0_60, %c0_61, %c4, %c0_62] : memref<1x12x12x8xf32, #tpu.memory_space<vmem>>, vector<1x8x8x8xf32>
    %49 = vector.shape_cast %48 : vector<1x8x8x8xf32> to vector<64x8xf32>
    %50 = arith.truncf %49 : vector<64x8xf32> to vector<64x8xbf16>
    %c4_63 = arith.constant 4 : index
    %c0_64 = arith.constant 0 : index
    %c0_65 = arith.constant 0 : index
    %51 = vector.load %arg4[%c4_63, %c0_64, %c0_65] : memref<25x8x16xbf16, #tpu.memory_space<vmem>>, vector<1x8x16xbf16>
    %52 = vector.shape_cast %51 : vector<1x8x16xbf16> to vector<8x16xbf16>
    %cst_66 = arith.constant dense<0.000000e+00> : vector<64x16xf32>
    %53 = tpu.matmul %50, %52, %cst_66 {dimension_numbers = #tpu.dot_dimension_numbers<[1], [0], [0], [1], [0, 0, 1, 1], [], []>} : vector<64x8xbf16>, vector<8x16xbf16>, vector<64x16xf32> -> vector<64x16xf32>
    %54 = arith.addf %47, %53 : vector<64x16xf32>
    %c0_67 = arith.constant 0 : index
    %c1_68 = arith.constant 1 : index
    %c0_69 = arith.constant 0 : index
    %c0_70 = arith.constant 0 : index
    %55 = vector.load %arg14[%c0_67, %c1_68, %c0_69, %c0_70] : memref<1x12x12x8xf32, #tpu.memory_space<vmem>>, vector<1x8x8x8xf32>
    %56 = vector.shape_cast %55 : vector<1x8x8x8xf32> to vector<64x8xf32>
    %57 = arith.truncf %56 : vector<64x8xf32> to vector<64x8xbf16>
    %c5 = arith.constant 5 : index
    %c0_71 = arith.constant 0 : index
    %c0_72 = arith.constant 0 : index
    %58 = vector.load %arg4[%c5, %c0_71, %c0_72] : memref<25x8x16xbf16, #tpu.memory_space<vmem>>, vector<1x8x16xbf16>
    %59 = vector.shape_cast %58 : vector<1x8x16xbf16> to vector<8x16xbf16>
    %cst_73 = arith.constant dense<0.000000e+00> : vector<64x16xf32>
    %60 = tpu.matmul %57, %59, %cst_73 {dimension_numbers = #tpu.dot_dimension_numbers<[1], [0], [0], [1], [0, 0, 1, 1], [], []>} : vector<64x8xbf16>, vector<8x16xbf16>, vector<64x16xf32> -> vector<64x16xf32>
    %61 = arith.addf %54, %60 : vector<64x16xf32>
    %c0_74 = arith.constant 0 : index
    %c1_75 = arith.constant 1 : index
    %c1_76 = arith.constant 1 : index
    %c0_77 = arith.constant 0 : index
    %62 = vector.load %arg14[%c0_74, %c1_75, %c1_76, %c0_77] : memref<1x12x12x8xf32, #tpu.memory_space<vmem>>, vector<1x8x8x8xf32>
    %63 = vector.shape_cast %62 : vector<1x8x8x8xf32> to vector<64x8xf32>
    %64 = arith.truncf %63 : vector<64x8xf32> to vector<64x8xbf16>
    %c6 = arith.constant 6 : index
    %c0_78 = arith.constant 0 : index
    %c0_79 = arith.constant 0 : index
    %65 = vector.load %arg4[%c6, %c0_78, %c0_79] : memref<25x8x16xbf16, #tpu.memory_space<vmem>>, vector<1x8x16xbf16>
    %66 = vector.shape_cast %65 : vector<1x8x16xbf16> to vector<8x16xbf16>
    %cst_80 = arith.constant dense<0.000000e+00> : vector<64x16xf32>
    %67 = tpu.matmul %64, %66, %cst_80 {dimension_numbers = #tpu.dot_dimension_numbers<[1], [0], [0], [1], [0, 0, 1, 1], [], []>} : vector<64x8xbf16>, vector<8x16xbf16>, vector<64x16xf32> -> vector<64x16xf32>
    %68 = arith.addf %61, %67 : vector<64x16xf32>
    %c0_81 = arith.constant 0 : index
    %c1_82 = arith.constant 1 : index
    %c2_83 = arith.constant 2 : index
    %c0_84 = arith.constant 0 : index
    %69 = vector.load %arg14[%c0_81, %c1_82, %c2_83, %c0_84] : memref<1x12x12x8xf32, #tpu.memory_space<vmem>>, vector<1x8x8x8xf32>
    %70 = vector.shape_cast %69 : vector<1x8x8x8xf32> to vector<64x8xf32>
    %71 = arith.truncf %70 : vector<64x8xf32> to vector<64x8xbf16>
    %c7 = arith.constant 7 : index
    %c0_85 = arith.constant 0 : index
    %c0_86 = arith.constant 0 : index
    %72 = vector.load %arg4[%c7, %c0_85, %c0_86] : memref<25x8x16xbf16, #tpu.memory_space<vmem>>, vector<1x8x16xbf16>
    %73 = vector.shape_cast %72 : vector<1x8x16xbf16> to vector<8x16xbf16>
    %cst_87 = arith.constant dense<0.000000e+00> : vector<64x16xf32>
    %74 = tpu.matmul %71, %73, %cst_87 {dimension_numbers = #tpu.dot_dimension_numbers<[1], [0], [0], [1], [0, 0, 1, 1], [], []>} : vector<64x8xbf16>, vector<8x16xbf16>, vector<64x16xf32> -> vector<64x16xf32>
    %75 = arith.addf %68, %74 : vector<64x16xf32>
    %c0_88 = arith.constant 0 : index
    %c1_89 = arith.constant 1 : index
    %c3_90 = arith.constant 3 : index
    %c0_91 = arith.constant 0 : index
    %76 = vector.load %arg14[%c0_88, %c1_89, %c3_90, %c0_91] : memref<1x12x12x8xf32, #tpu.memory_space<vmem>>, vector<1x8x8x8xf32>
    %77 = vector.shape_cast %76 : vector<1x8x8x8xf32> to vector<64x8xf32>
    %78 = arith.truncf %77 : vector<64x8xf32> to vector<64x8xbf16>
    %c8 = arith.constant 8 : index
    %c0_92 = arith.constant 0 : index
    %c0_93 = arith.constant 0 : index
    %79 = vector.load %arg4[%c8, %c0_92, %c0_93] : memref<25x8x16xbf16, #tpu.memory_space<vmem>>, vector<1x8x16xbf16>
    %80 = vector.shape_cast %79 : vector<1x8x16xbf16> to vector<8x16xbf16>
    %cst_94 = arith.constant dense<0.000000e+00> : vector<64x16xf32>
    %81 = tpu.matmul %78, %80, %cst_94 {dimension_numbers = #tpu.dot_dimension_numbers<[1], [0], [0], [1], [0, 0, 1, 1], [], []>} : vector<64x8xbf16>, vector<8x16xbf16>, vector<64x16xf32> -> vector<64x16xf32>
    %82 = arith.addf %75, %81 : vector<64x16xf32>
    %c0_95 = arith.constant 0 : index
    %c1_96 = arith.constant 1 : index
    %c4_97 = arith.constant 4 : index
    %c0_98 = arith.constant 0 : index
    %83 = vector.load %arg14[%c0_95, %c1_96, %c4_97, %c0_98] : memref<1x12x12x8xf32, #tpu.memory_space<vmem>>, vector<1x8x8x8xf32>
    %84 = vector.shape_cast %83 : vector<1x8x8x8xf32> to vector<64x8xf32>
    %85 = arith.truncf %84 : vector<64x8xf32> to vector<64x8xbf16>
    %c9 = arith.constant 9 : index
    %c0_99 = arith.constant 0 : index
    %c0_100 = arith.constant 0 : index
    %86 = vector.load %arg4[%c9, %c0_99, %c0_100] : memref<25x8x16xbf16, #tpu.memory_space<vmem>>, vector<1x8x16xbf16>
    %87 = vector.shape_cast %86 : vector<1x8x16xbf16> to vector<8x16xbf16>
    %cst_101 = arith.constant dense<0.000000e+00> : vector<64x16xf32>
    %88 = tpu.matmul %85, %87, %cst_101 {dimension_numbers = #tpu.dot_dimension_numbers<[1], [0], [0], [1], [0, 0, 1, 1], [], []>} : vector<64x8xbf16>, vector<8x16xbf16>, vector<64x16xf32> -> vector<64x16xf32>
    %89 = arith.addf %82, %88 : vector<64x16xf32>
    %c0_102 = arith.constant 0 : index
    %c2_103 = arith.constant 2 : index
    %c0_104 = arith.constant 0 : index
    %c0_105 = arith.constant 0 : index
    %90 = vector.load %arg14[%c0_102, %c2_103, %c0_104, %c0_105] : memref<1x12x12x8xf32, #tpu.memory_space<vmem>>, vector<1x8x8x8xf32>
    %91 = vector.shape_cast %90 : vector<1x8x8x8xf32> to vector<64x8xf32>
    %92 = arith.truncf %91 : vector<64x8xf32> to vector<64x8xbf16>
    %c10 = arith.constant 10 : index
    %c0_106 = arith.constant 0 : index
    %c0_107 = arith.constant 0 : index
    %93 = vector.load %arg4[%c10, %c0_106, %c0_107] : memref<25x8x16xbf16, #tpu.memory_space<vmem>>, vector<1x8x16xbf16>
    %94 = vector.shape_cast %93 : vector<1x8x16xbf16> to vector<8x16xbf16>
    %cst_108 = arith.constant dense<0.000000e+00> : vector<64x16xf32>
    %95 = tpu.matmul %92, %94, %cst_108 {dimension_numbers = #tpu.dot_dimension_numbers<[1], [0], [0], [1], [0, 0, 1, 1], [], []>} : vector<64x8xbf16>, vector<8x16xbf16>, vector<64x16xf32> -> vector<64x16xf32>
    %96 = arith.addf %89, %95 : vector<64x16xf32>
    %c0_109 = arith.constant 0 : index
    %c2_110 = arith.constant 2 : index
    %c1_111 = arith.constant 1 : index
    %c0_112 = arith.constant 0 : index
    %97 = vector.load %arg14[%c0_109, %c2_110, %c1_111, %c0_112] : memref<1x12x12x8xf32, #tpu.memory_space<vmem>>, vector<1x8x8x8xf32>
    %98 = vector.shape_cast %97 : vector<1x8x8x8xf32> to vector<64x8xf32>
    %99 = arith.truncf %98 : vector<64x8xf32> to vector<64x8xbf16>
    %c11 = arith.constant 11 : index
    %c0_113 = arith.constant 0 : index
    %c0_114 = arith.constant 0 : index
    %100 = vector.load %arg4[%c11, %c0_113, %c0_114] : memref<25x8x16xbf16, #tpu.memory_space<vmem>>, vector<1x8x16xbf16>
    %101 = vector.shape_cast %100 : vector<1x8x16xbf16> to vector<8x16xbf16>
    %cst_115 = arith.constant dense<0.000000e+00> : vector<64x16xf32>
    %102 = tpu.matmul %99, %101, %cst_115 {dimension_numbers = #tpu.dot_dimension_numbers<[1], [0], [0], [1], [0, 0, 1, 1], [], []>} : vector<64x8xbf16>, vector<8x16xbf16>, vector<64x16xf32> -> vector<64x16xf32>
    %103 = arith.addf %96, %102 : vector<64x16xf32>
    %c0_116 = arith.constant 0 : index
    %c2_117 = arith.constant 2 : index
    %c2_118 = arith.constant 2 : index
    %c0_119 = arith.constant 0 : index
    %104 = vector.load %arg14[%c0_116, %c2_117, %c2_118, %c0_119] : memref<1x12x12x8xf32, #tpu.memory_space<vmem>>, vector<1x8x8x8xf32>
    %105 = vector.shape_cast %104 : vector<1x8x8x8xf32> to vector<64x8xf32>
    %106 = arith.truncf %105 : vector<64x8xf32> to vector<64x8xbf16>
    %c12 = arith.constant 12 : index
    %c0_120 = arith.constant 0 : index
    %c0_121 = arith.constant 0 : index
    %107 = vector.load %arg4[%c12, %c0_120, %c0_121] : memref<25x8x16xbf16, #tpu.memory_space<vmem>>, vector<1x8x16xbf16>
    %108 = vector.shape_cast %107 : vector<1x8x16xbf16> to vector<8x16xbf16>
    %cst_122 = arith.constant dense<0.000000e+00> : vector<64x16xf32>
    %109 = tpu.matmul %106, %108, %cst_122 {dimension_numbers = #tpu.dot_dimension_numbers<[1], [0], [0], [1], [0, 0, 1, 1], [], []>} : vector<64x8xbf16>, vector<8x16xbf16>, vector<64x16xf32> -> vector<64x16xf32>
    %110 = arith.addf %103, %109 : vector<64x16xf32>
    %c0_123 = arith.constant 0 : index
    %c2_124 = arith.constant 2 : index
    %c3_125 = arith.constant 3 : index
    %c0_126 = arith.constant 0 : index
    %111 = vector.load %arg14[%c0_123, %c2_124, %c3_125, %c0_126] : memref<1x12x12x8xf32, #tpu.memory_space<vmem>>, vector<1x8x8x8xf32>
    %112 = vector.shape_cast %111 : vector<1x8x8x8xf32> to vector<64x8xf32>
    %113 = arith.truncf %112 : vector<64x8xf32> to vector<64x8xbf16>
    %c13 = arith.constant 13 : index
    %c0_127 = arith.constant 0 : index
    %c0_128 = arith.constant 0 : index
    %114 = vector.load %arg4[%c13, %c0_127, %c0_128] : memref<25x8x16xbf16, #tpu.memory_space<vmem>>, vector<1x8x16xbf16>
    %115 = vector.shape_cast %114 : vector<1x8x16xbf16> to vector<8x16xbf16>
    %cst_129 = arith.constant dense<0.000000e+00> : vector<64x16xf32>
    %116 = tpu.matmul %113, %115, %cst_129 {dimension_numbers = #tpu.dot_dimension_numbers<[1], [0], [0], [1], [0, 0, 1, 1], [], []>} : vector<64x8xbf16>, vector<8x16xbf16>, vector<64x16xf32> -> vector<64x16xf32>
    %117 = arith.addf %110, %116 : vector<64x16xf32>
    %c0_130 = arith.constant 0 : index
    %c2_131 = arith.constant 2 : index
    %c4_132 = arith.constant 4 : index
    %c0_133 = arith.constant 0 : index
    %118 = vector.load %arg14[%c0_130, %c2_131, %c4_132, %c0_133] : memref<1x12x12x8xf32, #tpu.memory_space<vmem>>, vector<1x8x8x8xf32>
    %119 = vector.shape_cast %118 : vector<1x8x8x8xf32> to vector<64x8xf32>
    %120 = arith.truncf %119 : vector<64x8xf32> to vector<64x8xbf16>
    %c14 = arith.constant 14 : index
    %c0_134 = arith.constant 0 : index
    %c0_135 = arith.constant 0 : index
    %121 = vector.load %arg4[%c14, %c0_134, %c0_135] : memref<25x8x16xbf16, #tpu.memory_space<vmem>>, vector<1x8x16xbf16>
    %122 = vector.shape_cast %121 : vector<1x8x16xbf16> to vector<8x16xbf16>
    %cst_136 = arith.constant dense<0.000000e+00> : vector<64x16xf32>
    %123 = tpu.matmul %120, %122, %cst_136 {dimension_numbers = #tpu.dot_dimension_numbers<[1], [0], [0], [1], [0, 0, 1, 1], [], []>} : vector<64x8xbf16>, vector<8x16xbf16>, vector<64x16xf32> -> vector<64x16xf32>
    %124 = arith.addf %117, %123 : vector<64x16xf32>
    %c0_137 = arith.constant 0 : index
    %c3_138 = arith.constant 3 : index
    %c0_139 = arith.constant 0 : index
    %c0_140 = arith.constant 0 : index
    %125 = vector.load %arg14[%c0_137, %c3_138, %c0_139, %c0_140] : memref<1x12x12x8xf32, #tpu.memory_space<vmem>>, vector<1x8x8x8xf32>
    %126 = vector.shape_cast %125 : vector<1x8x8x8xf32> to vector<64x8xf32>
    %127 = arith.truncf %126 : vector<64x8xf32> to vector<64x8xbf16>
    %c15 = arith.constant 15 : index
    %c0_141 = arith.constant 0 : index
    %c0_142 = arith.constant 0 : index
    %128 = vector.load %arg4[%c15, %c0_141, %c0_142] : memref<25x8x16xbf16, #tpu.memory_space<vmem>>, vector<1x8x16xbf16>
    %129 = vector.shape_cast %128 : vector<1x8x16xbf16> to vector<8x16xbf16>
    %cst_143 = arith.constant dense<0.000000e+00> : vector<64x16xf32>
    %130 = tpu.matmul %127, %129, %cst_143 {dimension_numbers = #tpu.dot_dimension_numbers<[1], [0], [0], [1], [0, 0, 1, 1], [], []>} : vector<64x8xbf16>, vector<8x16xbf16>, vector<64x16xf32> -> vector<64x16xf32>
    %131 = arith.addf %124, %130 : vector<64x16xf32>
    %c0_144 = arith.constant 0 : index
    %c3_145 = arith.constant 3 : index
    %c1_146 = arith.constant 1 : index
    %c0_147 = arith.constant 0 : index
    %132 = vector.load %arg14[%c0_144, %c3_145, %c1_146, %c0_147] : memref<1x12x12x8xf32, #tpu.memory_space<vmem>>, vector<1x8x8x8xf32>
    %133 = vector.shape_cast %132 : vector<1x8x8x8xf32> to vector<64x8xf32>
    %134 = arith.truncf %133 : vector<64x8xf32> to vector<64x8xbf16>
    %c16 = arith.constant 16 : index
    %c0_148 = arith.constant 0 : index
    %c0_149 = arith.constant 0 : index
    %135 = vector.load %arg4[%c16, %c0_148, %c0_149] : memref<25x8x16xbf16, #tpu.memory_space<vmem>>, vector<1x8x16xbf16>
    %136 = vector.shape_cast %135 : vector<1x8x16xbf16> to vector<8x16xbf16>
    %cst_150 = arith.constant dense<0.000000e+00> : vector<64x16xf32>
    %137 = tpu.matmul %134, %136, %cst_150 {dimension_numbers = #tpu.dot_dimension_numbers<[1], [0], [0], [1], [0, 0, 1, 1], [], []>} : vector<64x8xbf16>, vector<8x16xbf16>, vector<64x16xf32> -> vector<64x16xf32>
    %138 = arith.addf %131, %137 : vector<64x16xf32>
    %c0_151 = arith.constant 0 : index
    %c3_152 = arith.constant 3 : index
    %c2_153 = arith.constant 2 : index
    %c0_154 = arith.constant 0 : index
    %139 = vector.load %arg14[%c0_151, %c3_152, %c2_153, %c0_154] : memref<1x12x12x8xf32, #tpu.memory_space<vmem>>, vector<1x8x8x8xf32>
    %140 = vector.shape_cast %139 : vector<1x8x8x8xf32> to vector<64x8xf32>
    %141 = arith.truncf %140 : vector<64x8xf32> to vector<64x8xbf16>
    %c17 = arith.constant 17 : index
    %c0_155 = arith.constant 0 : index
    %c0_156 = arith.constant 0 : index
    %142 = vector.load %arg4[%c17, %c0_155, %c0_156] : memref<25x8x16xbf16, #tpu.memory_space<vmem>>, vector<1x8x16xbf16>
    %143 = vector.shape_cast %142 : vector<1x8x16xbf16> to vector<8x16xbf16>
    %cst_157 = arith.constant dense<0.000000e+00> : vector<64x16xf32>
    %144 = tpu.matmul %141, %143, %cst_157 {dimension_numbers = #tpu.dot_dimension_numbers<[1], [0], [0], [1], [0, 0, 1, 1], [], []>} : vector<64x8xbf16>, vector<8x16xbf16>, vector<64x16xf32> -> vector<64x16xf32>
    %145 = arith.addf %138, %144 : vector<64x16xf32>
    %c0_158 = arith.constant 0 : index
    %c3_159 = arith.constant 3 : index
    %c3_160 = arith.constant 3 : index
    %c0_161 = arith.constant 0 : index
    %146 = vector.load %arg14[%c0_158, %c3_159, %c3_160, %c0_161] : memref<1x12x12x8xf32, #tpu.memory_space<vmem>>, vector<1x8x8x8xf32>
    %147 = vector.shape_cast %146 : vector<1x8x8x8xf32> to vector<64x8xf32>
    %148 = arith.truncf %147 : vector<64x8xf32> to vector<64x8xbf16>
    %c18 = arith.constant 18 : index
    %c0_162 = arith.constant 0 : index
    %c0_163 = arith.constant 0 : index
    %149 = vector.load %arg4[%c18, %c0_162, %c0_163] : memref<25x8x16xbf16, #tpu.memory_space<vmem>>, vector<1x8x16xbf16>
    %150 = vector.shape_cast %149 : vector<1x8x16xbf16> to vector<8x16xbf16>
    %cst_164 = arith.constant dense<0.000000e+00> : vector<64x16xf32>
    %151 = tpu.matmul %148, %150, %cst_164 {dimension_numbers = #tpu.dot_dimension_numbers<[1], [0], [0], [1], [0, 0, 1, 1], [], []>} : vector<64x8xbf16>, vector<8x16xbf16>, vector<64x16xf32> -> vector<64x16xf32>
    %152 = arith.addf %145, %151 : vector<64x16xf32>
    %c0_165 = arith.constant 0 : index
    %c3_166 = arith.constant 3 : index
    %c4_167 = arith.constant 4 : index
    %c0_168 = arith.constant 0 : index
    %153 = vector.load %arg14[%c0_165, %c3_166, %c4_167, %c0_168] : memref<1x12x12x8xf32, #tpu.memory_space<vmem>>, vector<1x8x8x8xf32>
    %154 = vector.shape_cast %153 : vector<1x8x8x8xf32> to vector<64x8xf32>
    %155 = arith.truncf %154 : vector<64x8xf32> to vector<64x8xbf16>
    %c19 = arith.constant 19 : index
    %c0_169 = arith.constant 0 : index
    %c0_170 = arith.constant 0 : index
    %156 = vector.load %arg4[%c19, %c0_169, %c0_170] : memref<25x8x16xbf16, #tpu.memory_space<vmem>>, vector<1x8x16xbf16>
    %157 = vector.shape_cast %156 : vector<1x8x16xbf16> to vector<8x16xbf16>
    %cst_171 = arith.constant dense<0.000000e+00> : vector<64x16xf32>
    %158 = tpu.matmul %155, %157, %cst_171 {dimension_numbers = #tpu.dot_dimension_numbers<[1], [0], [0], [1], [0, 0, 1, 1], [], []>} : vector<64x8xbf16>, vector<8x16xbf16>, vector<64x16xf32> -> vector<64x16xf32>
    %159 = arith.addf %152, %158 : vector<64x16xf32>
    %c0_172 = arith.constant 0 : index
    %c4_173 = arith.constant 4 : index
    %c0_174 = arith.constant 0 : index
    %c0_175 = arith.constant 0 : index
    %160 = vector.load %arg14[%c0_172, %c4_173, %c0_174, %c0_175] : memref<1x12x12x8xf32, #tpu.memory_space<vmem>>, vector<1x8x8x8xf32>
    %161 = vector.shape_cast %160 : vector<1x8x8x8xf32> to vector<64x8xf32>
    %162 = arith.truncf %161 : vector<64x8xf32> to vector<64x8xbf16>
    %c20 = arith.constant 20 : index
    %c0_176 = arith.constant 0 : index
    %c0_177 = arith.constant 0 : index
    %163 = vector.load %arg4[%c20, %c0_176, %c0_177] : memref<25x8x16xbf16, #tpu.memory_space<vmem>>, vector<1x8x16xbf16>
    %164 = vector.shape_cast %163 : vector<1x8x16xbf16> to vector<8x16xbf16>
    %cst_178 = arith.constant dense<0.000000e+00> : vector<64x16xf32>
    %165 = tpu.matmul %162, %164, %cst_178 {dimension_numbers = #tpu.dot_dimension_numbers<[1], [0], [0], [1], [0, 0, 1, 1], [], []>} : vector<64x8xbf16>, vector<8x16xbf16>, vector<64x16xf32> -> vector<64x16xf32>
    %166 = arith.addf %159, %165 : vector<64x16xf32>
    %c0_179 = arith.constant 0 : index
    %c4_180 = arith.constant 4 : index
    %c1_181 = arith.constant 1 : index
    %c0_182 = arith.constant 0 : index
    %167 = vector.load %arg14[%c0_179, %c4_180, %c1_181, %c0_182] : memref<1x12x12x8xf32, #tpu.memory_space<vmem>>, vector<1x8x8x8xf32>
    %168 = vector.shape_cast %167 : vector<1x8x8x8xf32> to vector<64x8xf32>
    %169 = arith.truncf %168 : vector<64x8xf32> to vector<64x8xbf16>
    %c21 = arith.constant 21 : index
    %c0_183 = arith.constant 0 : index
    %c0_184 = arith.constant 0 : index
    %170 = vector.load %arg4[%c21, %c0_183, %c0_184] : memref<25x8x16xbf16, #tpu.memory_space<vmem>>, vector<1x8x16xbf16>
    %171 = vector.shape_cast %170 : vector<1x8x16xbf16> to vector<8x16xbf16>
    %cst_185 = arith.constant dense<0.000000e+00> : vector<64x16xf32>
    %172 = tpu.matmul %169, %171, %cst_185 {dimension_numbers = #tpu.dot_dimension_numbers<[1], [0], [0], [1], [0, 0, 1, 1], [], []>} : vector<64x8xbf16>, vector<8x16xbf16>, vector<64x16xf32> -> vector<64x16xf32>
    %173 = arith.addf %166, %172 : vector<64x16xf32>
    %c0_186 = arith.constant 0 : index
    %c4_187 = arith.constant 4 : index
    %c2_188 = arith.constant 2 : index
    %c0_189 = arith.constant 0 : index
    %174 = vector.load %arg14[%c0_186, %c4_187, %c2_188, %c0_189] : memref<1x12x12x8xf32, #tpu.memory_space<vmem>>, vector<1x8x8x8xf32>
    %175 = vector.shape_cast %174 : vector<1x8x8x8xf32> to vector<64x8xf32>
    %176 = arith.truncf %175 : vector<64x8xf32> to vector<64x8xbf16>
    %c22 = arith.constant 22 : index
    %c0_190 = arith.constant 0 : index
    %c0_191 = arith.constant 0 : index
    %177 = vector.load %arg4[%c22, %c0_190, %c0_191] : memref<25x8x16xbf16, #tpu.memory_space<vmem>>, vector<1x8x16xbf16>
    %178 = vector.shape_cast %177 : vector<1x8x16xbf16> to vector<8x16xbf16>
    %cst_192 = arith.constant dense<0.000000e+00> : vector<64x16xf32>
    %179 = tpu.matmul %176, %178, %cst_192 {dimension_numbers = #tpu.dot_dimension_numbers<[1], [0], [0], [1], [0, 0, 1, 1], [], []>} : vector<64x8xbf16>, vector<8x16xbf16>, vector<64x16xf32> -> vector<64x16xf32>
    %180 = arith.addf %173, %179 : vector<64x16xf32>
    %c0_193 = arith.constant 0 : index
    %c4_194 = arith.constant 4 : index
    %c3_195 = arith.constant 3 : index
    %c0_196 = arith.constant 0 : index
    %181 = vector.load %arg14[%c0_193, %c4_194, %c3_195, %c0_196] : memref<1x12x12x8xf32, #tpu.memory_space<vmem>>, vector<1x8x8x8xf32>
    %182 = vector.shape_cast %181 : vector<1x8x8x8xf32> to vector<64x8xf32>
    %183 = arith.truncf %182 : vector<64x8xf32> to vector<64x8xbf16>
    %c23 = arith.constant 23 : index
    %c0_197 = arith.constant 0 : index
    %c0_198 = arith.constant 0 : index
    %184 = vector.load %arg4[%c23, %c0_197, %c0_198] : memref<25x8x16xbf16, #tpu.memory_space<vmem>>, vector<1x8x16xbf16>
    %185 = vector.shape_cast %184 : vector<1x8x16xbf16> to vector<8x16xbf16>
    %cst_199 = arith.constant dense<0.000000e+00> : vector<64x16xf32>
    %186 = tpu.matmul %183, %185, %cst_199 {dimension_numbers = #tpu.dot_dimension_numbers<[1], [0], [0], [1], [0, 0, 1, 1], [], []>} : vector<64x8xbf16>, vector<8x16xbf16>, vector<64x16xf32> -> vector<64x16xf32>
    %187 = arith.addf %180, %186 : vector<64x16xf32>
    %c0_200 = arith.constant 0 : index
    %c4_201 = arith.constant 4 : index
    %c4_202 = arith.constant 4 : index
    %c0_203 = arith.constant 0 : index
    %188 = vector.load %arg14[%c0_200, %c4_201, %c4_202, %c0_203] : memref<1x12x12x8xf32, #tpu.memory_space<vmem>>, vector<1x8x8x8xf32>
    %189 = vector.shape_cast %188 : vector<1x8x8x8xf32> to vector<64x8xf32>
    %190 = arith.truncf %189 : vector<64x8xf32> to vector<64x8xbf16>
    %c24 = arith.constant 24 : index
    %c0_204 = arith.constant 0 : index
    %c0_205 = arith.constant 0 : index
    %191 = vector.load %arg4[%c24, %c0_204, %c0_205] : memref<25x8x16xbf16, #tpu.memory_space<vmem>>, vector<1x8x16xbf16>
    %192 = vector.shape_cast %191 : vector<1x8x16xbf16> to vector<8x16xbf16>
    %cst_206 = arith.constant dense<0.000000e+00> : vector<64x16xf32>
    %193 = tpu.matmul %190, %192, %cst_206 {dimension_numbers = #tpu.dot_dimension_numbers<[1], [0], [0], [1], [0, 0, 1, 1], [], []>} : vector<64x8xbf16>, vector<8x16xbf16>, vector<64x16xf32> -> vector<64x16xf32>
    %194 = arith.addf %187, %193 : vector<64x16xf32>
    %195 = vector.shape_cast %194 : vector<64x16xf32> to vector<1x8x8x16xf32>
    %c0_207 = arith.constant 0 : index
    %c0_208 = arith.constant 0 : index
    %c0_209 = arith.constant 0 : index
    %c0_210 = arith.constant 0 : index
    %196 = vector.load %arg15[%c0_207, %c0_208, %c0_209, %c0_210] : memref<1x8x8x16xf32, #tpu.memory_space<vmem>>, vector<1x8x8x16xf32>
    tpu.vector_store %arg15[%c0_207, %c0_208, %c0_209, %c0_210], %195 {strides = array<i32>} : memref<1x8x8x16xf32, #tpu.memory_space<vmem>>, vector<1x8x8x16xf32>,
    %cst_211 = arith.constant 0.000000e+00 : f32
    %197 = vector.broadcast %cst_211 : f32 to vector<1x128xf32>
    %c0_212 = arith.constant 0 : index
    %c0_213 = arith.constant 0 : index
    %c0_214 = arith.constant 0 : index
    %c0_215 = arith.constant 0 : index
    %198 = vector.load %arg15[%c0_212, %c0_213, %c0_214, %c0_215] : memref<1x8x8x16xf32, #tpu.memory_space<vmem>>, vector<1x1x1x16xf32>
    %199 = vector.shape_cast %198 : vector<1x1x1x16xf32> to vector<1x16xf32>
    %c0_216 = arith.constant 0 : index
    %c0_217 = arith.constant 0 : index
    %c1_218 = arith.constant 1 : index
    %c0_219 = arith.constant 0 : index
    %200 = vector.load %arg15[%c0_216, %c0_217, %c1_218, %c0_219] : memref<1x8x8x16xf32, #tpu.memory_space<vmem>>, vector<1x1x1x16xf32>
    %201 = vector.shape_cast %200 : vector<1x1x1x16xf32> to vector<1x16xf32>
    %202 = arith.maximumf %199, %201 : vector<1x16xf32>
    %c0_220 = arith.constant 0 : index
    %c1_221 = arith.constant 1 : index
    %c0_222 = arith.constant 0 : index
    %c0_223 = arith.constant 0 : index
    %203 = vector.load %arg15[%c0_220, %c1_221, %c0_222, %c0_223] : memref<1x8x8x16xf32, #tpu.memory_space<vmem>>, vector<1x1x1x16xf32>
    %204 = vector.shape_cast %203 : vector<1x1x1x16xf32> to vector<1x16xf32>
    %c0_224 = arith.constant 0 : index
    %c1_225 = arith.constant 1 : index
    %c1_226 = arith.constant 1 : index
    %c0_227 = arith.constant 0 : index
    %205 = vector.load %arg15[%c0_224, %c1_225, %c1_226, %c0_227] : memref<1x8x8x16xf32, #tpu.memory_space<vmem>>, vector<1x1x1x16xf32>
    %206 = vector.shape_cast %205 : vector<1x1x1x16xf32> to vector<1x16xf32>
    %207 = arith.maximumf %204, %206 : vector<1x16xf32>
    %208 = arith.maximumf %202, %207 : vector<1x16xf32>
    %c0_228 = arith.constant 0 : index
    %c0_229 = arith.constant 0 : index
    %209 = vector.load %arg5[%c0_228, %c0_229] : memref<1x16xf32, #tpu.memory_space<vmem>>, vector<1x16xf32>
    %210 = arith.addf %208, %209 : vector<1x16xf32>
    %cst_230 = arith.constant 0.000000e+00 : f32
    %211 = vector.broadcast %cst_230 : f32 to vector<1x16xf32>
    %212 = arith.maximumf %210, %211 : vector<1x16xf32>
    %213 = arith.truncf %212 : vector<1x16xf32> to vector<1x16xbf16>
    %c0_231 = arith.constant 0 : index
    %c0_232 = arith.constant 0 : index
    %c0_233 = arith.constant 0 : index
    %214 = vector.load %arg6[%c0_231, %c0_232, %c0_233] : memref<16x16x128xbf16, #tpu.memory_space<vmem>>, vector<1x16x128xbf16>
    %215 = vector.shape_cast %214 : vector<1x16x128xbf16> to vector<16x128xbf16>
    %cst_234 = arith.constant dense<0.000000e+00> : vector<1x128xf32>
    %216 = tpu.matmul %213, %215, %cst_234 {dimension_numbers = #tpu.dot_dimension_numbers<[1], [0], [0], [1], [0, 0, 1, 1], [], []>} : vector<1x16xbf16>, vector<16x128xbf16>, vector<1x128xf32> -> vector<1x128xf32>
    %217 = arith.addf %197, %216 : vector<1x128xf32>
    %c0_235 = arith.constant 0 : index
    %c0_236 = arith.constant 0 : index
    %c2_237 = arith.constant 2 : index
    %c0_238 = arith.constant 0 : index
    %218 = vector.load %arg15[%c0_235, %c0_236, %c2_237, %c0_238] : memref<1x8x8x16xf32, #tpu.memory_space<vmem>>, vector<1x1x1x16xf32>
    %219 = vector.shape_cast %218 : vector<1x1x1x16xf32> to vector<1x16xf32>
    %c0_239 = arith.constant 0 : index
    %c0_240 = arith.constant 0 : index
    %c3_241 = arith.constant 3 : index
    %c0_242 = arith.constant 0 : index
    %220 = vector.load %arg15[%c0_239, %c0_240, %c3_241, %c0_242] : memref<1x8x8x16xf32, #tpu.memory_space<vmem>>, vector<1x1x1x16xf32>
    %221 = vector.shape_cast %220 : vector<1x1x1x16xf32> to vector<1x16xf32>
    %222 = arith.maximumf %219, %221 : vector<1x16xf32>
    %c0_243 = arith.constant 0 : index
    %c1_244 = arith.constant 1 : index
    %c2_245 = arith.constant 2 : index
    %c0_246 = arith.constant 0 : index
    %223 = vector.load %arg15[%c0_243, %c1_244, %c2_245, %c0_246] : memref<1x8x8x16xf32, #tpu.memory_space<vmem>>, vector<1x1x1x16xf32>
    %224 = vector.shape_cast %223 : vector<1x1x1x16xf32> to vector<1x16xf32>
    %c0_247 = arith.constant 0 : index
    %c1_248 = arith.constant 1 : index
    %c3_249 = arith.constant 3 : index
    %c0_250 = arith.constant 0 : index
    %225 = vector.load %arg15[%c0_247, %c1_248, %c3_249, %c0_250] : memref<1x8x8x16xf32, #tpu.memory_space<vmem>>, vector<1x1x1x16xf32>
    %226 = vector.shape_cast %225 : vector<1x1x1x16xf32> to vector<1x16xf32>
    %227 = arith.maximumf %224, %226 : vector<1x16xf32>
    %228 = arith.maximumf %222, %227 : vector<1x16xf32>
    %c0_251 = arith.constant 0 : index
    %c0_252 = arith.constant 0 : index
    %229 = vector.load %arg5[%c0_251, %c0_252] : memref<1x16xf32, #tpu.memory_space<vmem>>, vector<1x16xf32>
    %230 = arith.addf %228, %229 : vector<1x16xf32>
    %cst_253 = arith.constant 0.000000e+00 : f32
    %231 = vector.broadcast %cst_253 : f32 to vector<1x16xf32>
    %232 = arith.maximumf %230, %231 : vector<1x16xf32>
    %233 = arith.truncf %232 : vector<1x16xf32> to vector<1x16xbf16>
    %c1_254 = arith.constant 1 : index
    %c0_255 = arith.constant 0 : index
    %c0_256 = arith.constant 0 : index
    %234 = vector.load %arg6[%c1_254, %c0_255, %c0_256] : memref<16x16x128xbf16, #tpu.memory_space<vmem>>, vector<1x16x128xbf16>
    %235 = vector.shape_cast %234 : vector<1x16x128xbf16> to vector<16x128xbf16>
    %cst_257 = arith.constant dense<0.000000e+00> : vector<1x128xf32>
    %236 = tpu.matmul %233, %235, %cst_257 {dimension_numbers = #tpu.dot_dimension_numbers<[1], [0], [0], [1], [0, 0, 1, 1], [], []>} : vector<1x16xbf16>, vector<16x128xbf16>, vector<1x128xf32> -> vector<1x128xf32>
    %237 = arith.addf %217, %236 : vector<1x128xf32>
    %c0_258 = arith.constant 0 : index
    %c0_259 = arith.constant 0 : index
    %c4_260 = arith.constant 4 : index
    %c0_261 = arith.constant 0 : index
    %238 = vector.load %arg15[%c0_258, %c0_259, %c4_260, %c0_261] : memref<1x8x8x16xf32, #tpu.memory_space<vmem>>, vector<1x1x1x16xf32>
    %239 = vector.shape_cast %238 : vector<1x1x1x16xf32> to vector<1x16xf32>
    %c0_262 = arith.constant 0 : index
    %c0_263 = arith.constant 0 : index
    %c5_264 = arith.constant 5 : index
    %c0_265 = arith.constant 0 : index
    %240 = vector.load %arg15[%c0_262, %c0_263, %c5_264, %c0_265] : memref<1x8x8x16xf32, #tpu.memory_space<vmem>>, vector<1x1x1x16xf32>
    %241 = vector.shape_cast %240 : vector<1x1x1x16xf32> to vector<1x16xf32>
    %242 = arith.maximumf %239, %241 : vector<1x16xf32>
    %c0_266 = arith.constant 0 : index
    %c1_267 = arith.constant 1 : index
    %c4_268 = arith.constant 4 : index
    %c0_269 = arith.constant 0 : index
    %243 = vector.load %arg15[%c0_266, %c1_267, %c4_268, %c0_269] : memref<1x8x8x16xf32, #tpu.memory_space<vmem>>, vector<1x1x1x16xf32>
    %244 = vector.shape_cast %243 : vector<1x1x1x16xf32> to vector<1x16xf32>
    %c0_270 = arith.constant 0 : index
    %c1_271 = arith.constant 1 : index
    %c5_272 = arith.constant 5 : index
    %c0_273 = arith.constant 0 : index
    %245 = vector.load %arg15[%c0_270, %c1_271, %c5_272, %c0_273] : memref<1x8x8x16xf32, #tpu.memory_space<vmem>>, vector<1x1x1x16xf32>
    %246 = vector.shape_cast %245 : vector<1x1x1x16xf32> to vector<1x16xf32>
    %247 = arith.maximumf %244, %246 : vector<1x16xf32>
    %248 = arith.maximumf %242, %247 : vector<1x16xf32>
    %c0_274 = arith.constant 0 : index
    %c0_275 = arith.constant 0 : index
    %249 = vector.load %arg5[%c0_274, %c0_275] : memref<1x16xf32, #tpu.memory_space<vmem>>, vector<1x16xf32>
    %250 = arith.addf %248, %249 : vector<1x16xf32>
    %cst_276 = arith.constant 0.000000e+00 : f32
    %251 = vector.broadcast %cst_276 : f32 to vector<1x16xf32>
    %252 = arith.maximumf %250, %251 : vector<1x16xf32>
    %253 = arith.truncf %252 : vector<1x16xf32> to vector<1x16xbf16>
    %c2_277 = arith.constant 2 : index
    %c0_278 = arith.constant 0 : index
    %c0_279 = arith.constant 0 : index
    %254 = vector.load %arg6[%c2_277, %c0_278, %c0_279] : memref<16x16x128xbf16, #tpu.memory_space<vmem>>, vector<1x16x128xbf16>
    %255 = vector.shape_cast %254 : vector<1x16x128xbf16> to vector<16x128xbf16>
    %cst_280 = arith.constant dense<0.000000e+00> : vector<1x128xf32>
    %256 = tpu.matmul %253, %255, %cst_280 {dimension_numbers = #tpu.dot_dimension_numbers<[1], [0], [0], [1], [0, 0, 1, 1], [], []>} : vector<1x16xbf16>, vector<16x128xbf16>, vector<1x128xf32> -> vector<1x128xf32>
    %257 = arith.addf %237, %256 : vector<1x128xf32>
    %c0_281 = arith.constant 0 : index
    %c0_282 = arith.constant 0 : index
    %c6_283 = arith.constant 6 : index
    %c0_284 = arith.constant 0 : index
    %258 = vector.load %arg15[%c0_281, %c0_282, %c6_283, %c0_284] : memref<1x8x8x16xf32, #tpu.memory_space<vmem>>, vector<1x1x1x16xf32>
    %259 = vector.shape_cast %258 : vector<1x1x1x16xf32> to vector<1x16xf32>
    %c0_285 = arith.constant 0 : index
    %c0_286 = arith.constant 0 : index
    %c7_287 = arith.constant 7 : index
    %c0_288 = arith.constant 0 : index
    %260 = vector.load %arg15[%c0_285, %c0_286, %c7_287, %c0_288] : memref<1x8x8x16xf32, #tpu.memory_space<vmem>>, vector<1x1x1x16xf32>
    %261 = vector.shape_cast %260 : vector<1x1x1x16xf32> to vector<1x16xf32>
    %262 = arith.maximumf %259, %261 : vector<1x16xf32>
    %c0_289 = arith.constant 0 : index
    %c1_290 = arith.constant 1 : index
    %c6_291 = arith.constant 6 : index
    %c0_292 = arith.constant 0 : index
    %263 = vector.load %arg15[%c0_289, %c1_290, %c6_291, %c0_292] : memref<1x8x8x16xf32, #tpu.memory_space<vmem>>, vector<1x1x1x16xf32>
    %264 = vector.shape_cast %263 : vector<1x1x1x16xf32> to vector<1x16xf32>
    %c0_293 = arith.constant 0 : index
    %c1_294 = arith.constant 1 : index
    %c7_295 = arith.constant 7 : index
    %c0_296 = arith.constant 0 : index
    %265 = vector.load %arg15[%c0_293, %c1_294, %c7_295, %c0_296] : memref<1x8x8x16xf32, #tpu.memory_space<vmem>>, vector<1x1x1x16xf32>
    %266 = vector.shape_cast %265 : vector<1x1x1x16xf32> to vector<1x16xf32>
    %267 = arith.maximumf %264, %266 : vector<1x16xf32>
    %268 = arith.maximumf %262, %267 : vector<1x16xf32>
    %c0_297 = arith.constant 0 : index
    %c0_298 = arith.constant 0 : index
    %269 = vector.load %arg5[%c0_297, %c0_298] : memref<1x16xf32, #tpu.memory_space<vmem>>, vector<1x16xf32>
    %270 = arith.addf %268, %269 : vector<1x16xf32>
    %cst_299 = arith.constant 0.000000e+00 : f32
    %271 = vector.broadcast %cst_299 : f32 to vector<1x16xf32>
    %272 = arith.maximumf %270, %271 : vector<1x16xf32>
    %273 = arith.truncf %272 : vector<1x16xf32> to vector<1x16xbf16>
    %c3_300 = arith.constant 3 : index
    %c0_301 = arith.constant 0 : index
    %c0_302 = arith.constant 0 : index
    %274 = vector.load %arg6[%c3_300, %c0_301, %c0_302] : memref<16x16x128xbf16, #tpu.memory_space<vmem>>, vector<1x16x128xbf16>
    %275 = vector.shape_cast %274 : vector<1x16x128xbf16> to vector<16x128xbf16>
    %cst_303 = arith.constant dense<0.000000e+00> : vector<1x128xf32>
    %276 = tpu.matmul %273, %275, %cst_303 {dimension_numbers = #tpu.dot_dimension_numbers<[1], [0], [0], [1], [0, 0, 1, 1], [], []>} : vector<1x16xbf16>, vector<16x128xbf16>, vector<1x128xf32> -> vector<1x128xf32>
    %277 = arith.addf %257, %276 : vector<1x128xf32>
    %c0_304 = arith.constant 0 : index
    %c2_305 = arith.constant 2 : index
    %c0_306 = arith.constant 0 : index
    %c0_307 = arith.constant 0 : index
    %278 = vector.load %arg15[%c0_304, %c2_305, %c0_306, %c0_307] : memref<1x8x8x16xf32, #tpu.memory_space<vmem>>, vector<1x1x1x16xf32>
    %279 = vector.shape_cast %278 : vector<1x1x1x16xf32> to vector<1x16xf32>
    %c0_308 = arith.constant 0 : index
    %c2_309 = arith.constant 2 : index
    %c1_310 = arith.constant 1 : index
    %c0_311 = arith.constant 0 : index
    %280 = vector.load %arg15[%c0_308, %c2_309, %c1_310, %c0_311] : memref<1x8x8x16xf32, #tpu.memory_space<vmem>>, vector<1x1x1x16xf32>
    %281 = vector.shape_cast %280 : vector<1x1x1x16xf32> to vector<1x16xf32>
    %282 = arith.maximumf %279, %281 : vector<1x16xf32>
    %c0_312 = arith.constant 0 : index
    %c3_313 = arith.constant 3 : index
    %c0_314 = arith.constant 0 : index
    %c0_315 = arith.constant 0 : index
    %283 = vector.load %arg15[%c0_312, %c3_313, %c0_314, %c0_315] : memref<1x8x8x16xf32, #tpu.memory_space<vmem>>, vector<1x1x1x16xf32>
    %284 = vector.shape_cast %283 : vector<1x1x1x16xf32> to vector<1x16xf32>
    %c0_316 = arith.constant 0 : index
    %c3_317 = arith.constant 3 : index
    %c1_318 = arith.constant 1 : index
    %c0_319 = arith.constant 0 : index
    %285 = vector.load %arg15[%c0_316, %c3_317, %c1_318, %c0_319] : memref<1x8x8x16xf32, #tpu.memory_space<vmem>>, vector<1x1x1x16xf32>
    %286 = vector.shape_cast %285 : vector<1x1x1x16xf32> to vector<1x16xf32>
    %287 = arith.maximumf %284, %286 : vector<1x16xf32>
    %288 = arith.maximumf %282, %287 : vector<1x16xf32>
    %c0_320 = arith.constant 0 : index
    %c0_321 = arith.constant 0 : index
    %289 = vector.load %arg5[%c0_320, %c0_321] : memref<1x16xf32, #tpu.memory_space<vmem>>, vector<1x16xf32>
    %290 = arith.addf %288, %289 : vector<1x16xf32>
    %cst_322 = arith.constant 0.000000e+00 : f32
    %291 = vector.broadcast %cst_322 : f32 to vector<1x16xf32>
    %292 = arith.maximumf %290, %291 : vector<1x16xf32>
    %293 = arith.truncf %292 : vector<1x16xf32> to vector<1x16xbf16>
    %c4_323 = arith.constant 4 : index
    %c0_324 = arith.constant 0 : index
    %c0_325 = arith.constant 0 : index
    %294 = vector.load %arg6[%c4_323, %c0_324, %c0_325] : memref<16x16x128xbf16, #tpu.memory_space<vmem>>, vector<1x16x128xbf16>
    %295 = vector.shape_cast %294 : vector<1x16x128xbf16> to vector<16x128xbf16>
    %cst_326 = arith.constant dense<0.000000e+00> : vector<1x128xf32>
    %296 = tpu.matmul %293, %295, %cst_326 {dimension_numbers = #tpu.dot_dimension_numbers<[1], [0], [0], [1], [0, 0, 1, 1], [], []>} : vector<1x16xbf16>, vector<16x128xbf16>, vector<1x128xf32> -> vector<1x128xf32>
    %297 = arith.addf %277, %296 : vector<1x128xf32>
    %c0_327 = arith.constant 0 : index
    %c2_328 = arith.constant 2 : index
    %c2_329 = arith.constant 2 : index
    %c0_330 = arith.constant 0 : index
    %298 = vector.load %arg15[%c0_327, %c2_328, %c2_329, %c0_330] : memref<1x8x8x16xf32, #tpu.memory_space<vmem>>, vector<1x1x1x16xf32>
    %299 = vector.shape_cast %298 : vector<1x1x1x16xf32> to vector<1x16xf32>
    %c0_331 = arith.constant 0 : index
    %c2_332 = arith.constant 2 : index
    %c3_333 = arith.constant 3 : index
    %c0_334 = arith.constant 0 : index
    %300 = vector.load %arg15[%c0_331, %c2_332, %c3_333, %c0_334] : memref<1x8x8x16xf32, #tpu.memory_space<vmem>>, vector<1x1x1x16xf32>
    %301 = vector.shape_cast %300 : vector<1x1x1x16xf32> to vector<1x16xf32>
    %302 = arith.maximumf %299, %301 : vector<1x16xf32>
    %c0_335 = arith.constant 0 : index
    %c3_336 = arith.constant 3 : index
    %c2_337 = arith.constant 2 : index
    %c0_338 = arith.constant 0 : index
    %303 = vector.load %arg15[%c0_335, %c3_336, %c2_337, %c0_338] : memref<1x8x8x16xf32, #tpu.memory_space<vmem>>, vector<1x1x1x16xf32>
    %304 = vector.shape_cast %303 : vector<1x1x1x16xf32> to vector<1x16xf32>
    %c0_339 = arith.constant 0 : index
    %c3_340 = arith.constant 3 : index
    %c3_341 = arith.constant 3 : index
    %c0_342 = arith.constant 0 : index
    %305 = vector.load %arg15[%c0_339, %c3_340, %c3_341, %c0_342] : memref<1x8x8x16xf32, #tpu.memory_space<vmem>>, vector<1x1x1x16xf32>
    %306 = vector.shape_cast %305 : vector<1x1x1x16xf32> to vector<1x16xf32>
    %307 = arith.maximumf %304, %306 : vector<1x16xf32>
    %308 = arith.maximumf %302, %307 : vector<1x16xf32>
    %c0_343 = arith.constant 0 : index
    %c0_344 = arith.constant 0 : index
    %309 = vector.load %arg5[%c0_343, %c0_344] : memref<1x16xf32, #tpu.memory_space<vmem>>, vector<1x16xf32>
    %310 = arith.addf %308, %309 : vector<1x16xf32>
    %cst_345 = arith.constant 0.000000e+00 : f32
    %311 = vector.broadcast %cst_345 : f32 to vector<1x16xf32>
    %312 = arith.maximumf %310, %311 : vector<1x16xf32>
    %313 = arith.truncf %312 : vector<1x16xf32> to vector<1x16xbf16>
    %c5_346 = arith.constant 5 : index
    %c0_347 = arith.constant 0 : index
    %c0_348 = arith.constant 0 : index
    %314 = vector.load %arg6[%c5_346, %c0_347, %c0_348] : memref<16x16x128xbf16, #tpu.memory_space<vmem>>, vector<1x16x128xbf16>
    %315 = vector.shape_cast %314 : vector<1x16x128xbf16> to vector<16x128xbf16>
    %cst_349 = arith.constant dense<0.000000e+00> : vector<1x128xf32>
    %316 = tpu.matmul %313, %315, %cst_349 {dimension_numbers = #tpu.dot_dimension_numbers<[1], [0], [0], [1], [0, 0, 1, 1], [], []>} : vector<1x16xbf16>, vector<16x128xbf16>, vector<1x128xf32> -> vector<1x128xf32>
    %317 = arith.addf %297, %316 : vector<1x128xf32>
    %c0_350 = arith.constant 0 : index
    %c2_351 = arith.constant 2 : index
    %c4_352 = arith.constant 4 : index
    %c0_353 = arith.constant 0 : index
    %318 = vector.load %arg15[%c0_350, %c2_351, %c4_352, %c0_353] : memref<1x8x8x16xf32, #tpu.memory_space<vmem>>, vector<1x1x1x16xf32>
    %319 = vector.shape_cast %318 : vector<1x1x1x16xf32> to vector<1x16xf32>
    %c0_354 = arith.constant 0 : index
    %c2_355 = arith.constant 2 : index
    %c5_356 = arith.constant 5 : index
    %c0_357 = arith.constant 0 : index
    %320 = vector.load %arg15[%c0_354, %c2_355, %c5_356, %c0_357] : memref<1x8x8x16xf32, #tpu.memory_space<vmem>>, vector<1x1x1x16xf32>
    %321 = vector.shape_cast %320 : vector<1x1x1x16xf32> to vector<1x16xf32>
    %322 = arith.maximumf %319, %321 : vector<1x16xf32>
    %c0_358 = arith.constant 0 : index
    %c3_359 = arith.constant 3 : index
    %c4_360 = arith.constant 4 : index
    %c0_361 = arith.constant 0 : index
    %323 = vector.load %arg15[%c0_358, %c3_359, %c4_360, %c0_361] : memref<1x8x8x16xf32, #tpu.memory_space<vmem>>, vector<1x1x1x16xf32>
    %324 = vector.shape_cast %323 : vector<1x1x1x16xf32> to vector<1x16xf32>
    %c0_362 = arith.constant 0 : index
    %c3_363 = arith.constant 3 : index
    %c5_364 = arith.constant 5 : index
    %c0_365 = arith.constant 0 : index
    %325 = vector.load %arg15[%c0_362, %c3_363, %c5_364, %c0_365] : memref<1x8x8x16xf32, #tpu.memory_space<vmem>>, vector<1x1x1x16xf32>
    %326 = vector.shape_cast %325 : vector<1x1x1x16xf32> to vector<1x16xf32>
    %327 = arith.maximumf %324, %326 : vector<1x16xf32>
    %328 = arith.maximumf %322, %327 : vector<1x16xf32>
    %c0_366 = arith.constant 0 : index
    %c0_367 = arith.constant 0 : index
    %329 = vector.load %arg5[%c0_366, %c0_367] : memref<1x16xf32, #tpu.memory_space<vmem>>, vector<1x16xf32>
    %330 = arith.addf %328, %329 : vector<1x16xf32>
    %cst_368 = arith.constant 0.000000e+00 : f32
    %331 = vector.broadcast %cst_368 : f32 to vector<1x16xf32>
    %332 = arith.maximumf %330, %331 : vector<1x16xf32>
    %333 = arith.truncf %332 : vector<1x16xf32> to vector<1x16xbf16>
    %c6_369 = arith.constant 6 : index
    %c0_370 = arith.constant 0 : index
    %c0_371 = arith.constant 0 : index
    %334 = vector.load %arg6[%c6_369, %c0_370, %c0_371] : memref<16x16x128xbf16, #tpu.memory_space<vmem>>, vector<1x16x128xbf16>
    %335 = vector.shape_cast %334 : vector<1x16x128xbf16> to vector<16x128xbf16>
    %cst_372 = arith.constant dense<0.000000e+00> : vector<1x128xf32>
    %336 = tpu.matmul %333, %335, %cst_372 {dimension_numbers = #tpu.dot_dimension_numbers<[1], [0], [0], [1], [0, 0, 1, 1], [], []>} : vector<1x16xbf16>, vector<16x128xbf16>, vector<1x128xf32> -> vector<1x128xf32>
    %337 = arith.addf %317, %336 : vector<1x128xf32>
    %c0_373 = arith.constant 0 : index
    %c2_374 = arith.constant 2 : index
    %c6_375 = arith.constant 6 : index
    %c0_376 = arith.constant 0 : index
    %338 = vector.load %arg15[%c0_373, %c2_374, %c6_375, %c0_376] : memref<1x8x8x16xf32, #tpu.memory_space<vmem>>, vector<1x1x1x16xf32>
    %339 = vector.shape_cast %338 : vector<1x1x1x16xf32> to vector<1x16xf32>
    %c0_377 = arith.constant 0 : index
    %c2_378 = arith.constant 2 : index
    %c7_379 = arith.constant 7 : index
    %c0_380 = arith.constant 0 : index
    %340 = vector.load %arg15[%c0_377, %c2_378, %c7_379, %c0_380] : memref<1x8x8x16xf32, #tpu.memory_space<vmem>>, vector<1x1x1x16xf32>
    %341 = vector.shape_cast %340 : vector<1x1x1x16xf32> to vector<1x16xf32>
    %342 = arith.maximumf %339, %341 : vector<1x16xf32>
    %c0_381 = arith.constant 0 : index
    %c3_382 = arith.constant 3 : index
    %c6_383 = arith.constant 6 : index
    %c0_384 = arith.constant 0 : index
    %343 = vector.load %arg15[%c0_381, %c3_382, %c6_383, %c0_384] : memref<1x8x8x16xf32, #tpu.memory_space<vmem>>, vector<1x1x1x16xf32>
    %344 = vector.shape_cast %343 : vector<1x1x1x16xf32> to vector<1x16xf32>
    %c0_385 = arith.constant 0 : index
    %c3_386 = arith.constant 3 : index
    %c7_387 = arith.constant 7 : index
    %c0_388 = arith.constant 0 : index
    %345 = vector.load %arg15[%c0_385, %c3_386, %c7_387, %c0_388] : memref<1x8x8x16xf32, #tpu.memory_space<vmem>>, vector<1x1x1x16xf32>
    %346 = vector.shape_cast %345 : vector<1x1x1x16xf32> to vector<1x16xf32>
    %347 = arith.maximumf %344, %346 : vector<1x16xf32>
    %348 = arith.maximumf %342, %347 : vector<1x16xf32>
    %c0_389 = arith.constant 0 : index
    %c0_390 = arith.constant 0 : index
    %349 = vector.load %arg5[%c0_389, %c0_390] : memref<1x16xf32, #tpu.memory_space<vmem>>, vector<1x16xf32>
    %350 = arith.addf %348, %349 : vector<1x16xf32>
    %cst_391 = arith.constant 0.000000e+00 : f32
    %351 = vector.broadcast %cst_391 : f32 to vector<1x16xf32>
    %352 = arith.maximumf %350, %351 : vector<1x16xf32>
    %353 = arith.truncf %352 : vector<1x16xf32> to vector<1x16xbf16>
    %c7_392 = arith.constant 7 : index
    %c0_393 = arith.constant 0 : index
    %c0_394 = arith.constant 0 : index
    %354 = vector.load %arg6[%c7_392, %c0_393, %c0_394] : memref<16x16x128xbf16, #tpu.memory_space<vmem>>, vector<1x16x128xbf16>
    %355 = vector.shape_cast %354 : vector<1x16x128xbf16> to vector<16x128xbf16>
    %cst_395 = arith.constant dense<0.000000e+00> : vector<1x128xf32>
    %356 = tpu.matmul %353, %355, %cst_395 {dimension_numbers = #tpu.dot_dimension_numbers<[1], [0], [0], [1], [0, 0, 1, 1], [], []>} : vector<1x16xbf16>, vector<16x128xbf16>, vector<1x128xf32> -> vector<1x128xf32>
    %357 = arith.addf %337, %356 : vector<1x128xf32>
    %c0_396 = arith.constant 0 : index
    %c4_397 = arith.constant 4 : index
    %c0_398 = arith.constant 0 : index
    %c0_399 = arith.constant 0 : index
    %358 = vector.load %arg15[%c0_396, %c4_397, %c0_398, %c0_399] : memref<1x8x8x16xf32, #tpu.memory_space<vmem>>, vector<1x1x1x16xf32>
    %359 = vector.shape_cast %358 : vector<1x1x1x16xf32> to vector<1x16xf32>
    %c0_400 = arith.constant 0 : index
    %c4_401 = arith.constant 4 : index
    %c1_402 = arith.constant 1 : index
    %c0_403 = arith.constant 0 : index
    %360 = vector.load %arg15[%c0_400, %c4_401, %c1_402, %c0_403] : memref<1x8x8x16xf32, #tpu.memory_space<vmem>>, vector<1x1x1x16xf32>
    %361 = vector.shape_cast %360 : vector<1x1x1x16xf32> to vector<1x16xf32>
    %362 = arith.maximumf %359, %361 : vector<1x16xf32>
    %c0_404 = arith.constant 0 : index
    %c5_405 = arith.constant 5 : index
    %c0_406 = arith.constant 0 : index
    %c0_407 = arith.constant 0 : index
    %363 = vector.load %arg15[%c0_404, %c5_405, %c0_406, %c0_407] : memref<1x8x8x16xf32, #tpu.memory_space<vmem>>, vector<1x1x1x16xf32>
    %364 = vector.shape_cast %363 : vector<1x1x1x16xf32> to vector<1x16xf32>
    %c0_408 = arith.constant 0 : index
    %c5_409 = arith.constant 5 : index
    %c1_410 = arith.constant 1 : index
    %c0_411 = arith.constant 0 : index
    %365 = vector.load %arg15[%c0_408, %c5_409, %c1_410, %c0_411] : memref<1x8x8x16xf32, #tpu.memory_space<vmem>>, vector<1x1x1x16xf32>
    %366 = vector.shape_cast %365 : vector<1x1x1x16xf32> to vector<1x16xf32>
    %367 = arith.maximumf %364, %366 : vector<1x16xf32>
    %368 = arith.maximumf %362, %367 : vector<1x16xf32>
    %c0_412 = arith.constant 0 : index
    %c0_413 = arith.constant 0 : index
    %369 = vector.load %arg5[%c0_412, %c0_413] : memref<1x16xf32, #tpu.memory_space<vmem>>, vector<1x16xf32>
    %370 = arith.addf %368, %369 : vector<1x16xf32>
    %cst_414 = arith.constant 0.000000e+00 : f32
    %371 = vector.broadcast %cst_414 : f32 to vector<1x16xf32>
    %372 = arith.maximumf %370, %371 : vector<1x16xf32>
    %373 = arith.truncf %372 : vector<1x16xf32> to vector<1x16xbf16>
    %c8_415 = arith.constant 8 : index
    %c0_416 = arith.constant 0 : index
    %c0_417 = arith.constant 0 : index
    %374 = vector.load %arg6[%c8_415, %c0_416, %c0_417] : memref<16x16x128xbf16, #tpu.memory_space<vmem>>, vector<1x16x128xbf16>
    %375 = vector.shape_cast %374 : vector<1x16x128xbf16> to vector<16x128xbf16>
    %cst_418 = arith.constant dense<0.000000e+00> : vector<1x128xf32>
    %376 = tpu.matmul %373, %375, %cst_418 {dimension_numbers = #tpu.dot_dimension_numbers<[1], [0], [0], [1], [0, 0, 1, 1], [], []>} : vector<1x16xbf16>, vector<16x128xbf16>, vector<1x128xf32> -> vector<1x128xf32>
    %377 = arith.addf %357, %376 : vector<1x128xf32>
    %c0_419 = arith.constant 0 : index
    %c4_420 = arith.constant 4 : index
    %c2_421 = arith.constant 2 : index
    %c0_422 = arith.constant 0 : index
    %378 = vector.load %arg15[%c0_419, %c4_420, %c2_421, %c0_422] : memref<1x8x8x16xf32, #tpu.memory_space<vmem>>, vector<1x1x1x16xf32>
    %379 = vector.shape_cast %378 : vector<1x1x1x16xf32> to vector<1x16xf32>
    %c0_423 = arith.constant 0 : index
    %c4_424 = arith.constant 4 : index
    %c3_425 = arith.constant 3 : index
    %c0_426 = arith.constant 0 : index
    %380 = vector.load %arg15[%c0_423, %c4_424, %c3_425, %c0_426] : memref<1x8x8x16xf32, #tpu.memory_space<vmem>>, vector<1x1x1x16xf32>
    %381 = vector.shape_cast %380 : vector<1x1x1x16xf32> to vector<1x16xf32>
    %382 = arith.maximumf %379, %381 : vector<1x16xf32>
    %c0_427 = arith.constant 0 : index
    %c5_428 = arith.constant 5 : index
    %c2_429 = arith.constant 2 : index
    %c0_430 = arith.constant 0 : index
    %383 = vector.load %arg15[%c0_427, %c5_428, %c2_429, %c0_430] : memref<1x8x8x16xf32, #tpu.memory_space<vmem>>, vector<1x1x1x16xf32>
    %384 = vector.shape_cast %383 : vector<1x1x1x16xf32> to vector<1x16xf32>
    %c0_431 = arith.constant 0 : index
    %c5_432 = arith.constant 5 : index
    %c3_433 = arith.constant 3 : index
    %c0_434 = arith.constant 0 : index
    %385 = vector.load %arg15[%c0_431, %c5_432, %c3_433, %c0_434] : memref<1x8x8x16xf32, #tpu.memory_space<vmem>>, vector<1x1x1x16xf32>
    %386 = vector.shape_cast %385 : vector<1x1x1x16xf32> to vector<1x16xf32>
    %387 = arith.maximumf %384, %386 : vector<1x16xf32>
    %388 = arith.maximumf %382, %387 : vector<1x16xf32>
    %c0_435 = arith.constant 0 : index
    %c0_436 = arith.constant 0 : index
    %389 = vector.load %arg5[%c0_435, %c0_436] : memref<1x16xf32, #tpu.memory_space<vmem>>, vector<1x16xf32>
    %390 = arith.addf %388, %389 : vector<1x16xf32>
    %cst_437 = arith.constant 0.000000e+00 : f32
    %391 = vector.broadcast %cst_437 : f32 to vector<1x16xf32>
    %392 = arith.maximumf %390, %391 : vector<1x16xf32>
    %393 = arith.truncf %392 : vector<1x16xf32> to vector<1x16xbf16>
    %c9_438 = arith.constant 9 : index
    %c0_439 = arith.constant 0 : index
    %c0_440 = arith.constant 0 : index
    %394 = vector.load %arg6[%c9_438, %c0_439, %c0_440] : memref<16x16x128xbf16, #tpu.memory_space<vmem>>, vector<1x16x128xbf16>
    %395 = vector.shape_cast %394 : vector<1x16x128xbf16> to vector<16x128xbf16>
    %cst_441 = arith.constant dense<0.000000e+00> : vector<1x128xf32>
    %396 = tpu.matmul %393, %395, %cst_441 {dimension_numbers = #tpu.dot_dimension_numbers<[1], [0], [0], [1], [0, 0, 1, 1], [], []>} : vector<1x16xbf16>, vector<16x128xbf16>, vector<1x128xf32> -> vector<1x128xf32>
    %397 = arith.addf %377, %396 : vector<1x128xf32>
    %c0_442 = arith.constant 0 : index
    %c4_443 = arith.constant 4 : index
    %c4_444 = arith.constant 4 : index
    %c0_445 = arith.constant 0 : index
    %398 = vector.load %arg15[%c0_442, %c4_443, %c4_444, %c0_445] : memref<1x8x8x16xf32, #tpu.memory_space<vmem>>, vector<1x1x1x16xf32>
    %399 = vector.shape_cast %398 : vector<1x1x1x16xf32> to vector<1x16xf32>
    %c0_446 = arith.constant 0 : index
    %c4_447 = arith.constant 4 : index
    %c5_448 = arith.constant 5 : index
    %c0_449 = arith.constant 0 : index
    %400 = vector.load %arg15[%c0_446, %c4_447, %c5_448, %c0_449] : memref<1x8x8x16xf32, #tpu.memory_space<vmem>>, vector<1x1x1x16xf32>
    %401 = vector.shape_cast %400 : vector<1x1x1x16xf32> to vector<1x16xf32>
    %402 = arith.maximumf %399, %401 : vector<1x16xf32>
    %c0_450 = arith.constant 0 : index
    %c5_451 = arith.constant 5 : index
    %c4_452 = arith.constant 4 : index
    %c0_453 = arith.constant 0 : index
    %403 = vector.load %arg15[%c0_450, %c5_451, %c4_452, %c0_453] : memref<1x8x8x16xf32, #tpu.memory_space<vmem>>, vector<1x1x1x16xf32>
    %404 = vector.shape_cast %403 : vector<1x1x1x16xf32> to vector<1x16xf32>
    %c0_454 = arith.constant 0 : index
    %c5_455 = arith.constant 5 : index
    %c5_456 = arith.constant 5 : index
    %c0_457 = arith.constant 0 : index
    %405 = vector.load %arg15[%c0_454, %c5_455, %c5_456, %c0_457] : memref<1x8x8x16xf32, #tpu.memory_space<vmem>>, vector<1x1x1x16xf32>
    %406 = vector.shape_cast %405 : vector<1x1x1x16xf32> to vector<1x16xf32>
    %407 = arith.maximumf %404, %406 : vector<1x16xf32>
    %408 = arith.maximumf %402, %407 : vector<1x16xf32>
    %c0_458 = arith.constant 0 : index
    %c0_459 = arith.constant 0 : index
    %409 = vector.load %arg5[%c0_458, %c0_459] : memref<1x16xf32, #tpu.memory_space<vmem>>, vector<1x16xf32>
    %410 = arith.addf %408, %409 : vector<1x16xf32>
    %cst_460 = arith.constant 0.000000e+00 : f32
    %411 = vector.broadcast %cst_460 : f32 to vector<1x16xf32>
    %412 = arith.maximumf %410, %411 : vector<1x16xf32>
    %413 = arith.truncf %412 : vector<1x16xf32> to vector<1x16xbf16>
    %c10_461 = arith.constant 10 : index
    %c0_462 = arith.constant 0 : index
    %c0_463 = arith.constant 0 : index
    %414 = vector.load %arg6[%c10_461, %c0_462, %c0_463] : memref<16x16x128xbf16, #tpu.memory_space<vmem>>, vector<1x16x128xbf16>
    %415 = vector.shape_cast %414 : vector<1x16x128xbf16> to vector<16x128xbf16>
    %cst_464 = arith.constant dense<0.000000e+00> : vector<1x128xf32>
    %416 = tpu.matmul %413, %415, %cst_464 {dimension_numbers = #tpu.dot_dimension_numbers<[1], [0], [0], [1], [0, 0, 1, 1], [], []>} : vector<1x16xbf16>, vector<16x128xbf16>, vector<1x128xf32> -> vector<1x128xf32>
    %417 = arith.addf %397, %416 : vector<1x128xf32>
    %c0_465 = arith.constant 0 : index
    %c4_466 = arith.constant 4 : index
    %c6_467 = arith.constant 6 : index
    %c0_468 = arith.constant 0 : index
    %418 = vector.load %arg15[%c0_465, %c4_466, %c6_467, %c0_468] : memref<1x8x8x16xf32, #tpu.memory_space<vmem>>, vector<1x1x1x16xf32>
    %419 = vector.shape_cast %418 : vector<1x1x1x16xf32> to vector<1x16xf32>
    %c0_469 = arith.constant 0 : index
    %c4_470 = arith.constant 4 : index
    %c7_471 = arith.constant 7 : index
    %c0_472 = arith.constant 0 : index
    %420 = vector.load %arg15[%c0_469, %c4_470, %c7_471, %c0_472] : memref<1x8x8x16xf32, #tpu.memory_space<vmem>>, vector<1x1x1x16xf32>
    %421 = vector.shape_cast %420 : vector<1x1x1x16xf32> to vector<1x16xf32>
    %422 = arith.maximumf %419, %421 : vector<1x16xf32>
    %c0_473 = arith.constant 0 : index
    %c5_474 = arith.constant 5 : index
    %c6_475 = arith.constant 6 : index
    %c0_476 = arith.constant 0 : index
    %423 = vector.load %arg15[%c0_473, %c5_474, %c6_475, %c0_476] : memref<1x8x8x16xf32, #tpu.memory_space<vmem>>, vector<1x1x1x16xf32>
    %424 = vector.shape_cast %423 : vector<1x1x1x16xf32> to vector<1x16xf32>
    %c0_477 = arith.constant 0 : index
    %c5_478 = arith.constant 5 : index
    %c7_479 = arith.constant 7 : index
    %c0_480 = arith.constant 0 : index
    %425 = vector.load %arg15[%c0_477, %c5_478, %c7_479, %c0_480] : memref<1x8x8x16xf32, #tpu.memory_space<vmem>>, vector<1x1x1x16xf32>
    %426 = vector.shape_cast %425 : vector<1x1x1x16xf32> to vector<1x16xf32>
    %427 = arith.maximumf %424, %426 : vector<1x16xf32>
    %428 = arith.maximumf %422, %427 : vector<1x16xf32>
    %c0_481 = arith.constant 0 : index
    %c0_482 = arith.constant 0 : index
    %429 = vector.load %arg5[%c0_481, %c0_482] : memref<1x16xf32, #tpu.memory_space<vmem>>, vector<1x16xf32>
    %430 = arith.addf %428, %429 : vector<1x16xf32>
    %cst_483 = arith.constant 0.000000e+00 : f32
    %431 = vector.broadcast %cst_483 : f32 to vector<1x16xf32>
    %432 = arith.maximumf %430, %431 : vector<1x16xf32>
    %433 = arith.truncf %432 : vector<1x16xf32> to vector<1x16xbf16>
    %c11_484 = arith.constant 11 : index
    %c0_485 = arith.constant 0 : index
    %c0_486 = arith.constant 0 : index
    %434 = vector.load %arg6[%c11_484, %c0_485, %c0_486] : memref<16x16x128xbf16, #tpu.memory_space<vmem>>, vector<1x16x128xbf16>
    %435 = vector.shape_cast %434 : vector<1x16x128xbf16> to vector<16x128xbf16>
    %cst_487 = arith.constant dense<0.000000e+00> : vector<1x128xf32>
    %436 = tpu.matmul %433, %435, %cst_487 {dimension_numbers = #tpu.dot_dimension_numbers<[1], [0], [0], [1], [0, 0, 1, 1], [], []>} : vector<1x16xbf16>, vector<16x128xbf16>, vector<1x128xf32> -> vector<1x128xf32>
    %437 = arith.addf %417, %436 : vector<1x128xf32>
    %c0_488 = arith.constant 0 : index
    %c6_489 = arith.constant 6 : index
    %c0_490 = arith.constant 0 : index
    %c0_491 = arith.constant 0 : index
    %438 = vector.load %arg15[%c0_488, %c6_489, %c0_490, %c0_491] : memref<1x8x8x16xf32, #tpu.memory_space<vmem>>, vector<1x1x1x16xf32>
    %439 = vector.shape_cast %438 : vector<1x1x1x16xf32> to vector<1x16xf32>
    %c0_492 = arith.constant 0 : index
    %c6_493 = arith.constant 6 : index
    %c1_494 = arith.constant 1 : index
    %c0_495 = arith.constant 0 : index
    %440 = vector.load %arg15[%c0_492, %c6_493, %c1_494, %c0_495] : memref<1x8x8x16xf32, #tpu.memory_space<vmem>>, vector<1x1x1x16xf32>
    %441 = vector.shape_cast %440 : vector<1x1x1x16xf32> to vector<1x16xf32>
    %442 = arith.maximumf %439, %441 : vector<1x16xf32>
    %c0_496 = arith.constant 0 : index
    %c7_497 = arith.constant 7 : index
    %c0_498 = arith.constant 0 : index
    %c0_499 = arith.constant 0 : index
    %443 = vector.load %arg15[%c0_496, %c7_497, %c0_498, %c0_499] : memref<1x8x8x16xf32, #tpu.memory_space<vmem>>, vector<1x1x1x16xf32>
    %444 = vector.shape_cast %443 : vector<1x1x1x16xf32> to vector<1x16xf32>
    %c0_500 = arith.constant 0 : index
    %c7_501 = arith.constant 7 : index
    %c1_502 = arith.constant 1 : index
    %c0_503 = arith.constant 0 : index
    %445 = vector.load %arg15[%c0_500, %c7_501, %c1_502, %c0_503] : memref<1x8x8x16xf32, #tpu.memory_space<vmem>>, vector<1x1x1x16xf32>
    %446 = vector.shape_cast %445 : vector<1x1x1x16xf32> to vector<1x16xf32>
    %447 = arith.maximumf %444, %446 : vector<1x16xf32>
    %448 = arith.maximumf %442, %447 : vector<1x16xf32>
    %c0_504 = arith.constant 0 : index
    %c0_505 = arith.constant 0 : index
    %449 = vector.load %arg5[%c0_504, %c0_505] : memref<1x16xf32, #tpu.memory_space<vmem>>, vector<1x16xf32>
    %450 = arith.addf %448, %449 : vector<1x16xf32>
    %cst_506 = arith.constant 0.000000e+00 : f32
    %451 = vector.broadcast %cst_506 : f32 to vector<1x16xf32>
    %452 = arith.maximumf %450, %451 : vector<1x16xf32>
    %453 = arith.truncf %452 : vector<1x16xf32> to vector<1x16xbf16>
    %c12_507 = arith.constant 12 : index
    %c0_508 = arith.constant 0 : index
    %c0_509 = arith.constant 0 : index
    %454 = vector.load %arg6[%c12_507, %c0_508, %c0_509] : memref<16x16x128xbf16, #tpu.memory_space<vmem>>, vector<1x16x128xbf16>
    %455 = vector.shape_cast %454 : vector<1x16x128xbf16> to vector<16x128xbf16>
    %cst_510 = arith.constant dense<0.000000e+00> : vector<1x128xf32>
    %456 = tpu.matmul %453, %455, %cst_510 {dimension_numbers = #tpu.dot_dimension_numbers<[1], [0], [0], [1], [0, 0, 1, 1], [], []>} : vector<1x16xbf16>, vector<16x128xbf16>, vector<1x128xf32> -> vector<1x128xf32>
    %457 = arith.addf %437, %456 : vector<1x128xf32>
    %c0_511 = arith.constant 0 : index
    %c6_512 = arith.constant 6 : index
    %c2_513 = arith.constant 2 : index
    %c0_514 = arith.constant 0 : index
    %458 = vector.load %arg15[%c0_511, %c6_512, %c2_513, %c0_514] : memref<1x8x8x16xf32, #tpu.memory_space<vmem>>, vector<1x1x1x16xf32>
    %459 = vector.shape_cast %458 : vector<1x1x1x16xf32> to vector<1x16xf32>
    %c0_515 = arith.constant 0 : index
    %c6_516 = arith.constant 6 : index
    %c3_517 = arith.constant 3 : index
    %c0_518 = arith.constant 0 : index
    %460 = vector.load %arg15[%c0_515, %c6_516, %c3_517, %c0_518] : memref<1x8x8x16xf32, #tpu.memory_space<vmem>>, vector<1x1x1x16xf32>
    %461 = vector.shape_cast %460 : vector<1x1x1x16xf32> to vector<1x16xf32>
    %462 = arith.maximumf %459, %461 : vector<1x16xf32>
    %c0_519 = arith.constant 0 : index
    %c7_520 = arith.constant 7 : index
    %c2_521 = arith.constant 2 : index
    %c0_522 = arith.constant 0 : index
    %463 = vector.load %arg15[%c0_519, %c7_520, %c2_521, %c0_522] : memref<1x8x8x16xf32, #tpu.memory_space<vmem>>, vector<1x1x1x16xf32>
    %464 = vector.shape_cast %463 : vector<1x1x1x16xf32> to vector<1x16xf32>
    %c0_523 = arith.constant 0 : index
    %c7_524 = arith.constant 7 : index
    %c3_525 = arith.constant 3 : index
    %c0_526 = arith.constant 0 : index
    %465 = vector.load %arg15[%c0_523, %c7_524, %c3_525, %c0_526] : memref<1x8x8x16xf32, #tpu.memory_space<vmem>>, vector<1x1x1x16xf32>
    %466 = vector.shape_cast %465 : vector<1x1x1x16xf32> to vector<1x16xf32>
    %467 = arith.maximumf %464, %466 : vector<1x16xf32>
    %468 = arith.maximumf %462, %467 : vector<1x16xf32>
    %c0_527 = arith.constant 0 : index
    %c0_528 = arith.constant 0 : index
    %469 = vector.load %arg5[%c0_527, %c0_528] : memref<1x16xf32, #tpu.memory_space<vmem>>, vector<1x16xf32>
    %470 = arith.addf %468, %469 : vector<1x16xf32>
    %cst_529 = arith.constant 0.000000e+00 : f32
    %471 = vector.broadcast %cst_529 : f32 to vector<1x16xf32>
    %472 = arith.maximumf %470, %471 : vector<1x16xf32>
    %473 = arith.truncf %472 : vector<1x16xf32> to vector<1x16xbf16>
    %c13_530 = arith.constant 13 : index
    %c0_531 = arith.constant 0 : index
    %c0_532 = arith.constant 0 : index
    %474 = vector.load %arg6[%c13_530, %c0_531, %c0_532] : memref<16x16x128xbf16, #tpu.memory_space<vmem>>, vector<1x16x128xbf16>
    %475 = vector.shape_cast %474 : vector<1x16x128xbf16> to vector<16x128xbf16>
    %cst_533 = arith.constant dense<0.000000e+00> : vector<1x128xf32>
    %476 = tpu.matmul %473, %475, %cst_533 {dimension_numbers = #tpu.dot_dimension_numbers<[1], [0], [0], [1], [0, 0, 1, 1], [], []>} : vector<1x16xbf16>, vector<16x128xbf16>, vector<1x128xf32> -> vector<1x128xf32>
    %477 = arith.addf %457, %476 : vector<1x128xf32>
    %c0_534 = arith.constant 0 : index
    %c6_535 = arith.constant 6 : index
    %c4_536 = arith.constant 4 : index
    %c0_537 = arith.constant 0 : index
    %478 = vector.load %arg15[%c0_534, %c6_535, %c4_536, %c0_537] : memref<1x8x8x16xf32, #tpu.memory_space<vmem>>, vector<1x1x1x16xf32>
    %479 = vector.shape_cast %478 : vector<1x1x1x16xf32> to vector<1x16xf32>
    %c0_538 = arith.constant 0 : index
    %c6_539 = arith.constant 6 : index
    %c5_540 = arith.constant 5 : index
    %c0_541 = arith.constant 0 : index
    %480 = vector.load %arg15[%c0_538, %c6_539, %c5_540, %c0_541] : memref<1x8x8x16xf32, #tpu.memory_space<vmem>>, vector<1x1x1x16xf32>
    %481 = vector.shape_cast %480 : vector<1x1x1x16xf32> to vector<1x16xf32>
    %482 = arith.maximumf %479, %481 : vector<1x16xf32>
    %c0_542 = arith.constant 0 : index
    %c7_543 = arith.constant 7 : index
    %c4_544 = arith.constant 4 : index
    %c0_545 = arith.constant 0 : index
    %483 = vector.load %arg15[%c0_542, %c7_543, %c4_544, %c0_545] : memref<1x8x8x16xf32, #tpu.memory_space<vmem>>, vector<1x1x1x16xf32>
    %484 = vector.shape_cast %483 : vector<1x1x1x16xf32> to vector<1x16xf32>
    %c0_546 = arith.constant 0 : index
    %c7_547 = arith.constant 7 : index
    %c5_548 = arith.constant 5 : index
    %c0_549 = arith.constant 0 : index
    %485 = vector.load %arg15[%c0_546, %c7_547, %c5_548, %c0_549] : memref<1x8x8x16xf32, #tpu.memory_space<vmem>>, vector<1x1x1x16xf32>
    %486 = vector.shape_cast %485 : vector<1x1x1x16xf32> to vector<1x16xf32>
    %487 = arith.maximumf %484, %486 : vector<1x16xf32>
    %488 = arith.maximumf %482, %487 : vector<1x16xf32>
    %c0_550 = arith.constant 0 : index
    %c0_551 = arith.constant 0 : index
    %489 = vector.load %arg5[%c0_550, %c0_551] : memref<1x16xf32, #tpu.memory_space<vmem>>, vector<1x16xf32>
    %490 = arith.addf %488, %489 : vector<1x16xf32>
    %cst_552 = arith.constant 0.000000e+00 : f32
    %491 = vector.broadcast %cst_552 : f32 to vector<1x16xf32>
    %492 = arith.maximumf %490, %491 : vector<1x16xf32>
    %493 = arith.truncf %492 : vector<1x16xf32> to vector<1x16xbf16>
    %c14_553 = arith.constant 14 : index
    %c0_554 = arith.constant 0 : index
    %c0_555 = arith.constant 0 : index
    %494 = vector.load %arg6[%c14_553, %c0_554, %c0_555] : memref<16x16x128xbf16, #tpu.memory_space<vmem>>, vector<1x16x128xbf16>
    %495 = vector.shape_cast %494 : vector<1x16x128xbf16> to vector<16x128xbf16>
    %cst_556 = arith.constant dense<0.000000e+00> : vector<1x128xf32>
    %496 = tpu.matmul %493, %495, %cst_556 {dimension_numbers = #tpu.dot_dimension_numbers<[1], [0], [0], [1], [0, 0, 1, 1], [], []>} : vector<1x16xbf16>, vector<16x128xbf16>, vector<1x128xf32> -> vector<1x128xf32>
    %497 = arith.addf %477, %496 : vector<1x128xf32>
    %c0_557 = arith.constant 0 : index
    %c6_558 = arith.constant 6 : index
    %c6_559 = arith.constant 6 : index
    %c0_560 = arith.constant 0 : index
    %498 = vector.load %arg15[%c0_557, %c6_558, %c6_559, %c0_560] : memref<1x8x8x16xf32, #tpu.memory_space<vmem>>, vector<1x1x1x16xf32>
    %499 = vector.shape_cast %498 : vector<1x1x1x16xf32> to vector<1x16xf32>
    %c0_561 = arith.constant 0 : index
    %c6_562 = arith.constant 6 : index
    %c7_563 = arith.constant 7 : index
    %c0_564 = arith.constant 0 : index
    %500 = vector.load %arg15[%c0_561, %c6_562, %c7_563, %c0_564] : memref<1x8x8x16xf32, #tpu.memory_space<vmem>>, vector<1x1x1x16xf32>
    %501 = vector.shape_cast %500 : vector<1x1x1x16xf32> to vector<1x16xf32>
    %502 = arith.maximumf %499, %501 : vector<1x16xf32>
    %c0_565 = arith.constant 0 : index
    %c7_566 = arith.constant 7 : index
    %c6_567 = arith.constant 6 : index
    %c0_568 = arith.constant 0 : index
    %503 = vector.load %arg15[%c0_565, %c7_566, %c6_567, %c0_568] : memref<1x8x8x16xf32, #tpu.memory_space<vmem>>, vector<1x1x1x16xf32>
    %504 = vector.shape_cast %503 : vector<1x1x1x16xf32> to vector<1x16xf32>
    %c0_569 = arith.constant 0 : index
    %c7_570 = arith.constant 7 : index
    %c7_571 = arith.constant 7 : index
    %c0_572 = arith.constant 0 : index
    %505 = vector.load %arg15[%c0_569, %c7_570, %c7_571, %c0_572] : memref<1x8x8x16xf32, #tpu.memory_space<vmem>>, vector<1x1x1x16xf32>
    %506 = vector.shape_cast %505 : vector<1x1x1x16xf32> to vector<1x16xf32>
    %507 = arith.maximumf %504, %506 : vector<1x16xf32>
    %508 = arith.maximumf %502, %507 : vector<1x16xf32>
    %c0_573 = arith.constant 0 : index
    %c0_574 = arith.constant 0 : index
    %509 = vector.load %arg5[%c0_573, %c0_574] : memref<1x16xf32, #tpu.memory_space<vmem>>, vector<1x16xf32>
    %510 = arith.addf %508, %509 : vector<1x16xf32>
    %cst_575 = arith.constant 0.000000e+00 : f32
    %511 = vector.broadcast %cst_575 : f32 to vector<1x16xf32>
    %512 = arith.maximumf %510, %511 : vector<1x16xf32>
    %513 = arith.truncf %512 : vector<1x16xf32> to vector<1x16xbf16>
    %c15_576 = arith.constant 15 : index
    %c0_577 = arith.constant 0 : index
    %c0_578 = arith.constant 0 : index
    %514 = vector.load %arg6[%c15_576, %c0_577, %c0_578] : memref<16x16x128xbf16, #tpu.memory_space<vmem>>, vector<1x16x128xbf16>
    %515 = vector.shape_cast %514 : vector<1x16x128xbf16> to vector<16x128xbf16>
    %cst_579 = arith.constant dense<0.000000e+00> : vector<1x128xf32>
    %516 = tpu.matmul %513, %515, %cst_579 {dimension_numbers = #tpu.dot_dimension_numbers<[1], [0], [0], [1], [0, 0, 1, 1], [], []>} : vector<1x16xbf16>, vector<16x128xbf16>, vector<1x128xf32> -> vector<1x128xf32>
    %517 = arith.addf %497, %516 : vector<1x128xf32>
    %c0_580 = arith.constant 0 : index
    %c0_581 = arith.constant 0 : index
    %518 = vector.load %arg7[%c0_580, %c0_581] : memref<1x128xf32, #tpu.memory_space<vmem>>, vector<1x128xf32>
    %519 = arith.addf %517, %518 : vector<1x128xf32>
    %cst_582 = arith.constant 0.000000e+00 : f32
    %520 = vector.broadcast %cst_582 : f32 to vector<1x128xf32>
    %521 = arith.maximumf %519, %520 : vector<1x128xf32>
    %522 = arith.truncf %521 : vector<1x128xf32> to vector<1x128xbf16>
    %c0_583 = arith.constant 0 : index
    %c0_584 = arith.constant 0 : index
    %523 = vector.load %arg8[%c0_583, %c0_584] : memref<128x128xbf16, #tpu.memory_space<vmem>>, vector<128x128xbf16>
    %cst_585 = arith.constant dense<0.000000e+00> : vector<1x128xf32>
    %524 = tpu.matmul %522, %523, %cst_585 {dimension_numbers = #tpu.dot_dimension_numbers<[1], [0], [0], [1], [0, 0, 1, 1], [], []>} : vector<1x128xbf16>, vector<128x128xbf16>, vector<1x128xf32> -> vector<1x128xf32>
    %c0_586 = arith.constant 0 : index
    %c0_587 = arith.constant 0 : index
    %525 = vector.load %arg9[%c0_586, %c0_587] : memref<1x128xf32, #tpu.memory_space<vmem>>, vector<1x128xf32>
    %526 = arith.addf %524, %525 : vector<1x128xf32>
    %cst_588 = arith.constant 0.000000e+00 : f32
    %527 = vector.broadcast %cst_588 : f32 to vector<1x128xf32>
    %528 = arith.maximumf %526, %527 : vector<1x128xf32>
    %529 = arith.truncf %528 : vector<1x128xf32> to vector<1x128xbf16>
    %c0_589 = arith.constant 0 : index
    %c0_590 = arith.constant 0 : index
    %530 = vector.load %arg10[%c0_589, %c0_590] : memref<128x128xbf16, #tpu.memory_space<vmem>>, vector<128x128xbf16>
    %cst_591 = arith.constant dense<0.000000e+00> : vector<1x128xf32>
    %531 = tpu.matmul %529, %530, %cst_591 {dimension_numbers = #tpu.dot_dimension_numbers<[1], [0], [0], [1], [0, 0, 1, 1], [], []>} : vector<1x128xbf16>, vector<128x128xbf16>, vector<1x128xf32> -> vector<1x128xf32>
    %c0_592 = arith.constant 0 : index
    %c0_593 = arith.constant 0 : index
    %532 = vector.load %arg11[%c0_592, %c0_593] : memref<1x128xf32, #tpu.memory_space<vmem>>, vector<1x128xf32>
    %533 = arith.addf %531, %532 : vector<1x128xf32>
    %c0_594 = arith.constant 0 : index
    %c0_595 = arith.constant 0 : index
    %c0_596 = arith.constant 0 : index
    %534 = vector.load %arg12[%c0_594, %c0_595, %c0_596] : memref<1x1x128xf32, #tpu.memory_space<vmem>>, vector<1x1x128xf32>
    %535 = vector.shape_cast %534 : vector<1x1x128xf32> to vector<1x128xf32>
    %536 = vector.shape_cast %533 : vector<1x128xf32> to vector<1x1x128xf32>
    tpu.vector_store %arg12[%c0_594, %c0_595, %c0_596], %536 {strides = array<i32>} : memref<1x1x128xf32, #tpu.memory_space<vmem>>, vector<1x1x128xf32>,
    return
  }
  func.func @transform_0(%arg0: i32) -> (i32, i32) {
    %c0_i32 = arith.constant 0 : i32
    %c0_i32_0 = arith.constant 0 : i32
    return %arg0, %c0_i32 : i32, i32
  }
  func.func @transform_1(%arg0: i32) -> (i32, i32) {
    %c0_i32 = arith.constant 0 : i32
    %c0_i32_0 = arith.constant 0 : i32
    %c0_i32_1 = arith.constant 0 : i32
    return %c0_i32, %c0_i32_0 : i32, i32
  }
  func.func @transform_2(%arg0: i32) -> (i32, i32) {
    %c0_i32 = arith.constant 0 : i32
    %c0_i32_0 = arith.constant 0 : i32
    %c0_i32_1 = arith.constant 0 : i32
    return %c0_i32, %c0_i32_0 : i32, i32
  }
  func.func @transform_3(%arg0: i32) -> (i32, i32, i32) {
    %c0_i32 = arith.constant 0 : i32
    %c0_i32_0 = arith.constant 0 : i32
    %c0_i32_1 = arith.constant 0 : i32
    %c0_i32_2 = arith.constant 0 : i32
    return %c0_i32, %c0_i32_0, %c0_i32_1 : i32, i32, i32
  }
  func.func @transform_4(%arg0: i32) -> (i32, i32) {
    %c0_i32 = arith.constant 0 : i32
    %c0_i32_0 = arith.constant 0 : i32
    %c0_i32_1 = arith.constant 0 : i32
    return %c0_i32, %c0_i32_0 : i32, i32
  }
  func.func @transform_5(%arg0: i32) -> (i32, i32, i32) {
    %c0_i32 = arith.constant 0 : i32
    %c0_i32_0 = arith.constant 0 : i32
    %c0_i32_1 = arith.constant 0 : i32
    %c0_i32_2 = arith.constant 0 : i32
    return %c0_i32, %c0_i32_0, %c0_i32_1 : i32, i32, i32
  }
  func.func @transform_6(%arg0: i32) -> (i32, i32) {
    %c0_i32 = arith.constant 0 : i32
    %c0_i32_0 = arith.constant 0 : i32
    %c0_i32_1 = arith.constant 0 : i32
    return %c0_i32, %c0_i32_0 : i32, i32
  }
  func.func @transform_7(%arg0: i32) -> (i32, i32) {
    %c0_i32 = arith.constant 0 : i32
    %c0_i32_0 = arith.constant 0 : i32
    %c0_i32_1 = arith.constant 0 : i32
    return %c0_i32, %c0_i32_0 : i32, i32
  }
  func.func @transform_8(%arg0: i32) -> (i32, i32) {
    %c0_i32 = arith.constant 0 : i32
    %c0_i32_0 = arith.constant 0 : i32
    %c0_i32_1 = arith.constant 0 : i32
    return %c0_i32, %c0_i32_0 : i32, i32
  }
  func.func @transform_9(%arg0: i32) -> (i32, i32) {
    %c0_i32 = arith.constant 0 : i32
    %c0_i32_0 = arith.constant 0 : i32
    %c0_i32_1 = arith.constant 0 : i32
    return %c0_i32, %c0_i32_0 : i32, i32
  }
  func.func @transform_10(%arg0: i32) -> (i32, i32) {
    %c0_i32 = arith.constant 0 : i32
    %c0_i32_0 = arith.constant 0 : i32
    %c0_i32_1 = arith.constant 0 : i32
    return %c0_i32, %c0_i32_0 : i32, i32
  }
  func.func @transform_11(%arg0: i32) -> (i32, i32, i32) {
    %c0_i32 = arith.constant 0 : i32
    %c0_i32_0 = arith.constant 0 : i32
    %c0_i32_1 = arith.constant 0 : i32
    return %arg0, %c0_i32, %c0_i32_0 : i32, i32, i32
  }
}

</mosaic_0001>

<bundles_post_ra>
// kernel: lenet2_forward.1
= control target key start
LH: loop header
LB: loop body
LE: loop exit
PB: predicated region body
PF: predicated region fallthrough
CT: control target
= control target key end

     0   :  { %s7997_s0 = inlined_call_operand.vmem [shape: bf16[1152,75], index: 0, kind: input, shape index: {}]   ;;  %s7998_s1 = inlined_call_operand.vmem [shape: bf16[75,8], index: 1, kind: input, shape index: {}]   ;;  %s7999_s2 = inlined_call_operand.vmem [shape: f32[1,8], index: 2, kind: input, shape index: {}]   ;;  %s8000_s3 = inlined_call_operand.vmem [shape: bf16[25,8,16], index: 3, kind: input, shape index: {}]   ;;  %s8001_s4 = inlined_call_operand.vmem [shape: f32[1,16], index: 4, kind: input, shape index: {}]   ;;  %s8002_s5 = inlined_call_operand.vmem [shape: bf16[16,16,128], index: 5, kind: input, shape index: {}]   ;;  %s8003_s6 = inlined_call_operand.vmem [shape: f32[1,128], index: 6, kind: input, shape index: {}]   ;;  %s8004_s7 = inlined_call_operand.vmem [shape: bf16[128,128], index: 7, kind: input, shape index: {}]   ;;  %s8005_s8 = inlined_call_operand.vmem [shape: f32[1,128], index: 8, kind: input, shape index: {}]   ;;  %s8006_s9 = inlined_call_operand.vmem [shape: bf16[128,128], index: 9, kind: input, shape index: {}]   ;;  %s8007_s10 = inlined_call_operand.vmem [shape: f32[1,128], index: 10, kind: input, shape index: {}]   ;;  %s8008_s11 = inlined_call_operand.hbm [shape: f32[2,1,128], index: 11, kind: output, shape index: {}]  }
   0x1   :  { %8017 = sst [smem:[#allocation31_spill]] %s7997_s0 }
   0x2   :  { %16 = vsyncpa [#allocation6], 0 }
   0x3   :  { %18 = vsyncpa [#allocation6 + $0x1], 0  ;;  %s6661_s17 = smov 0   ;;  %s6663_s18 = smov 0  }
   0x4   :  { %s6665_s19 = smov 0   ;;  %s6667_s20 = smov 0  }
   0x5 LB: > { %s6682_s21 = sadd.s32 4294967295, %s6595_s20   ;;  %s5423_s22 = sadd.s32 4294967294, %s6595_s20   ;;  %s6595_s20 = sphi %s6667_s20, %s8091_s20   ;;  %s6591_s19 = sphi %s6665_s19, %s8090_s19   ;;  %s6587_s18 = sphi %s6663_s18, %s8089_s18   ;;  %s6583_s17 = sphi %s6661_s17, %s8088_s17  }
   0x6   : > { %s6686_s23 = sadd.s32 1, %s6595_s20   ;;  %s267_s24 = sadd.s32 1, %s6591_s19 }
   0x7   : > { %s264_s25 = ssub.s32 %s6595_s20, %s6686_s23  ;;  %p277_p0 = scmp.ne.s32.totalorder %s6591_s19, %s6587_s18 }
   0x8   : > { %p265_p1 = scmp.eq.s32.totalorder %s264_s25, 0  ;;  %p278_p2 = scmp.eq.s32.totalorder %s6682_s21, 1 }
   0x9   : > { %p283_p3 = scmp.ne.s32.totalorder %s6587_s18, %s6583_s17  ;;  %p284_p4 = scmp.eq.s32.totalorder %s5423_s22, 1 }
   0xa   : > { %s6697_s26 = scalar_select %p265_p1, %s6591_s19, %s267_s24  }
   0xb   : > { %p6699_p5 = por %p278_p2, %p277_p0  ;;  %p6703_p6 = por %p284_p4, %p283_p3 }
   0xc   : > { %p5426_p7 = scmp.ge.s32.totalorder %s6595_s20, 1  ;;  %p341_p8 = scmp.lt.s32.totalorder %s6595_s20, 3 }
   0xe   : > { %p342_p9 = pnand %p5426_p7, %p341_p8 }
  0x10   : > { %345 = sbr.rel (%p342_p9) target bundleno = 1502 (0x5de), region = 64 }
  0x15   : > { %v6462_v0 = vld [vmem:[%s7998_s1 + $0x20] sm:$0x3f]   ;;  %vm787_vm0 = vcmask 1044480   ;;  %vm788_vm1 = vcmask 1045504   ;;  %v6597_v1 = vmov 65535   ;;  %v6463_v4 = vld [vmem:[%s7998_s1 + $0x18] sm:$0xff]  }
  0x16   : > { %v789_v2 = vsel %vm787_vm0, 4294967295, %v6597_v1  ;;  %s380_s14 = smul.u32 72, %s6682_s21  ;;  %v6464_v6 = vld [vmem:[%s7998_s1 + $0x10] sm:$0xff]   ;;  %v6465_v7 = vld [vmem:[%s7998_s1 + $0x8] sm:$0xff]   ;;  %vm678_vm2 = vcmask 613376   ;;  %s8020_s0 = sld [smem:[#allocation31_spill]] }
  0x17   : > { %v790_v3 = vsel %vm788_vm1, %v789_v2, 0  ;;  %v6466_v9 = vld [vmem:[%s7998_s1] sm:$0xff]   ;;  %vm1570_vm3 = vcmask 1043456   ;;  %v5555_v47 = vld [vmem:[%s8000_s3 + $0x28] sm:$0xf]  ;;  %vm1115_vm4 = vcmask 64512  }
  0x18   : > { %v792_v5 = vand.u32 %v6462_v0, %v790_v3  ;;  %p381_p10 = scmp.lt.s32.totalorder %s380_s14, 143  ;;  %v5506_v45 = vld [vmem:[%s8000_s3 + $0x4] sm:$0xf]  ;;  %v2564_v48 = vsel %vm1570_vm3, %v5555_v47, 0  ;;  %v6815_v49 = vld [vmem:[%s8000_s3] sm:$0xf] }
  0x19   : > { %6395 = vmatprep.subr.msk.bf16.mxu1 %vm1570_vm3, %v5506_v45  ;;  %v1572_v46 = vsel %vm1570_vm3, %v5506_v45, 0  ;;  %v6832_v2 = vld [vmem:[%s7999_s2] ss:$0 sm:$0xff]  ;;  %v6837_v3 = vld [vmem:[%s8000_s3 + $0x30] sm:$0xf]  ;;  %vm1507_vm5 = vcmask 60416  }
  0x1a   : > { %5927 = vmatprep.subr.bf16.mxu0 %v792_v5  ;;  %s8093_s14 = smov (!%p381_p10, %s380_s14), 143  ;;  %6010 = vmatpush3.bf16.msra.mxu1 %v1572_v46  ;;  %vm6599_vm6 = vmmov 0   ;;  %vm4069_vm7 = vcmask 130048   ;;  %s378_s22 = sand.u32 1, %s6587_s18  }
  0x1b   : > { %5928 = vmatpush3.bf16.msra.mxu0 %v792_v5  ;;  %s5427_s25 = sshll.u32 %s8093_s14, 2  ;;  %6396 = vmatprep.subr.msk.bf16.mxu1 %vm1570_vm3, %v6815_v49  ;;  %s5708_s29 = sshll.u32 %s6682_s21, 4 }
  0x1c   : > { %5929 = vmatprep.subr.bf16.mxu0 %v6463_v4  ;;  %s6725_s12 = scalar_lea.vmem %s8020_s0, %s5427_s25  ;;  %s379_s30 = scalar_lea.vmem [#allocation5], %s378_s22 }
  0x1d   : > { %v6467_v8 = vld [vmem:[%s6725_s12] sm:$0xff]   ;;  %v6468_v10 = vld [vmem:[%s6725_s12 + $0x8] sm:$0xff]   ;;  %v6469_v11 = vld [vmem:[%s6725_s12 + $0x10] sm:$0xff]   ;;  %s7956_s15 = scalar_lea.hbm %s8008_s11, %s5708_s29  ;;  %s5309_s16 = scalar_lea.sflag [#allocation6], %s378_s22 }
  0x1e   : > { %5937 = vmatprep.mubr.msk.bf16.mxu0 %vm678_vm2, %v6467_v8  ;;  %v6470_v12 = vld [vmem:[%s6725_s12 + $0x18] sm:$0xff]   ;;  %v6471_v13 = vld [vmem:[%s6725_s12 + $0x20] sm:$0xff]   ;;  %v6472_v14 = vld [vmem:[%s6725_s12 + $0x28] sm:$0xff]   ;;  %s6600_s21 = smov [#allocation5]  }
  0x1f   : > { %5930 = vmatpush3.bf16.msra.mxu0 %v6463_v4  ;;  %v6473_v15 = vld [vmem:[%s6725_s12 + $0x30] sm:$0xff]   ;;  %v6474_v16 = vld [vmem:[%s6725_s12 + $0x38] sm:$0xff]   ;;  %v6475_v17 = vld [vmem:[%s6725_s12 + $0x40] sm:$0xff]   ;;  %s6539_s25 = sshll.u32 %s6600_s21, 4  ;;  %s6540_s25 = int_to_ptr.vmem [resolvable:$false] %s6539_s25 }
  0x20   : > { %5931 = vmatprep.subr.bf16.mxu0 %v6464_v6  ;;  %v6476_v18 = vld [vmem:[%s6725_s12 + $0x48] sm:$0xff]   ;;  %v6477_v19 = vld [vmem:[%s6725_s12 + $0x50] sm:$0xff]   ;;  %v6478_v20 = vld [vmem:[%s6725_s12 + $0x58] sm:$0xff]   ;;  %s6541_s13 = scalar_lea.vmem %s6540_s25, 32 }
  0x21   : > { %v6479_v21 = vld [vmem:[%s6725_s12 + $0x60] sm:$0xff]   ;;  %v6480_v22 = vld [vmem:[%s6725_s12 + $0x68] sm:$0xff]   ;;  %v6481_v23 = vld [vmem:[%s6725_s12 + $0x70] sm:$0xff]  }
  0x22   : > { %v6482_v24 = vld [vmem:[%s6725_s12 + $0x78] sm:$0xff]   ;;  %v6483_v25 = vld [vmem:[%s6725_s12 + $0x80] sm:$0xff]   ;;  %v6484_v26 = vld [vmem:[%s6725_s12 + $0x88] sm:$0xff]  }
  0x23   : > { %5932 = vmatpush3.bf16.msra.mxu0 %v6464_v6  ;;  %v6485_v27 = vld [vmem:[%s6725_s12 + $0x90] sm:$0xff]   ;;  %v6486_v28 = vld [vmem:[%s6725_s12 + $0x98] sm:$0xff]   ;;  %v6487_v29 = vld [vmem:[%s6725_s12 + $0xa0] sm:$0xff]  }
  0x24   : > { %5933 = vmatprep.subr.bf16.mxu0 %v6465_v7  ;;  %v6488_v30 = vld [vmem:[%s6725_s12 + $0xa8] sm:$0xff]   ;;  %v6489_v31 = vld [vmem:[%s6725_s12 + $0xb0] sm:$0xff]   ;;  %v6490_v32 = vld [vmem:[%s6725_s12 + $0xb8] sm:$0xff]  }
  0x25   : > { %v6491_v33 = vld [vmem:[%s6725_s12 + $0xc0] sm:$0xff]   ;;  %v6492_v34 = vld [vmem:[%s6725_s12 + $0xc8] sm:$0xff]   ;;  %v6493_v35 = vld [vmem:[%s6725_s12 + $0xd0] sm:$0xff]  }
  0x26   : > { %v6494_v36 = vld [vmem:[%s6725_s12 + $0xd8] sm:$0xff]   ;;  %v6495_v37 = vld [vmem:[%s6725_s12 + $0xe0] sm:$0xff]   ;;  %v6496_v38 = vld [vmem:[%s6725_s12 + $0xe8] sm:$0xff]  }
  0x27   : > { %5934 = vmatpush3.bf16.msra.mxu0 %v6465_v7  ;;  %v6497_v39 = vld [vmem:[%s6725_s12 + $0xf0] sm:$0xff]   ;;  %v6498_v40 = vld [vmem:[%s6725_s12 + $0xf8] sm:$0xff]   ;;  %v6499_v41 = vld [vmem:[%s6725_s12 + $0x100] sm:$0xff]  }
  0x28   : > { %5935 = vmatprep.subr.bf16.mxu0 %v6466_v9  ;;  %v6500_v42 = vld [vmem:[%s6725_s12 + $0x108] sm:$0xff]   ;;  %v6501_v43 = vld [vmem:[%s6725_s12 + $0x110] sm:$0xff]   ;;  %v6502_v44 = vld [vmem:[%s6725_s12 + $0x118] sm:$0xff]   ;;  %s5321_s12 = sshll.u32 %s379_s30, 4  ;;  %s7958_s12 = int_to_ptr.vmem [resolvable:$true] %s5321_s12 }
  0x29   : > { %s6535_s24 = scalar_lea.vmem %s7958_s12, 16  ;;  %p6542_p0 = scmp.lt.s32.totalorder %s7958_s12, %s6540_s25 }
  0x2a   : > { %p6536_p11 = scmp.ne.s32.totalorder %s7958_s12, %s6535_s24  ;;  %p6543_p1 = scmp.lt.s32.totalorder %s6541_s13, %s6535_s24 }
  0x2b   : > { %5936 = vmatpush3.bf16.msra.mxu0 %v6466_v9 }
  0x2c   : > { %6405 = vmatprep.subr.msk.bf16.mxu0 %vm1570_vm3, %v5555_v47  ;;  %p6537_p12 = pnand %p6536_p11, %p6699_p5  ;;  %p6544_p2 = por %p6543_p1, %p6542_p0 }
  0x2e   : > { %5938 = vmatmul.mubr.msk.bf16.vlgmr.msra.gmra.mxu0 %vm678_vm2, %v6468_v10  ;;  %p6538_p13 = pneg %p6537_p12 }
  0x2f   : > { %5941 = vmatprep.mubr.msk.bf16.mxu0 %vm678_vm2, %v6469_v11  ;;  %6110 = vmatpush3.bf16.msra.mxu0 %v2564_v48 }
  0x30   : > { %6407 = vmatprep.subr.msk.bf16.mxu0 %vm1570_vm3, %v6837_v3  ;;  %p6545_p3 = pnand %p6544_p2, %p6538_p13 }
  0x36   : > { %5942 = vmatmul.mubr.msk.bf16.gmra.mxu0 %vm678_vm2, %v6470_v12 }
  0x37   : > { %5945 = vmatprep.mubr.msk.bf16.mxu0 %vm678_vm2, %v6471_v13 }
  0x3e   : > { %5946 = vmatmul.mubr.msk.bf16.gmra.mxu0 %vm678_vm2, %v6472_v14 }
  0x3f   : > { %5949 = vmatprep.mubr.msk.bf16.mxu0 %vm678_vm2, %v6473_v15 }
  0x46   : > { %5950 = vmatmul.mubr.msk.bf16.gmra.mxu0 %vm678_vm2, %v6474_v16 }
  0x47   : > { %5953 = vmatprep.mubr.msk.bf16.mxu0 %vm678_vm2, %v6475_v17 }
  0x4e   : > { %5954 = vmatmul.mubr.msk.bf16.gmra.mxu0 %vm678_vm2, %v6476_v18 }
  0x4f   : > { %5957 = vmatprep.mubr.msk.bf16.mxu0 %vm678_vm2, %v6477_v19 }
  0x56   : > { %5958 = vmatmul.mubr.msk.bf16.gmra.mxu0 %vm678_vm2, %v6478_v20 }
  0x57   : > { %5961 = vmatprep.mubr.msk.bf16.mxu0 %vm678_vm2, %v6479_v21 }
  0x5e   : > { %5962 = vmatmul.mubr.msk.bf16.gmra.mxu0 %vm678_vm2, %v6480_v22 }
  0x5f   : > { %5965 = vmatprep.mubr.msk.bf16.mxu0 %vm678_vm2, %v6481_v23 }
  0x66   : > { %5966 = vmatmul.mubr.msk.bf16.gmra.mxu0 %vm678_vm2, %v6482_v24 }
  0x67   : > { %5969 = vmatprep.mubr.msk.bf16.mxu0 %vm678_vm2, %v6483_v25 }
  0x6e   : > { %5970 = vmatmul.mubr.msk.bf16.gmra.mxu0 %vm678_vm2, %v6484_v26 }
  0x6f   : > { %5973 = vmatprep.mubr.msk.bf16.mxu0 %vm678_vm2, %v6485_v27 }
  0x76   : > { %5974 = vmatmul.mubr.msk.bf16.gmra.mxu0 %vm678_vm2, %v6486_v28 }
  0x77   : > { %5977 = vmatprep.mubr.msk.bf16.mxu0 %vm678_vm2, %v6487_v29 }
  0x7e   : > { %5978 = vmatmul.mubr.msk.bf16.gmra.mxu0 %vm678_vm2, %v6488_v30 }
  0x7f   : > { %5981 = vmatprep.mubr.msk.bf16.mxu0 %vm678_vm2, %v6489_v31 }
  0x86   : > { %5982 = vmatmul.mubr.msk.bf16.gmra.mxu0 %vm678_vm2, %v6490_v32 }
  0x87   : > { %5985 = vmatprep.mubr.msk.bf16.mxu0 %vm678_vm2, %v6491_v33 }
  0x8e   : > { %5986 = vmatmul.mubr.msk.bf16.gmra.mxu0 %vm678_vm2, %v6492_v34 }
  0x8f   : > { %5989 = vmatprep.mubr.msk.bf16.mxu0 %vm678_vm2, %v6493_v35 }
  0x96   : > { %5990 = vmatmul.mubr.msk.bf16.gmra.mxu0 %vm678_vm2, %v6494_v36 }
  0x97   : > { %5993 = vmatprep.mubr.msk.bf16.mxu0 %vm678_vm2, %v6495_v37 }
  0x9e   : > { %5994 = vmatmul.mubr.msk.bf16.gmra.mxu0 %vm678_vm2, %v6496_v38 }
  0x9f   : > { %5997 = vmatprep.mubr.msk.bf16.mxu0 %vm678_vm2, %v6497_v39 }
  0xa6   : > { %5998 = vmatmul.mubr.msk.bf16.gmra.mxu0 %vm678_vm2, %v6498_v40 }
  0xa7   : > { %6001 = vmatprep.mubr.msk.bf16.mxu0 %vm678_vm2, %v6499_v41 }
  0xae   : > { %6002 = vmatmul.mubr.msk.bf16.gmra.mxu0 %vm678_vm2, %v6500_v42 }
  0xaf   : > { %6005 = vmatprep.mubr.msk.bf16.mxu0 %vm678_vm2, %v6501_v43 }
  0xb6   : > { %6006 = vmatmul.mubr.msk.bf16.gmra.mxu0 %vm678_vm2, %v6502_v44 }
  0xee   : > { %v5939_v50 = vpop.f32.mrf.mxu0 }
  0xef   : > { %1118 = vst.msk [vmem:[#allocation2 + $0x10] sm:$0xff] %vm1115_vm4, %v5939_v50 }
  0xf0   : > { %v828_v51 = vpop.f32.mrf.mxu0 }
  0xf1   : > { %1116 = vst.msk [vmem:[#allocation2] sm:$0xff] %vm1115_vm4, %v828_v51 }
  0xf2   : > { %v5940_v52 = vpop.f32.mrf.mxu0 }
  0xf3   : > { %1119 = vst.msk [vmem:[#allocation2 + $0x18] sm:$0xff] %vm1115_vm4, %v5940_v52 }
  0xf4   : > { %v831_v53 = vpop.f32.mrf.mxu0 }
  0xf5   : > { %1117 = vst.msk [vmem:[#allocation2 + $0x8] sm:$0xff] %vm1115_vm4, %v831_v53 }
  0xf6   : > { %v5943_v54 = vpop.f32.mrf.mxu0  ;;  %v1190_v4 = vld [vmem:[#allocation2 + $0x10] ss:$2 sm:$0xf]  ;;  %v1238_v5 = vld [vmem:[#allocation2 + $0x11] ss:$2 sm:$0xf] }
  0xf7   : > { %1122 = vst.msk [vmem:[#allocation2 + $0x30] sm:$0xff] %vm1115_vm4, %v5943_v54  ;;  %v1284_v11 = vmax.f32 %v1190_v4, %v1238_v5 }
  0xf8   : > { %v844_v55 = vpop.f32.mrf.mxu0 }
  0xf9   : > { %1120 = vst.msk [vmem:[#allocation2 + $0x20] sm:$0xff] %vm1115_vm4, %v844_v55 }
  0xfa   : > { %v5944_v56 = vpop.f32.mrf.mxu0 }
  0xfb   : > { %1123 = vst.msk [vmem:[#allocation2 + $0x38] sm:$0xff] %vm1115_vm4, %v5944_v56 }
  0xfc   : > { %v847_v57 = vpop.f32.mrf.mxu0  ;;  %v1188_v58 = vld [vmem:[#allocation2] ss:$2 sm:$0xff]  ;;  %v1236_v59 = vld [vmem:[#allocation2 + $0x1] ss:$2 sm:$0xff] }
  0xfd   : > { %1121 = vst.msk [vmem:[#allocation2 + $0x28] sm:$0xff] %vm1115_vm4, %v847_v57  ;;  %v1283_v0 = vmax.f32 %v1188_v58, %v1236_v59 }
  0xfe   : > { %v5947_v60 = vpop.f32.mrf.mxu0 }
  0xff   : > { %1126 = vst.msk [vmem:[#allocation2 + $0x50] sm:$0xff] %vm1115_vm4, %v5947_v60 }
 0x100   : > { %v1308_v61 = vld [vmem:[#allocation2 + $0x18] ss:$2 sm:$0xff]  ;;  %v1356_v62 = vld [vmem:[#allocation2 + $0x19] ss:$2 sm:$0xff]  ;;  %v860_v63 = vpop.f32.mrf.mxu0 }
 0x101   : > { %v1403_v1 = vmax.f32 %v1308_v61, %v1356_v62  ;;  %1124 = vst.msk [vmem:[#allocation2 + $0x40] sm:$0xff] %vm1115_vm4, %v860_v63 }
 0x102   : > { %v5948_v6 = vpop.f32.mrf.mxu0  ;;  %v1192_v20 = vld [vmem:[#allocation2 + $0x30] ss:$2 sm:$0xff]  ;;  %v1240_v21 = vld [vmem:[#allocation2 + $0x31] ss:$2 sm:$0xff] }
 0x103   : > { %v1427_v7 = vmax.f32 %v1283_v0, %v1403_v1  ;;  %1127 = vst.msk [vmem:[#allocation2 + $0x58] sm:$0xff] %vm1115_vm4, %v5948_v6  ;;  %v1285_v32 = vmax.f32 %v1192_v20, %v1240_v21 }
 0x104   : > { %v1310_v8 = vld [vmem:[#allocation2 + $0x28] ss:$2 sm:$0xf]  ;;  %v1358_v9 = vld [vmem:[#allocation2 + $0x29] ss:$2 sm:$0xf]  ;;  %v863_v10 = vpop.f32.mrf.mxu0 }
 0x105   : > { %v1404_v12 = vmax.f32 %v1310_v8, %v1358_v9  ;;  %1125 = vst.msk [vmem:[#allocation2 + $0x48] sm:$0xff] %vm1115_vm4, %v863_v10  ;;  %v1458_v13 = vadd.f32 %v6832_v2, %v1427_v7 }
 0x106   : > { %v5951_v14 = vpop.f32.mrf.mxu0 }
 0x107   : > { %v1428_v15 = vmax.f32 %v1284_v11, %v1404_v12  ;;  %1130 = vst.msk [vmem:[#allocation2 + $0x70] sm:$0xff] %vm1115_vm4, %v5951_v14  ;;  %v1482_v16 = vmax.f32 %v1458_v13, 0.0 }
 0x108   : > { %v1194_v17 = vld [vmem:[#allocation2 + $0x40] ss:$2 sm:$0xf]  ;;  %v1242_v18 = vld [vmem:[#allocation2 + $0x41] ss:$2 sm:$0xf]  ;;  %v876_v19 = vpop.f32.mrf.mxu0 }
 0x109   : > { %1128 = vst.msk [vmem:[#allocation2 + $0x60] sm:$0xff] %vm1115_vm4, %v876_v19  ;;  %v1459_v22 = vadd.f32 %v6832_v2, %v1428_v15  ;;  %1506 = vst.msk [vmem:[#allocation3] sm:$0xff] %vm1115_vm4, %v1482_v16  ;;  %v1286_v26 = vmax.f32 %v1194_v17, %v1242_v18 }
 0x10a   : > { %v1314_v23 = vld [vmem:[#allocation2 + $0x58] ss:$2 sm:$0xf]  ;;  %v1362_v24 = vld [vmem:[#allocation2 + $0x59] ss:$2 sm:$0xf]  ;;  %v5952_v25 = vpop.f32.mrf.mxu0 }
 0x10b   : > { %v1406_v27 = vmax.f32 %v1314_v23, %v1362_v24  ;;  %1131 = vst.msk [vmem:[#allocation2 + $0x78] sm:$0xff] %vm1115_vm4, %v5952_v25  ;;  %v1483_v28 = vmax.f32 %v1459_v22, 0.0 }
 0x10c   : > { %v1312_v29 = vld [vmem:[#allocation2 + $0x48] ss:$2 sm:$0xff]  ;;  %v1360_v30 = vld [vmem:[#allocation2 + $0x49] ss:$2 sm:$0xff]  ;;  %v879_v31 = vpop.f32.mrf.mxu0 }
 0x10d   : > { %v1430_v33 = vmax.f32 %v1286_v26, %v1406_v27  ;;  %v1405_v34 = vmax.f32 %v1312_v29, %v1360_v30  ;;  %1129 = vst.msk [vmem:[#allocation2 + $0x68] sm:$0xff] %vm1115_vm4, %v879_v31 }
 0x10e   : > { %1508 = vst.msk [vmem:[#allocation3 + $0x8] sm:$0xf] %vm1507_vm5, %v1483_v28  ;;  %v5955_v35 = vpop.f32.mrf.mxu0  ;;  %v1198_v53 = vld [vmem:[#allocation2 + $0x70] ss:$2 sm:$0xf] }
 0x10f   : > { %v1429_v36 = vmax.f32 %v1285_v32, %v1405_v34  ;;  %1134 = vst.msk [vmem:[#allocation2 + $0x90] sm:$0xff] %vm1115_vm4, %v5955_v35  ;;  %v1461_v37 = vadd.f32 %v6832_v2, %v1430_v33  ;;  %v1246_v54 = vld [vmem:[#allocation2 + $0x71] ss:$2 sm:$0xf] }
 0x110   : > { %v892_v38 = vpop.f32.mrf.mxu0  ;;  %v1288_v60 = vmax.f32 %v1198_v53, %v1246_v54 }
 0x111   : > { %1132 = vst.msk [vmem:[#allocation2 + $0x80] sm:$0xff] %vm1115_vm4, %v892_v38  ;;  %v1460_v39 = vadd.f32 %v6832_v2, %v1429_v36  ;;  %v1485_v40 = vmax.f32 %v1461_v37, 0.0 }
 0x112   : > { %v5956_v41 = vpop.f32.mrf.mxu0 }
 0x113   : > { %1135 = vst.msk [vmem:[#allocation2 + $0x98] sm:$0xff] %vm1115_vm4, %v5956_v41  ;;  %v1484_v42 = vmax.f32 %v1460_v39, 0.0 }
 0x114   : > { %1510 = vst.msk [vmem:[#allocation3 + $0x18] sm:$0xf] %vm1507_vm5, %v1485_v40  ;;  %v895_v43 = vpop.f32.mrf.mxu0  ;;  %v1196_v44 = vld [vmem:[#allocation2 + $0x60] ss:$2 sm:$0xff]  ;;  %v1244_v45 = vld [vmem:[#allocation2 + $0x61] ss:$2 sm:$0xff] }
 0x115   : > { %1133 = vst.msk [vmem:[#allocation2 + $0x88] sm:$0xff] %vm1115_vm4, %v895_v43  ;;  %1509 = vst.msk [vmem:[#allocation3 + $0x10] sm:$0xff] %vm1115_vm4, %v1484_v42  ;;  %v1287_v51 = vmax.f32 %v1196_v44, %v1244_v45  ;;  %v1544_v63 = vld [vmem:[#allocation3 + $0x1] sm:$0xff] }
 0x116   : > { %v5959_v46 = vpop.f32.mrf.mxu0 }
 0x117   : > { %1138 = vst.msk [vmem:[#allocation2 + $0xb0] sm:$0xff] %vm1115_vm4, %v5959_v46 }
 0x118   : > { %v1316_v47 = vld [vmem:[#allocation2 + $0x78] ss:$2 sm:$0xff]  ;;  %v1364_v48 = vld [vmem:[#allocation2 + $0x79] ss:$2 sm:$0xff]  ;;  %v908_v50 = vpop.f32.mrf.mxu0 }
 0x119   : > { %v1407_v52 = vmax.f32 %v1316_v47, %v1364_v48  ;;  %1136 = vst.msk [vmem:[#allocation2 + $0xa0] sm:$0xff] %vm1115_vm4, %v908_v50 }
 0x11a   : > { %v5960_v55 = vpop.f32.mrf.mxu0  ;;  %v1200_v10 = vld [vmem:[#allocation2 + $0x90] ss:$2 sm:$0xff]  ;;  %v1248_v11 = vld [vmem:[#allocation2 + $0x91] ss:$2 sm:$0xff] }
 0x11b   : > { %v1431_v56 = vmax.f32 %v1287_v51, %v1407_v52  ;;  %1139 = vst.msk [vmem:[#allocation2 + $0xb8] sm:$0xff] %vm1115_vm4, %v5960_v55  ;;  %v1289_v22 = vmax.f32 %v1200_v10, %v1248_v11  ;;  %v1652_v11 = vsel %vm1570_vm3, %v6815_v49, 0 }
 0x11c   : > { %v1318_v57 = vld [vmem:[#allocation2 + $0x88] ss:$2 sm:$0xf]  ;;  %v1366_v58 = vld [vmem:[#allocation2 + $0x89] ss:$2 sm:$0xf]  ;;  %v911_v59 = vpop.f32.mrf.mxu0 }
 0x11d   : > { %v1462_v61 = vadd.f32 %v6832_v2, %v1431_v56  ;;  %v1408_v62 = vmax.f32 %v1318_v57, %v1366_v58  ;;  %1137 = vst.msk [vmem:[#allocation2 + $0xa8] sm:$0xff] %vm1115_vm4, %v911_v59  ;;  %v6864_v0 = vld [vmem:[#allocation3 + $0x11] sm:$0xff] }
 0x11e   : > { %v5963_v1 = vpop.f32.mrf.mxu0  ;;  %v1552_v4 = vpack.c.bf16 %v6864_v0, %v1544_v63  ;;  %v6879_v30 = vld [vmem:[#allocation3 + $0x10] sm:$0xff] }
 0x11f   : > { %v1486_v5 = vmax.f32 %v1462_v61, 0.0  ;;  %v1432_v6 = vmax.f32 %v1288_v60, %v1408_v62  ;;  %1142 = vst.msk [vmem:[#allocation2 + $0xd0] sm:$0xff] %vm1115_vm4, %v5963_v1  ;;  %v6887_v36 = vld [vmem:[#allocation3 + $0x12] sm:$0xff] }
 0x120   : > { %v1202_v7 = vld [vmem:[#allocation2 + $0xa0] ss:$2 sm:$0xf]  ;;  %v1250_v8 = vld [vmem:[#allocation2 + $0xa1] ss:$2 sm:$0xf]  ;;  %6011 = vmatprep.mubr.msk.bf16.mxu1 %vm1115_vm4, %v1552_v4  ;;  %v924_v9 = vpop.f32.mrf.mxu0 }
 0x121   : > { %1511 = vst.msk [vmem:[#allocation3 + $0x20] sm:$0xff] %vm1115_vm4, %v1486_v5  ;;  %v1463_v12 = vadd.f32 %v6832_v2, %v1432_v6  ;;  %1140 = vst.msk [vmem:[#allocation2 + $0xc0] sm:$0xff] %vm1115_vm4, %v924_v9  ;;  %v1290_v17 = vmax.f32 %v1202_v7, %v1250_v8  ;;  %v6891_v39 = vld [vmem:[#allocation3 + $0x13] sm:$0xff] }
 0x122   : > { %v1322_v13 = vld [vmem:[#allocation2 + $0xb8] ss:$2 sm:$0xf]  ;;  %v1370_v14 = vld [vmem:[#allocation2 + $0xb9] ss:$2 sm:$0xf]  ;;  %v5964_v15 = vpop.f32.mrf.mxu0 }
 0x123   : > { %v1487_v16 = vmax.f32 %v1463_v12, 0.0  ;;  %v1410_v18 = vmax.f32 %v1322_v13, %v1370_v14  ;;  %1143 = vst.msk [vmem:[#allocation2 + $0xd8] sm:$0xff] %vm1115_vm4, %v5964_v15  ;;  %v6893_v40 = vld [vmem:[#allocation3 + $0x14] sm:$0xff]  ;;  %v6929_v14 = vld [vmem:[%s8000_s3 + $0x8] sm:$0xf] }
 0x124   : > { %v1320_v19 = vld [vmem:[#allocation2 + $0xa8] ss:$2 sm:$0xff]  ;;  %v1368_v20 = vld [vmem:[#allocation2 + $0xa9] ss:$2 sm:$0xff]  ;;  %v927_v21 = vpop.f32.mrf.mxu0 }
 0x125   : > { %v1434_v23 = vmax.f32 %v1290_v17, %v1410_v18  ;;  %1512 = vst.msk [vmem:[#allocation3 + $0x28] sm:$0xf] %vm1507_vm5, %v1487_v16  ;;  %v1409_v24 = vmax.f32 %v1320_v19, %v1368_v20 }
 0x126   : > { %1141 = vst.msk [vmem:[#allocation2 + $0xc8] sm:$0xff] %vm1115_vm4, %v927_v21  ;;  %v5967_v25 = vpop.f32.mrf.mxu0  ;;  %v1206_v57 = vld [vmem:[#allocation2 + $0xd0] ss:$2 sm:$0xf] }
 0x127   : > { %v1465_v26 = vadd.f32 %v6832_v2, %v1434_v23  ;;  %v1433_v27 = vmax.f32 %v1289_v22, %v1409_v24  ;;  %1146 = vst.msk [vmem:[#allocation2 + $0xf0] sm:$0xff] %vm1115_vm4, %v5967_v25  ;;  %v1254_v58 = vld [vmem:[#allocation2 + $0xd1] ss:$2 sm:$0xf] }
 0x128   : > { %v940_v28 = vpop.f32.mrf.mxu0  ;;  %v6877_v29 = vld [vmem:[#allocation3 + $0x20] sm:$0xff]  ;;  %v1292_v1 = vmax.f32 %v1206_v57, %v1254_v58 }
 0x129   : > { %v1489_v31 = vmax.f32 %v1465_v26, 0.0  ;;  %v1464_v32 = vadd.f32 %v6832_v2, %v1433_v27  ;;  %1144 = vst.msk [vmem:[#allocation2 + $0xe0] sm:$0xff] %vm1115_vm4, %v940_v28 }
 0x12a   : > { %v5968_v34 = vpop.f32.mrf.mxu0 }
 0x12b   : > { %1514 = vst.msk [vmem:[#allocation3 + $0x38] sm:$0xf] %vm1507_vm5, %v1489_v31  ;;  %v1488_v35 = vmax.f32 %v1464_v32, 0.0 }
 0x12c   : > { %1147 = vst.msk [vmem:[#allocation2 + $0xf8] sm:$0xff] %vm1115_vm4, %v5968_v34  ;;  %v943_v37 = vpop.f32.mrf.mxu0  ;;  %v6889_v38 = vld [vmem:[#allocation3 + $0x21] sm:$0xff] }
 0x12d   : > { %1513 = vst.msk [vmem:[#allocation3 + $0x30] sm:$0xff] %vm1115_vm4, %v1488_v35  ;;  %1145 = vst.msk [vmem:[#allocation2 + $0xe8] sm:$0xff] %vm1115_vm4, %v943_v37  ;;  %v6897_v41 = vld [vmem:[#allocation3 + $0x22] sm:$0xff] }
 0x12e   : > { %v6899_v42 = vld [vmem:[#allocation3 + $0x23] sm:$0xff]  ;;  %v5971_v47 = vpop.f32.mrf.mxu0 }
 0x12f   : > { %v6901_v43 = vld [vmem:[#allocation3 + $0x24] sm:$0xff]  ;;  %1150 = vst.msk [vmem:[#allocation2 + $0x110] sm:$0xff] %vm1115_vm4, %v5971_v47 }
 0x130   : > { %v1204_v45 = vld [vmem:[#allocation2 + $0xc0] ss:$2 sm:$0xff]  ;;  %v1252_v46 = vld [vmem:[#allocation2 + $0xc1] ss:$2 sm:$0xff]  ;;  %v956_v54 = vpop.f32.mrf.mxu0 }
 0x131   : > { %v1324_v52 = vld [vmem:[#allocation2 + $0xd8] ss:$2 sm:$0xff]  ;;  %v1372_v53 = vld [vmem:[#allocation2 + $0xd9] ss:$2 sm:$0xff]  ;;  %v1291_v55 = vmax.f32 %v1204_v45, %v1252_v46  ;;  %1148 = vst.msk [vmem:[#allocation2 + $0x100] sm:$0xff] %vm1115_vm4, %v956_v54 }
 0x132   : > { %v1411_v56 = vmax.f32 %v1324_v52, %v1372_v53  ;;  %v5972_v59 = vpop.f32.mrf.mxu0 }
 0x133   : > { %1151 = vst.msk [vmem:[#allocation2 + $0x118] sm:$0xff] %vm1115_vm4, %v5972_v59  ;;  %v1208_v49 = vld [vmem:[#allocation2 + $0xf0] ss:$2 sm:$0xff]  ;;  %v1256_v18 = vld [vmem:[#allocation2 + $0xf1] ss:$2 sm:$0xff] }
 0x134   : > { %v1435_v60 = vmax.f32 %v1291_v55, %v1411_v56  ;;  %v1326_v61 = vld [vmem:[#allocation2 + $0xe8] ss:$2 sm:$0xf]  ;;  %v1374_v62 = vld [vmem:[#allocation2 + $0xe9] ss:$2 sm:$0xf]  ;;  %v959_v63 = vpop.f32.mrf.mxu0  ;;  %v1293_v31 = vmax.f32 %v1208_v49, %v1256_v18 }
 0x135   : > { %v1412_v5 = vmax.f32 %v1326_v61, %v1374_v62  ;;  %1149 = vst.msk [vmem:[#allocation2 + $0x108] sm:$0xff] %vm1115_vm4, %v959_v63  ;;  %v1547_v6 = vld [vmem:[#allocation3 + $0x31] sm:$0xff] }
 0x136   : > { %v1466_v4 = vadd.f32 %v6832_v2, %v1435_v60  ;;  %v6916_v7 = vld [vmem:[#allocation3 + $0x30] sm:$0xff]  ;;  %v5975_v8 = vpop.f32.mrf.mxu0  ;;  %v1553_v9 = vpack.c.bf16 %v1547_v6, %v6889_v38 }
 0x137   : > { %v6921_v10 = vpack.c.bf16 %v6916_v7, %v6877_v29  ;;  %v1436_v13 = vmax.f32 %v1292_v1, %v1412_v5  ;;  %1154 = vst.msk [vmem:[#allocation2 + $0x130] sm:$0xff] %vm1115_vm4, %v5975_v8  ;;  %v6952_v59 = vld [vmem:[#allocation3 + $0x32] sm:$0xff] }
 0x138   : > { %v1490_v12 = vmax.f32 %v1466_v4, 0.0  ;;  %v1210_v15 = vld [vmem:[#allocation2 + $0x100] ss:$2 sm:$0xf]  ;;  %6012 = vmatmul.mubr.msk.bf16.vlgmr.msra.gmra.mxu1 %vm1115_vm4, %v1553_v9  ;;  %v972_v17 = vpop.f32.mrf.mxu0  ;;  %v6958_v61 = vld [vmem:[#allocation3 + $0x34] sm:$0xff] }
 0x139   : > { %v1258_v16 = vld [vmem:[#allocation2 + $0x101] ss:$2 sm:$0xf]  ;;  %6111 = vmatprep.mubr.msk.bf16.mxu0 %vm1115_vm4, %v6921_v10  ;;  %v1467_v19 = vadd.f32 %v6832_v2, %v1436_v13  ;;  %1152 = vst.msk [vmem:[#allocation2 + $0x120] sm:$0xff] %vm1115_vm4, %v972_v17  ;;  %6020 = vmatpush3.bf16.msra.mxu1 %v1652_v11 }
 0x13a   : > { %1515 = vst.msk [vmem:[#allocation3 + $0x40] sm:$0xff] %vm1115_vm4, %v1490_v12  ;;  %v1330_v20 = vld [vmem:[#allocation2 + $0x118] ss:$2 sm:$0xf]  ;;  %v5976_v22 = vpop.f32.mrf.mxu0  ;;  %6397 = vmatprep.subr.msk.bf16.mxu1 %vm1570_vm3, %v6929_v14  ;;  %v1294_v24 = vmax.f32 %v1210_v15, %v1258_v16 }
 0x13b   : > { %v1378_v21 = vld [vmem:[#allocation2 + $0x119] ss:$2 sm:$0xf]  ;;  %v1491_v23 = vmax.f32 %v1467_v19, 0.0  ;;  %1155 = vst.msk [vmem:[#allocation2 + $0x138] sm:$0xff] %vm1115_vm4, %v5976_v22 }
 0x13c   : > { %v1414_v25 = vmax.f32 %v1330_v20, %v1378_v21  ;;  %v1328_v26 = vld [vmem:[#allocation2 + $0x108] ss:$2 sm:$0xff]  ;;  %v1376_v27 = vld [vmem:[#allocation2 + $0x109] ss:$2 sm:$0xff]  ;;  %v975_v28 = vpop.f32.mrf.mxu0 }
 0x13d   : > { %1516 = vst.msk [vmem:[#allocation3 + $0x48] sm:$0xf] %vm1507_vm5, %v1491_v23  ;;  %v1413_v34 = vmax.f32 %v1328_v26, %v1376_v27 }
 0x13e   : > { %v1438_v32 = vmax.f32 %v1294_v24, %v1414_v25  ;;  %1153 = vst.msk [vmem:[#allocation2 + $0x128] sm:$0xff] %vm1115_vm4, %v975_v28  ;;  %v5979_v35 = vpop.f32.mrf.mxu0  ;;  %v1262_v17 = vld [vmem:[#allocation2 + $0x131] ss:$2 sm:$0xf] }
 0x13f   : > { %v1437_v45 = vmax.f32 %v1293_v31, %v1413_v34  ;;  %1158 = vst.msk [vmem:[#allocation2 + $0x150] sm:$0xff] %vm1115_vm4, %v5979_v35 }
 0x140   : > { %v1469_v37 = vadd.f32 %v6832_v2, %v1438_v32  ;;  %v988_v46 = vpop.f32.mrf.mxu0  ;;  %v2768_v32 = vsel %vm1570_vm3, %v6837_v3, 0 }
 0x141   : > { %v6944_v47 = vld [vmem:[#allocation3 + $0x40] sm:$0xff]  ;;  %v1468_v53 = vadd.f32 %v6832_v2, %v1437_v45  ;;  %1156 = vst.msk [vmem:[#allocation2 + $0x140] sm:$0xff] %vm1115_vm4, %v988_v46 }
 0x142   : > { %v1493_v52 = vmax.f32 %v1469_v37, 0.0  ;;  %v5980_v55 = vpop.f32.mrf.mxu0  ;;  %v6994_v37 = vld [vmem:[%s8000_s3 + $0x38] sm:$0xf] }
 0x143   : > { %v1492_v56 = vmax.f32 %v1468_v53, 0.0  ;;  %1159 = vst.msk [vmem:[#allocation2 + $0x158] sm:$0xff] %vm1115_vm4, %v5980_v55 }
 0x144   : > { %1518 = vst.msk [vmem:[#allocation3 + $0x58] sm:$0xf] %vm1507_vm5, %v1493_v52  ;;  %v991_v57 = vpop.f32.mrf.mxu0  ;;  %v1548_v58 = vld [vmem:[#allocation3 + $0x41] sm:$0xff] }
 0x145   : > { %1517 = vst.msk [vmem:[#allocation3 + $0x50] sm:$0xff] %vm1115_vm4, %v1492_v56  ;;  %1157 = vst.msk [vmem:[#allocation2 + $0x148] sm:$0xff] %vm1115_vm4, %v991_v57  ;;  %v6956_v60 = vld [vmem:[#allocation3 + $0x42] sm:$0xff]  ;;  %v6962_v63 = vpack.c.bf16 %v1548_v58, %v1547_v6  ;;  %v1214_v6 = vld [vmem:[#allocation2 + $0x130] ss:$2 sm:$0xf] }
 0x146   : > { %v6960_v62 = vld [vmem:[#allocation3 + $0x44] sm:$0xff]  ;;  %v5983_v5 = vpop.f32.mrf.mxu0  ;;  %v6966_v8 = vpack.c.bf16 %v6956_v60, %v6952_v59  ;;  %v1296_v22 = vmax.f32 %v1214_v6, %v1262_v17 }
 0x147   : > { %v1212_v1 = vld [vmem:[#allocation2 + $0x120] ss:$2 sm:$0xff]  ;;  %v1260_v4 = vld [vmem:[#allocation2 + $0x121] ss:$2 sm:$0xff]  ;;  %v6970_v9 = vpack.c.bf16 %v6960_v62, %v6958_v61  ;;  %1162 = vst.msk [vmem:[#allocation2 + $0x170] sm:$0xff] %vm1115_vm4, %v5983_v5 }
 0x148   : > { %v1332_v11 = vld [vmem:[#allocation2 + $0x138] ss:$2 sm:$0xff]  ;;  %v1380_v12 = vld [vmem:[#allocation2 + $0x139] ss:$2 sm:$0xff]  ;;  %v1004_v13 = vpop.f32.mrf.mxu0  ;;  %v1295_v15 = vmax.f32 %v1212_v1, %v1260_v4 }
 0x149   : > { %v1415_v16 = vmax.f32 %v1332_v11, %v1380_v12  ;;  %1160 = vst.msk [vmem:[#allocation2 + $0x160] sm:$0xff] %vm1115_vm4, %v1004_v13 }
 0x14a   : > { %v5984_v49 = vpop.f32.mrf.mxu0  ;;  %v1216_v3 = vld [vmem:[#allocation2 + $0x150] ss:$2 sm:$0xff]  ;;  %v1264_v53 = vld [vmem:[#allocation2 + $0x151] ss:$2 sm:$0xff] }
 0x14b   : > { %v1439_v18 = vmax.f32 %v1295_v15, %v1415_v16  ;;  %1163 = vst.msk [vmem:[#allocation2 + $0x178] sm:$0xff] %vm1115_vm4, %v5984_v49  ;;  %v1297_v15 = vmax.f32 %v1216_v3, %v1264_v53 }
 0x14c   : > { %v1334_v19 = vld [vmem:[#allocation2 + $0x148] ss:$2 sm:$0xf]  ;;  %v1382_v20 = vld [vmem:[#allocation2 + $0x149] ss:$2 sm:$0xf]  ;;  %v1007_v21 = vpop.f32.mrf.mxu0 }
 0x14d   : > { %v1470_v23 = vadd.f32 %v6832_v2, %v1439_v18  ;;  %v1416_v24 = vmax.f32 %v1334_v19, %v1382_v20  ;;  %1161 = vst.msk [vmem:[#allocation2 + $0x168] sm:$0xff] %vm1115_vm4, %v1007_v21  ;;  %v6977_v25 = vld [vmem:[#allocation3 + $0x51] sm:$0xff] }
 0x14e   : > { %v6979_v26 = vld [vmem:[#allocation3 + $0x50] sm:$0xff]  ;;  %v5987_v27 = vpop.f32.mrf.mxu0  ;;  %v6982_v28 = vpack.c.bf16 %v6977_v25, %v1548_v58 }
 0x14f   : > { %v6986_v31 = vpack.c.bf16 %v6979_v26, %v6944_v47  ;;  %v1494_v34 = vmax.f32 %v1470_v23, 0.0  ;;  %v1440_v35 = vmax.f32 %v1296_v22, %v1416_v24  ;;  %1166 = vst.msk [vmem:[#allocation2 + $0x190] sm:$0xff] %vm1115_vm4, %v5987_v27 }
 0x150   : > { %8021 = vst [vmem:[#allocation8_spill] sm:$0xff] %v6982_v28  ;;  %v1218_v45 = vld [vmem:[#allocation2 + $0x160] ss:$2 sm:$0xf]  ;;  %6015 = vmatprep.mubr.msk.bf16.mxu1 %vm1115_vm4, %v6982_v28  ;;  %v1020_v52 = vpop.f32.mrf.mxu0 }
 0x151   : > { %v1266_v46 = vld [vmem:[#allocation2 + $0x161] ss:$2 sm:$0xf]  ;;  %6112 = vmatmul.mubr.msk.bf16.vlgmr.msra.gmra.mxu0 %vm1115_vm4, %v6986_v31  ;;  %1519 = vst.msk [vmem:[#allocation3 + $0x60] sm:$0xff] %vm1115_vm4, %v1494_v34  ;;  %v1471_v55 = vadd.f32 %v6832_v2, %v1440_v35  ;;  %1164 = vst.msk [vmem:[#allocation2 + $0x180] sm:$0xff] %vm1115_vm4, %v1020_v52  ;;  %v7024_v52 = vld [vmem:[#allocation3 + $0x54] sm:$0xff] }
 0x152   : > { %6130 = vmatpush3.bf16.msra.mxu0 %v2768_v32  ;;  %v1338_v56 = vld [vmem:[#allocation2 + $0x178] ss:$2 sm:$0xf]  ;;  %v1386_v57 = vld [vmem:[#allocation2 + $0x179] ss:$2 sm:$0xf]  ;;  %v5988_v58 = vpop.f32.mrf.mxu0  ;;  %v1298_v4 = vmax.f32 %v1218_v45, %v1266_v46 }
 0x153   : > { %6409 = vmatprep.subr.msk.bf16.mxu0 %vm1570_vm3, %v6994_v37  ;;  %v1495_v1 = vmax.f32 %v1471_v55, 0.0  ;;  %v1418_v5 = vmax.f32 %v1338_v56, %v1386_v57  ;;  %1167 = vst.msk [vmem:[#allocation2 + $0x198] sm:$0xff] %vm1115_vm4, %v5988_v58  ;;  %v7018_v45 = vld [vmem:[#allocation3 + $0x52] sm:$0xff] }
 0x154   : > { %v1336_v11 = vld [vmem:[#allocation2 + $0x168] ss:$2 sm:$0xff]  ;;  %v1384_v12 = vld [vmem:[#allocation2 + $0x169] ss:$2 sm:$0xff]  ;;  %v1023_v13 = vpop.f32.mrf.mxu0 }
 0x155   : > { %1520 = vst.msk [vmem:[#allocation3 + $0x68] sm:$0xf] %vm1507_vm5, %v1495_v1  ;;  %v1442_v16 = vmax.f32 %v1298_v4, %v1418_v5  ;;  %v1417_v6 = vmax.f32 %v1336_v11, %v1384_v12 }
 0x156   : > { %1165 = vst.msk [vmem:[#allocation2 + $0x188] sm:$0xff] %vm1115_vm4, %v1023_v13  ;;  %v5991_v17 = vpop.f32.mrf.mxu0  ;;  %v1222_v57 = vld [vmem:[#allocation2 + $0x190] ss:$2 sm:$0xf] }
 0x157   : > { %v1473_v49 = vadd.f32 %v6832_v2, %v1442_v16  ;;  %v1441_v18 = vmax.f32 %v1297_v15, %v1417_v6  ;;  %1170 = vst.msk [vmem:[#allocation2 + $0x1b0] sm:$0xff] %vm1115_vm4, %v5991_v17  ;;  %v1270_v58 = vld [vmem:[#allocation2 + $0x191] ss:$2 sm:$0xf] }
 0x158   : > { %v1036_v19 = vpop.f32.mrf.mxu0  ;;  %v7010_v20 = vld [vmem:[#allocation3 + $0x60] sm:$0xff]  ;;  %v1300_v15 = vmax.f32 %v1222_v57, %v1270_v58 }
 0x159   : > { %v1497_v21 = vmax.f32 %v1473_v49, 0.0  ;;  %v1472_v22 = vadd.f32 %v6832_v2, %v1441_v18  ;;  %1168 = vst.msk [vmem:[#allocation2 + $0x1a0] sm:$0xff] %vm1115_vm4, %v1036_v19 }
 0x15a   : > { %v5992_v24 = vpop.f32.mrf.mxu0 }
 0x15b   : > { %1522 = vst.msk [vmem:[#allocation3 + $0x78] sm:$0xf] %vm1507_vm5, %v1497_v21  ;;  %v1496_v27 = vmax.f32 %v1472_v22, 0.0 }
 0x15c   : > { %1171 = vst.msk [vmem:[#allocation2 + $0x1b8] sm:$0xff] %vm1115_vm4, %v5992_v24  ;;  %v1039_v35 = vpop.f32.mrf.mxu0  ;;  %v7022_v46 = vld [vmem:[#allocation3 + $0x62] sm:$0xff] }
 0x15d   : > { %v1220_v32 = vld [vmem:[#allocation2 + $0x180] ss:$2 sm:$0xff]  ;;  %v1268_v34 = vld [vmem:[#allocation2 + $0x181] ss:$2 sm:$0xff]  ;;  %1521 = vst.msk [vmem:[#allocation3 + $0x70] sm:$0xff] %vm1115_vm4, %v1496_v27  ;;  %1169 = vst.msk [vmem:[#allocation2 + $0x1a8] sm:$0xff] %vm1115_vm4, %v1039_v35  ;;  %v7030_v55 = vpack.c.bf16 %v7022_v46, %v7018_v45 }
 0x15e   : > { %v7026_v3 = vld [vmem:[#allocation3 + $0x64] sm:$0xff]  ;;  %v5995_v53 = vpop.f32.mrf.mxu0  ;;  %v1299_v1 = vmax.f32 %v1220_v32, %v1268_v34 }
 0x15f   : > { %v7034_v56 = vpack.c.bf16 %v7026_v3, %v7024_v52  ;;  %1174 = vst.msk [vmem:[#allocation2 + $0x1d0] sm:$0xff] %vm1115_vm4, %v5995_v53  ;;  %v7041_v21 = vld [vmem:[#allocation3 + $0x61] sm:$0xff] }
 0x160   : > { %v1340_v4 = vld [vmem:[#allocation2 + $0x198] ss:$2 sm:$0xff]  ;;  %v1388_v5 = vld [vmem:[#allocation2 + $0x199] ss:$2 sm:$0xff]  ;;  %v1052_v11 = vpop.f32.mrf.mxu0 }
 0x161   : > { %8022 = vst [vmem:[#allocation9_spill] sm:$0xff] %v7034_v56  ;;  %v1419_v12 = vmax.f32 %v1340_v4, %v1388_v5  ;;  %1172 = vst.msk [vmem:[#allocation2 + $0x1c0] sm:$0xff] %vm1115_vm4, %v1052_v11  ;;  %v1531_v34 = vld [vmem:[#allocation3] sm:$0xff] }
 0x162   : > { %v5996_v13 = vpop.f32.mrf.mxu0  ;;  %v1539_v4 = vpack.c.bf16 %v6879_v30, %v1531_v34  ;;  %v1821_v56 = vld [vmem:[#allocation3 + $0x3] sm:$0xff] }
 0x163   : > { %v1443_v16 = vmax.f32 %v1299_v1, %v1419_v12  ;;  %1175 = vst.msk [vmem:[#allocation2 + $0x1d8] sm:$0xff] %vm1115_vm4, %v5996_v13  ;;  %v1224_v57 = vld [vmem:[#allocation2 + $0x1b0] ss:$2 sm:$0xff]  ;;  %v1272_v58 = vld [vmem:[#allocation2 + $0x1b1] ss:$2 sm:$0xff] }
 0x164   : > { %v1342_v6 = vld [vmem:[#allocation2 + $0x1a8] ss:$2 sm:$0xf]  ;;  %v1390_v17 = vld [vmem:[#allocation2 + $0x1a9] ss:$2 sm:$0xf]  ;;  %v1055_v49 = vpop.f32.mrf.mxu0 }
 0x165   : > { %v1474_v18 = vadd.f32 %v6832_v2, %v1443_v16  ;;  %v1420_v19 = vmax.f32 %v1342_v6, %v1390_v17  ;;  %1173 = vst.msk [vmem:[#allocation2 + $0x1c8] sm:$0xff] %vm1115_vm4, %v1055_v49  ;;  %v7043_v22 = vld [vmem:[#allocation3 + $0x71] sm:$0xff]  ;;  %v1301_v49 = vmax.f32 %v1224_v57, %v1272_v58  ;;  %v5520_v58 = vld [vmem:[%s8000_s3 + $0xc] sm:$0xf] }
 0x166   : > { %v7045_v24 = vld [vmem:[#allocation3 + $0x70] sm:$0xff]  ;;  %v7049_v27 = vpack.c.bf16 %v7043_v22, %v7041_v21  ;;  %v5999_v35 = vpop.f32.mrf.mxu0 }
 0x167   : > { %v7053_v32 = vpack.c.bf16 %v7045_v24, %v7010_v20  ;;  %v1498_v53 = vmax.f32 %v1474_v18, 0.0  ;;  %v1444_v1 = vmax.f32 %v1300_v15, %v1420_v19  ;;  %1178 = vst.msk [vmem:[#allocation2 + $0x1f0] sm:$0xff] %vm1115_vm4, %v5999_v35 }
 0x168   : > { %8023 = vst [vmem:[#allocation10_spill] sm:$0xff] %v7049_v27  ;;  %v1226_v5 = vld [vmem:[#allocation2 + $0x1c0] ss:$2 sm:$0xf]  ;;  %6016 = vmatmul.mubr.msk.bf16.gmra.mxu1 %vm1115_vm4, %v7049_v27  ;;  %v1068_v12 = vpop.f32.mrf.mxu0 }
 0x169   : > { %v1274_v11 = vld [vmem:[#allocation2 + $0x1c1] ss:$2 sm:$0xf]  ;;  %6115 = vmatprep.mubr.msk.bf16.mxu0 %vm1115_vm4, %v7053_v32  ;;  %1523 = vst.msk [vmem:[#allocation3 + $0x80] sm:$0xff] %vm1115_vm4, %v1498_v53  ;;  %v1475_v13 = vadd.f32 %v6832_v2, %v1444_v1  ;;  %6021 = vmatprep.mubr.msk.bf16.mxu1 %vm1115_vm4, %v1539_v4  ;;  %1176 = vst.msk [vmem:[#allocation2 + $0x1e0] sm:$0xff] %vm1115_vm4, %v1068_v12  ;;  %v1746_v4 = vsel %vm1570_vm3, %v6929_v14, 0 }
 0x16a   : > { %v1302_v16 = vmax.f32 %v1226_v5, %v1274_v11  ;;  %v1346_v15 = vld [vmem:[#allocation2 + $0x1d8] ss:$2 sm:$0xf]  ;;  %v1394_v6 = vld [vmem:[#allocation2 + $0x1d9] ss:$2 sm:$0xf]  ;;  %v6000_v17 = vpop.f32.mrf.mxu0 }
 0x16b   : > { %v1499_v18 = vmax.f32 %v1475_v13, 0.0  ;;  %v1422_v19 = vmax.f32 %v1346_v15, %v1394_v6  ;;  %1179 = vst.msk [vmem:[#allocation2 + $0x1f8] sm:$0xff] %vm1115_vm4, %v6000_v17  ;;  %v7083_v15 = vld [vmem:[#allocation3 + $0x72] sm:$0xff] }
 0x16c   : > { %v1344_v34 = vld [vmem:[#allocation2 + $0x1c8] ss:$2 sm:$0xff]  ;;  %v1392_v35 = vld [vmem:[#allocation2 + $0x1c9] ss:$2 sm:$0xff]  ;;  %v1071_v51 = vpop.f32.mrf.mxu0 }
 0x16d   : > { %1524 = vst.msk [vmem:[#allocation3 + $0x88] sm:$0xf] %vm1507_vm5, %v1499_v18  ;;  %v1446_v53 = vmax.f32 %v1302_v16, %v1422_v19  ;;  %v1421_v1 = vmax.f32 %v1344_v34, %v1392_v35  ;;  %v7090_v18 = vld [vmem:[#allocation3 + $0x74] sm:$0xff]  ;;  %v1719_v35 = vld [vmem:[#allocation3 + $0x2] sm:$0xff] }
 0x16e   : > { %1177 = vst.msk [vmem:[#allocation2 + $0x1e8] sm:$0xff] %vm1115_vm4, %v1071_v51  ;;  %v6003_v5 = vpop.f32.mrf.mxu0 }
 0x16f   : > { %v1477_v11 = vadd.f32 %v6832_v2, %v1446_v53  ;;  %v1445_v57 = vmax.f32 %v1301_v49, %v1421_v1  ;;  %1182 = vst.msk [vmem:[#allocation2 + $0x210] sm:$0xff] %vm1115_vm4, %v6003_v5 }
 0x170   : > { %6022 = vmatmul.mubr.msk.bf16.vlgmr.msra.gmra.mxu1 %vm1115_vm4, %v6921_v10  ;;  %v1084_v12 = vpop.f32.mrf.mxu0 }
 0x171   : > { %v1501_v13 = vmax.f32 %v1477_v11, 0.0  ;;  %v1476_v51 = vadd.f32 %v6832_v2, %v1445_v57  ;;  %6030 = vmatpush3.bf16.msra.mxu1 %v1746_v4  ;;  %6025 = vmatprep.mubr.msk.bf16.mxu1 %vm1115_vm4, %v6986_v31  ;;  %1180 = vst.msk [vmem:[#allocation2 + $0x200] sm:$0xff] %vm1115_vm4, %v1084_v12  ;;  %v1727_v4 = vpack.c.bf16 %v6887_v36, %v1719_v35 }
 0x172   : > { %6398 = vmatprep.subr.msk.bf16.mxu1 %vm1570_vm3, %v5520_v58  ;;  %v6004_v14 = vpop.f32.mrf.mxu0 }
 0x173   : > { %1526 = vst.msk [vmem:[#allocation3 + $0x98] sm:$0xf] %vm1507_vm5, %v1501_v13  ;;  %v1500_v16 = vmax.f32 %v1476_v51, 0.0  ;;  %v1230_v13 = vld [vmem:[#allocation2 + $0x1f0] ss:$2 sm:$0xf] }
 0x174   : > { %1183 = vst.msk [vmem:[#allocation2 + $0x218] sm:$0xff] %vm1115_vm4, %v6004_v14  ;;  %v7086_v17 = vld [vmem:[#allocation3 + $0x82] sm:$0xff]  ;;  %v1087_v49 = vpop.f32.mrf.mxu0  ;;  %v1278_v51 = vld [vmem:[#allocation2 + $0x1f1] ss:$2 sm:$0xf] }
 0x175   : > { %v1228_v10 = vld [vmem:[#allocation2 + $0x1e0] ss:$2 sm:$0xff]  ;;  %v1276_v6 = vld [vmem:[#allocation2 + $0x1e1] ss:$2 sm:$0xff]  ;;  %1525 = vst.msk [vmem:[#allocation3 + $0x90] sm:$0xff] %vm1115_vm4, %v1500_v16  ;;  %1181 = vst.msk [vmem:[#allocation2 + $0x208] sm:$0xff] %vm1115_vm4, %v1087_v49  ;;  %v7096_v34 = vpack.c.bf16 %v7086_v17, %v7083_v15  ;;  %v1304_v35 = vmax.f32 %v1230_v13, %v1278_v51 }
 0x176   : > { %v7092_v19 = vld [vmem:[#allocation3 + $0x84] sm:$0xff]  ;;  %v6007_v53 = vpop.f32.mrf.mxu0  ;;  %v1303_v5 = vmax.f32 %v1228_v10, %v1276_v6  ;;  %v1848_v13 = vsel %vm1570_vm3, %v5520_v58, 0  ;;  %v5525_v51 = vld [vmem:[%s8000_s3 + $0x10] sm:$0xf] }
 0x177   : > { %v7100_v1 = vpack.c.bf16 %v7092_v19, %v7090_v18  ;;  %1186 = vst.msk [vmem:[#allocation2 + $0x230] sm:$0xff] %vm1115_vm4, %v6007_v53  ;;  %v7109_v10 = vld [vmem:[#allocation3 + $0x80] sm:$0xff] }
 0x178   : > { %6026 = vmatmul.mubr.msk.bf16.gmra.mxu1 %vm1115_vm4, %v7053_v32  ;;  %v1348_v11 = vld [vmem:[#allocation2 + $0x1f8] ss:$2 sm:$0xff]  ;;  %v1396_v57 = vld [vmem:[#allocation2 + $0x1f9] ss:$2 sm:$0xff]  ;;  %v1100_v12 = vpop.f32.mrf.mxu0 }
 0x179   : > { %8024 = vst [vmem:[#allocation11_spill] sm:$0xff] %v7100_v1  ;;  %6031 = vmatprep.mubr.msk.bf16.mxu1 %vm1115_vm4, %v1727_v4  ;;  %v1423_v14 = vmax.f32 %v1348_v11, %v1396_v57  ;;  %1184 = vst.msk [vmem:[#allocation2 + $0x220] sm:$0xff] %vm1115_vm4, %v1100_v12  ;;  %v7118_v57 = vld [vmem:[#allocation3 + $0x81] sm:$0xff] }
 0x17a   : > { %v6008_v16 = vpop.f32.mrf.mxu0 }
 0x17b   : > { %v1447_v49 = vmax.f32 %v1303_v5, %v1423_v14  ;;  %1187 = vst.msk [vmem:[#allocation2 + $0x238] sm:$0xff] %vm1115_vm4, %v6008_v16  ;;  %v1728_v5 = vpack.c.bf16 %v6952_v59, %v6897_v41  ;;  %v7129_v16 = vld [vmem:[#allocation3 + $0x83] sm:$0xff]  ;;  %v1232_v58 = vld [vmem:[#allocation2 + $0x210] ss:$2 sm:$0xff]  ;;  %v1280_v23 = vld [vmem:[#allocation2 + $0x211] ss:$2 sm:$0xff] }
 0x17c   : > { %v7111_v6 = vld [vmem:[#allocation3 + $0x90] sm:$0xff]  ;;  %v1350_v53 = vld [vmem:[#allocation2 + $0x208] ss:$2 sm:$0xf]  ;;  %v1103_v50 = vpop.f32.mrf.mxu0 }
 0x17d   : > { %v7115_v48 = vpack.c.bf16 %v7111_v6, %v7109_v10  ;;  %v1478_v4 = vadd.f32 %v6832_v2, %v1447_v49  ;;  %v1398_v11 = vld [vmem:[#allocation2 + $0x209] ss:$2 sm:$0xf]  ;;  %v7120_v12 = vld [vmem:[#allocation3 + $0x91] sm:$0xff]  ;;  %1185 = vst.msk [vmem:[#allocation2 + $0x228] sm:$0xff] %vm1115_vm4, %v1103_v50  ;;  %v7141_v50 = vpack.c.bf16 %v7018_v45, %v6956_v60 }
 0x17e   : > { %v1424_v14 = vmax.f32 %v1350_v53, %v1398_v11  ;;  %v7131_v49 = vld [vmem:[#allocation3 + $0x93] sm:$0xff]  ;;  %v7135_v44 = vpack.c.bf16 %v7120_v12, %v7118_v57 }
 0x17f   : > { %6116 = vmatmul.mubr.msk.bf16.gmra.mxu0 %vm1115_vm4, %v7115_v48  ;;  %v1502_v59 = vmax.f32 %v1478_v4, 0.0  ;;  %v7145_v53 = vpack.c.bf16 %v7131_v49, %v7129_v16 }
 0x180   : > { %8025 = vst [vmem:[#allocation12_spill] sm:$0xff] %v7135_v44  ;;  %6032 = vmatmul.mubr.msk.bf16.vlgmr.msra.gmra.mxu1 %vm1115_vm4, %v1728_v5  ;;  %6131 = vmatprep.mubr.msk.bf16.mxu0 %vm1115_vm4, %v1728_v5  ;;  %v1448_v11 = vmax.f32 %v1304_v35, %v1424_v14  ;;  %v1234_v54 = vld [vmem:[#allocation2 + $0x220] ss:$2 sm:$0xf]  ;;  %v1305_v44 = vmax.f32 %v1232_v58, %v1280_v23 }
 0x181   : > { %8026 = vst [vmem:[#allocation13_spill] sm:$0xff] %v7145_v53  ;;  %v1282_v33 = vld [vmem:[#allocation2 + $0x221] ss:$2 sm:$0xf]  ;;  %6040 = vmatpush3.bf16.msra.mxu1 %v1848_v13  ;;  %6035 = vmatprep.mubr.msk.bf16.mxu1 %vm1115_vm4, %v7141_v50  ;;  %1527 = vst.msk [vmem:[#allocation3 + $0xa0] sm:$0xff] %vm1115_vm4, %v1502_v59  ;;  %v7156_v13 = vpack.c.bf16 %v7083_v15, %v7022_v46 }
 0x182   : > { %v1306_v60 = vmax.f32 %v1234_v54, %v1282_v33  ;;  %6399 = vmatprep.subr.msk.bf16.mxu1 %vm1570_vm3, %v5525_v51  ;;  %v1479_v45 = vadd.f32 %v6832_v2, %v1448_v11  ;;  %v1354_v4 = vld [vmem:[#allocation2 + $0x238] ss:$2 sm:$0xf]  ;;  %v1402_v53 = vld [vmem:[#allocation2 + $0x239] ss:$2 sm:$0xf]  ;;  %v1829_v54 = vpack.c.bf16 %v6891_v39, %v1821_v56 }
 0x183   : > { %v1426_v27 = vmax.f32 %v1354_v4, %v1402_v53  ;;  %v2972_v33 = vsel %vm1570_vm3, %v6994_v37, 0  ;;  %v5585_v23 = vld [vmem:[%s8000_s3 + $0x40] sm:$0xf]  ;;  %v7186_v53 = vld [vmem:[#allocation3 + $0x53] sm:$0xff]  ;;  %v2953_v4 = vpack.c.bf16 %v6958_v61, %v6901_v43  ;;  %v5595_v61 = vld [vmem:[%s8000_s3 + $0x48] sm:$0xf] }
 0x184   : > { %v1503_v28 = vmax.f32 %v1479_v45, 0.0  ;;  %v1352_v5 = vld [vmem:[#allocation2 + $0x228] ss:$2 sm:$0xff]  ;;  %v1400_v35 = vld [vmem:[#allocation2 + $0x229] ss:$2 sm:$0xff] }
 0x185   : > { %v1450_v14 = vmax.f32 %v1306_v60, %v1426_v27  ;;  %v1425_v1 = vmax.f32 %v1352_v5, %v1400_v35  ;;  %v1950_v60 = vsel %vm1570_vm3, %v5525_v51, 0  ;;  %v1825_v45 = vld [vmem:[#allocation3 + $0x43] sm:$0xff]  ;;  %v5530_v51 = vld [vmem:[%s8000_s3 + $0x14] sm:$0xf] }
 0x186   : > { %1528 = vst.msk [vmem:[#allocation3 + $0xa8] sm:$0xf] %vm1507_vm5, %v1503_v28  ;;  %v7172_v28 = vld [vmem:[#allocation3 + $0x92] sm:$0xff] }
 0x187   : > { %6132 = vmatmul.mubr.msk.bf16.vlgmr.msra.gmra.mxu0 %vm1115_vm4, %v7141_v50  ;;  %v1481_v27 = vadd.f32 %v6832_v2, %v1450_v14  ;;  %v1449_v59 = vmax.f32 %v1305_v44, %v1425_v1  ;;  %v1824_v44 = vld [vmem:[#allocation3 + $0x33] sm:$0xff]  ;;  %v7183_v1 = vpack.c.bf16 %v7172_v28, %v7086_v17  ;;  %v7206_v14 = vpack.c.bf16 %v7186_v53, %v1825_v45 }
 0x188   : > { %6036 = vmatmul.mubr.msk.bf16.gmra.mxu1 %vm1115_vm4, %v7156_v13  ;;  %6135 = vmatprep.mubr.msk.bf16.mxu0 %vm1115_vm4, %v7156_v13  ;;  %v7174_v37 = vld [vmem:[#allocation3 + $0xa0] sm:$0xff]  ;;  %v7197_v17 = vld [vmem:[#allocation3 + $0x94] sm:$0xff] }
 0x189   : > { %6041 = vmatprep.mubr.msk.bf16.mxu1 %vm1115_vm4, %v1829_v54  ;;  %6150 = vmatpush3.bf16.msra.mxu0 %v2972_v33  ;;  %v1505_v46 = vmax.f32 %v1481_v27, 0.0  ;;  %v1480_v56 = vadd.f32 %v6832_v2, %v1449_v59  ;;  %v3059_v15 = vpack.c.bf16 %v7174_v37, %v7111_v6  ;;  %v7192_v2 = vpack.c.bf16 %v1824_v44, %v6899_v42  ;;  %v1828_v33 = vld [vmem:[#allocation3 + $0x73] sm:$0xff]  ;;  %v1827_v54 = vld [vmem:[#allocation3 + $0x63] sm:$0xff] }
 0x18a   : > { %6411 = vmatprep.subr.msk.bf16.mxu0 %vm1570_vm3, %v5585_v23  ;;  %v7221_v27 = vpack.c.bf16 %v7024_v52, %v6960_v62  ;;  %v7223_v59 = vpack.c.bf16 %v1828_v33, %v1827_v54  ;;  %v7244_v62 = vpack.c.bf16 %v7197_v17, %v7092_v19  ;;  %v2053_v52 = vsel %vm1570_vm3, %v5530_v51, 0 }
 0x18b   : > { %1530 = vst.msk [vmem:[#allocation3 + $0xb8] sm:$0xf] %vm1507_vm5, %v1505_v46  ;;  %v1504_v58 = vmax.f32 %v1480_v56, 0.0  ;;  %v1923_v46 = vld [vmem:[#allocation3 + $0x4] sm:$0xff]  ;;  %v7227_v56 = vpack.c.bf16 %v7090_v18, %v7026_v3  ;;  %v5535_v3 = vld [vmem:[%s8000_s3 + $0x18] sm:$0xf]  ;;  %v3159_v18 = vpack.c.bf16 %v7041_v21, %v6977_v25  ;;  %v3160_v19 = vpack.c.bf16 %v7118_v57, %v7043_v22 }
 0x18c   : > { %v8027_v25 = vpack.c.bf16 %v6877_v29, %v6879_v30  ;;  %v2155_v22 = vsel %vm1570_vm3, %v5535_v3, 0  ;;  %v3362_v57 = vpack.c.bf16 %v1825_v45, %v1824_v44  ;;  %v8028_v29 = vpack.c.bf16 %v6944_v47, %v6916_v7 }
 0x18d   : > { %1529 = vst.msk [vmem:[#allocation3 + $0xb0] sm:$0xff] %vm1115_vm4, %v1504_v58  ;;  %v7189_v11 = vld [vmem:[#allocation3 + $0xa2] sm:$0xff]  ;;  %v3177_v58 = vsel %vm1570_vm3, %v5585_v23, 0  ;;  %v3381_v23 = vsel %vm1570_vm3, %v5595_v61, 0  ;;  %v8029_v30 = vpack.c.bf16 %v7010_v20, %v6979_v26  ;;  %v7297_v44 = vpack.c.bf16 %v7109_v10, %v7045_v24  ;;  %v5615_v26 = vld [vmem:[%s8000_s3 + $0x58] sm:$0xf] }
 0x18e   : > { %v7199_v5 = vld [vmem:[#allocation3 + $0xa4] sm:$0xff]  ;;  %v3263_v35 = vpack.c.bf16 %v7189_v11, %v7172_v28  ;;  %v3364_v7 = vpack.c.bf16 %v7129_v16, %v1828_v33  ;;  %v5545_v33 = vld [vmem:[%s8000_s3 + $0x20] sm:$0xf]  ;;  %v5620_v28 = vld [vmem:[%s8000_s3 + $0x5c] sm:$0xf] }
 0x18f   : > { %6136 = vmatmul.mubr.msk.bf16.gmra.mxu0 %vm1115_vm4, %v7183_v1  ;;  %v7312_v24 = vld [vmem:[#allocation3 + $0xa3] sm:$0xff] }
 0x190   : > { %6042 = vmatmul.mubr.msk.bf16.vlgmr.msra.gmra.mxu1 %vm1115_vm4, %v7192_v2  ;;  %6151 = vmatprep.mubr.msk.bf16.mxu0 %vm1115_vm4, %v2953_v4  ;;  %v3365_v10 = vpack.c.bf16 %v7312_v24, %v7131_v49  ;;  %v2359_v49 = vsel %vm1570_vm3, %v5545_v33, 0 }
 0x191   : > { %6050 = vmatpush3.bf16.msra.mxu1 %v1950_v60  ;;  %6045 = vmatprep.mubr.msk.bf16.mxu1 %vm1115_vm4, %v7206_v14  ;;  %v1931_v60 = vpack.c.bf16 %v6893_v40, %v1923_v46 }
 0x192   : > { %6400 = vmatprep.subr.msk.bf16.mxu1 %vm1570_vm3, %v5530_v51  ;;  %v7270_v51 = vld [vmem:[#allocation3 + $0xa1] sm:$0xff] }
 0x193   : > { %v3161_v21 = vpack.c.bf16 %v7270_v51, %v7120_v12  ;;  %v3363_v12 = vpack.c.bf16 %v1827_v54, %v7186_v53  ;;  %v8030_v53 = vpack.c.bf16 %v6889_v38, %v6864_v0  ;;  %v3790_v0 = vsel %vm1570_vm3, %v5615_v26, 0  ;;  %v5625_v38 = vld [vmem:[%s8000_s3 + $0x60] sm:$0xf]  ;;  %v5550_v54 = vld [vmem:[%s8000_s3 + $0x24] sm:$0xf] }
 0x194   : > { %v2461_v46 = vsel %vm1570_vm3, %v5550_v54, 0 }
 0x197   : > { %6152 = vmatmul.mubr.msk.bf16.vlgmr.msra.gmra.mxu0 %vm1115_vm4, %v7221_v27 }
 0x198   : > { %6046 = vmatmul.mubr.msk.bf16.gmra.mxu1 %vm1115_vm4, %v7223_v59  ;;  %6155 = vmatprep.mubr.msk.bf16.mxu0 %vm1115_vm4, %v7227_v56 }
 0x199   : > { %6051 = vmatprep.mubr.msk.bf16.mxu1 %vm1115_vm4, %v1931_v60  ;;  %6170 = vmatpush3.bf16.msra.mxu0 %v3177_v58  ;;  %v5570_v58 = vld [vmem:[%s8000_s3 + $0x34] sm:$0xf] }
 0x19a   : > { %6413 = vmatprep.subr.msk.bf16.mxu0 %vm1570_vm3, %v5595_v61  ;;  %v5540_v61 = vld [vmem:[%s8000_s3 + $0x1c] sm:$0xf] }
 0x19b   : > { %v2257_v16 = vsel %vm1570_vm3, %v5540_v61, 0 }
 0x19f   : > { %6156 = vmatmul.mubr.msk.bf16.gmra.mxu0 %vm1115_vm4, %v7244_v62 }
 0x1a0   : > { %6052 = vmatmul.mubr.msk.bf16.vlgmr.msra.gmra.mxu1 %vm1115_vm4, %v2953_v4  ;;  %6171 = vmatprep.mubr.msk.bf16.mxu0 %vm1115_vm4, %v6962_v63  ;;  %v5605_v4 = vld [vmem:[%s8000_s3 + $0x50] sm:$0xf] }
 0x1a1   : > { %6060 = vmatpush3.bf16.msra.mxu1 %v2053_v52  ;;  %6055 = vmatprep.mubr.msk.bf16.mxu1 %vm1115_vm4, %v7221_v27  ;;  %v3586_v45 = vsel %vm1570_vm3, %v5605_v4, 0  ;;  %v2870_v52 = vsel %vm1570_vm3, %v5570_v58, 0 }
 0x1a2   : > { %6401 = vmatprep.subr.msk.bf16.mxu1 %vm1570_vm3, %v5535_v3  ;;  %v5580_v3 = vld [vmem:[%s8000_s3 + $0x3c] sm:$0xf] }
 0x1a7   : > { %6172 = vmatmul.mubr.msk.bf16.vlgmr.msra.gmra.mxu0 %vm1115_vm4, %v3159_v18 }
 0x1a8   : > { %6056 = vmatmul.mubr.msk.bf16.gmra.mxu1 %vm1115_vm4, %v7227_v56  ;;  %6175 = vmatprep.mubr.msk.bf16.mxu0 %vm1115_vm4, %v3160_v19 }
 0x1a9   : > { %6061 = vmatprep.mubr.msk.bf16.mxu1 %vm1115_vm4, %v8027_v25  ;;  %6190 = vmatpush3.bf16.msra.mxu0 %v3381_v23  ;;  %v8038_v23 = vld [vmem:[#allocation12_spill] sm:$0xff] }
 0x1aa   : > { %6415 = vmatprep.subr.msk.bf16.mxu0 %vm1570_vm3, %v5605_v4  ;;  %v3075_v4 = vsel %vm1570_vm3, %v5580_v3, 0  ;;  %v5590_v25 = vld [vmem:[%s8000_s3 + $0x44] sm:$0xf] }
 0x1af   : > { %6176 = vmatmul.mubr.msk.bf16.gmra.mxu0 %vm1115_vm4, %v3161_v21  ;;  %v3048_v21 = vld [vmem:[#allocation3 + $0x30] sm:$0xff] }
 0x1b0   : > { %6062 = vmatmul.mubr.msk.bf16.vlgmr.msra.gmra.mxu1 %vm1115_vm4, %v8028_v29  ;;  %6191 = vmatprep.mubr.msk.bf16.mxu0 %vm1115_vm4, %v3362_v57 }
 0x1b1   : > { %6070 = vmatpush3.bf16.msra.mxu1 %v2155_v22  ;;  %6065 = vmatprep.mubr.msk.bf16.mxu1 %vm1115_vm4, %v8029_v30  ;;  %v3056_v22 = vpack.c.bf16 %v6944_v47, %v3048_v21  ;;  %v3664_v21 = vld [vmem:[#allocation3 + $0x71] sm:$0xff] }
 0x1b2   : > { %6402 = vmatprep.subr.msk.bf16.mxu1 %vm1570_vm3, %v5540_v61  ;;  %v3050_v61 = vld [vmem:[#allocation3 + $0x50] sm:$0xff] }
 0x1b3   : > { %v3057_v30 = vpack.c.bf16 %v7010_v20, %v3050_v61  ;;  %v3663_v61 = vld [vmem:[#allocation3 + $0x61] sm:$0xff] }
 0x1b7   : > { %6192 = vmatmul.mubr.msk.bf16.vlgmr.msra.gmra.mxu0 %vm1115_vm4, %v3363_v12 }
 0x1b8   : > { %6066 = vmatmul.mubr.msk.bf16.gmra.mxu1 %vm1115_vm4, %v7297_v44  ;;  %6195 = vmatprep.mubr.msk.bf16.mxu0 %vm1115_vm4, %v3364_v7 }
 0x1b9   : > { %6071 = vmatprep.mubr.msk.bf16.mxu1 %vm1115_vm4, %v8030_v53  ;;  %6210 = vmatpush3.bf16.msra.mxu0 %v3586_v45 }
 0x1ba   : > { %6417 = vmatprep.subr.msk.bf16.mxu0 %vm1570_vm3, %v5615_v26 }
 0x1bf   : > { %6196 = vmatmul.mubr.msk.bf16.gmra.mxu0 %vm1115_vm4, %v3365_v10 }
 0x1c0   : > { %6072 = vmatmul.mubr.msk.bf16.vlgmr.msra.gmra.mxu1 %vm1115_vm4, %v6962_v63  ;;  %6211 = vmatprep.mubr.msk.bf16.mxu0 %vm1115_vm4, %v6986_v31  ;;  %v3566_v63 = vld [vmem:[#allocation3 + $0xb0] sm:$0xff]  ;;  %v8031_v31 = vpack.c.bf16 %v6897_v41, %v6887_v36  ;;  %v3994_v36 = vsel %vm1570_vm3, %v5625_v38, 0 }
 0x1c1   : > { %6080 = vmatpush3.bf16.msra.mxu1 %v2257_v16  ;;  %6075 = vmatprep.mubr.msk.bf16.mxu1 %vm1115_vm4, %v3159_v18  ;;  %v3770_v41 = vld [vmem:[#allocation3 + $0xb2] sm:$0xff]  ;;  %v8036_v18 = vld [vmem:[#allocation8_spill] sm:$0xff] }
 0x1c2   : > { %6403 = vmatprep.subr.msk.bf16.mxu1 %vm1570_vm3, %v5545_v33 }
 0x1c7   : > { %6212 = vmatmul.mubr.msk.bf16.vlgmr.msra.gmra.mxu0 %vm1115_vm4, %v7053_v32  ;;  %v3570_v32 = vpack.c.bf16 %v3566_v63, %v7174_v37 }
 0x1c8   : > { %6076 = vmatmul.mubr.msk.bf16.gmra.mxu1 %vm1115_vm4, %v3160_v19  ;;  %6215 = vmatprep.mubr.msk.bf16.mxu0 %vm1115_vm4, %v7115_v48  ;;  %v8032_v48 = vpack.c.bf16 %v6899_v42, %v6891_v39  ;;  %v3974_v39 = vld [vmem:[#allocation3 + $0xb4] sm:$0xff]  ;;  %v8033_v42 = vpack.c.bf16 %v6901_v43, %v6893_v40  ;;  %v2639_v43 = vld [vmem:[#allocation3 + $0x21] sm:$0xff] }
 0x1c9   : > { %6081 = vmatprep.mubr.msk.bf16.mxu1 %vm1115_vm4, %v8031_v31  ;;  %6230 = vmatpush3.bf16.msra.mxu0 %v3790_v0  ;;  %v2640_v40 = vld [vmem:[#allocation3 + $0x31] sm:$0xff] }
 0x1ca   : > { %6419 = vmatprep.subr.msk.bf16.mxu0 %vm1570_vm3, %v5625_v38  ;;  %v2647_v60 = vpack.c.bf16 %v2640_v40, %v2639_v43  ;;  %v8037_v19 = vld [vmem:[#allocation10_spill] sm:$0xff] }
 0x1cf   : > { %6216 = vmatmul.mubr.msk.bf16.gmra.mxu0 %vm1115_vm4, %v3570_v32 }
 0x1d0   : > { %6082 = vmatmul.mubr.msk.bf16.vlgmr.msra.gmra.mxu1 %vm1115_vm4, %v6966_v8  ;;  %6231 = vmatprep.mubr.msk.bf16.mxu0 %vm1115_vm4, %v7141_v50  ;;  %v3774_v50 = vpack.c.bf16 %v3770_v41, %v7189_v11 }
 0x1d1   : > { %6090 = vmatpush3.bf16.msra.mxu1 %v2359_v49  ;;  %6085 = vmatprep.mubr.msk.bf16.mxu1 %vm1115_vm4, %v7030_v55 }
 0x1d2   : > { %6404 = vmatprep.subr.msk.bf16.mxu1 %vm1570_vm3, %v5550_v54 }
 0x1d7   : > { %6232 = vmatmul.mubr.msk.bf16.vlgmr.msra.gmra.mxu0 %vm1115_vm4, %v7156_v13  ;;  %v5560_v13 = vld [vmem:[%s8000_s3 + $0x2c] sm:$0xf] }
 0x1d8   : > { %6086 = vmatmul.mubr.msk.bf16.gmra.mxu1 %vm1115_vm4, %v7096_v34  ;;  %6235 = vmatprep.mubr.msk.bf16.mxu0 %vm1115_vm4, %v7183_v1  ;;  %v3978_v1 = vpack.c.bf16 %v3974_v39, %v7199_v5 }
 0x1d9   : > { %6091 = vmatprep.mubr.msk.bf16.mxu1 %vm1115_vm4, %v8032_v48  ;;  %6250 = vmatpush3.bf16.msra.mxu0 %v3994_v36 }
 0x1df   : > { %6236 = vmatmul.mubr.msk.bf16.gmra.mxu0 %vm1115_vm4, %v3774_v50 }
 0x1e0   : > { %6092 = vmatmul.mubr.msk.bf16.vlgmr.msra.gmra.mxu1 %vm1115_vm4, %v3362_v57  ;;  %6251 = vmatprep.mubr.msk.bf16.mxu0 %vm1115_vm4, %v7221_v27  ;;  %v2666_v27 = vsel %vm1570_vm3, %v5560_v13, 0  ;;  %v8039_v57 = vld [vmem:[#allocation13_spill] sm:$0xff] }
 0x1e1   : > { %6100 = vmatpush3.bf16.msra.mxu1 %v2461_v46  ;;  %6095 = vmatprep.mubr.msk.bf16.mxu1 %vm1115_vm4, %v3363_v12  ;;  %v3279_v12 = vsel %vm1570_vm3, %v5590_v25, 0 }
 0x1e2   : > { %6406 = vmatprep.subr.msk.bf16.mxu1 %vm1570_vm3, %v5560_v13 }
 0x1e7   : > { %6252 = vmatmul.mubr.msk.bf16.vlgmr.msra.gmra.mxu0 %vm1115_vm4, %v7227_v56  ;;  %v8034_v56 = vld [vmem:[#allocation9_spill] sm:$0xff] }
 0x1e8   : > { %6096 = vmatmul.mubr.msk.bf16.gmra.mxu1 %vm1115_vm4, %v3364_v7  ;;  %6255 = vmatprep.mubr.msk.bf16.mxu0 %vm1115_vm4, %v7244_v62  ;;  %v8035_v62 = vld [vmem:[#allocation11_spill] sm:$0xff]  ;;  %v5600_v7 = vld [vmem:[%s8000_s3 + $0x4c] sm:$0xf] }
 0x1e9   : > { %6101 = vmatprep.mubr.msk.bf16.mxu1 %vm1115_vm4, %v8033_v42  ;;  %v3483_v16 = vsel %vm1570_vm3, %v5600_v7, 0 }
 0x1ef   : > { %6256 = vmatmul.mubr.msk.bf16.gmra.mxu0 %vm1115_vm4, %v3978_v1 }
 0x1f0   : > { %6102 = vmatmul.mubr.msk.bf16.vlgmr.msra.gmra.mxu1 %vm1115_vm4, %v6970_v9 }
 0x1f1   : > { %6120 = vmatpush3.bf16.msra.mxu1 %v2666_v27  ;;  %6105 = vmatprep.mubr.msk.bf16.mxu1 %vm1115_vm4, %v8034_v56  ;;  %v3662_v27 = vld [vmem:[#allocation3 + $0x51] sm:$0xff] }
 0x1f2   : > { %6408 = vmatprep.subr.msk.bf16.mxu1 %vm1570_vm3, %v5570_v58 }
 0x1f8   : > { %6106 = vmatmul.mubr.msk.bf16.gmra.mxu1 %vm1115_vm4, %v8035_v62 }
 0x1f9   : > { %6121 = vmatprep.mubr.msk.bf16.mxu1 %vm1115_vm4, %v2647_v60  ;;  %v3661_v60 = vld [vmem:[#allocation3 + $0x41] sm:$0xff] }
 0x200   : > { %6122 = vmatmul.mubr.msk.bf16.vlgmr.msra.gmra.mxu1 %vm1115_vm4, %v8036_v18 }
 0x201   : > { %6140 = vmatpush3.bf16.msra.mxu1 %v2870_v52  ;;  %6125 = vmatprep.mubr.msk.bf16.mxu1 %vm1115_vm4, %v8037_v19 }
 0x202   : > { %6410 = vmatprep.subr.msk.bf16.mxu1 %vm1570_vm3, %v5580_v3 }
 0x208   : > { %6126 = vmatmul.mubr.msk.bf16.gmra.mxu1 %vm1115_vm4, %v8038_v23 }
 0x209   : > { %6141 = vmatprep.mubr.msk.bf16.mxu1 %vm1115_vm4, %v7192_v2  ;;  %v6013_v2 = vpop.f32.mrf.mxu1 }
 0x20b   : > { %v1608_v29 = vpop.f32.mrf.mxu1 }
 0x20d   : > { %v6014_v47 = vpop.f32.mrf.mxu1 }
 0x20f   : > { %v1611_v45 = vpop.f32.mrf.mxu1 }
 0x210   : > { %6142 = vmatmul.mubr.msk.bf16.vlgmr.msra.gmra.mxu1 %vm1115_vm4, %v7206_v14 }
 0x211   : > { %6160 = vmatpush3.bf16.msra.mxu1 %v3075_v4  ;;  %6145 = vmatprep.mubr.msk.bf16.mxu1 %vm1115_vm4, %v7223_v59  ;;  %v7450_v31 = vpop.f32.mrf.mxu0 }
 0x212   : > { %6412 = vmatprep.subr.msk.bf16.mxu1 %vm1570_vm3, %v5590_v25 }
 0x213   : > { %v7458_v54 = vpop.f32.mrf.mxu0 }
 0x215   : > { %v7464_v11 = vpop.f32.mrf.mxu0 }
 0x217   : > { %v7471_v42 = vpop.f32.mrf.mxu0 }
 0x218   : > { %6146 = vmatmul.mubr.msk.bf16.gmra.mxu1 %vm1115_vm4, %v8039_v57 }
 0x219   : > { %6161 = vmatprep.mubr.msk.bf16.mxu1 %vm1115_vm4, %v3056_v22 }
 0x220   : > { %6162 = vmatmul.mubr.msk.bf16.vlgmr.msra.gmra.mxu1 %vm1115_vm4, %v3057_v30 }
 0x221   : > { %6180 = vmatpush3.bf16.msra.mxu1 %v3279_v12  ;;  %6165 = vmatprep.mubr.msk.bf16.mxu1 %vm1115_vm4, %v7297_v44  ;;  %v5610_v44 = vld [vmem:[%s8000_s3 + $0x54] sm:$0xf]  ;;  %v3670_v12 = vpack.c.bf16 %v3664_v21, %v3663_v61 }
 0x222   : > { %6414 = vmatprep.subr.msk.bf16.mxu1 %vm1570_vm3, %v5600_v7  ;;  %v3688_v50 = vsel %vm1570_vm3, %v5610_v44, 0  ;;  %v3892_v7 = vsel %vm1570_vm3, %v5620_v28, 0 }
 0x228   : > { %v6017_v26 = vpop.f32.mrf.mxu1  ;;  %6166 = vmatmul.mubr.msk.bf16.gmra.mxu1 %vm1115_vm4, %v3059_v15 }
 0x229   : > { %6181 = vmatprep.mubr.msk.bf16.mxu1 %vm1115_vm4, %v6966_v8 }
 0x22a   : > { %v1624_v20 = vpop.f32.mrf.mxu1 }
 0x22c   : > { %v6018_v53 = vpop.f32.mrf.mxu1 }
 0x22e   : > { %v1627_v10 = vpop.f32.mrf.mxu1 }
 0x230   : > { %v6023_v33 = vpop.f32.mrf.mxu1  ;;  %6182 = vmatmul.mubr.msk.bf16.vlgmr.msra.gmra.mxu1 %vm1115_vm4, %v7030_v55 }
 0x231   : > { %v1697_v0 = vadd.f32 %v6023_v33, %v6013_v2  ;;  %6200 = vmatpush3.bf16.msra.mxu1 %v3483_v16  ;;  %6185 = vmatprep.mubr.msk.bf16.mxu1 %vm1115_vm4, %v7096_v34 }
 0x232   : > { %v1688_v6 = vpop.f32.mrf.mxu1  ;;  %6416 = vmatprep.subr.msk.bf16.mxu1 %vm1570_vm3, %v5610_v44 }
 0x233   : > { %v1689_v8 = vadd.f32 %v1688_v6, %v1608_v29 }
 0x234   : > { %v6024_v37 = vpop.f32.mrf.mxu1 }
 0x235   : > { %v1700_v15 = vadd.f32 %v6024_v37, %v6014_v47 }
 0x236   : > { %v1691_v38 = vpop.f32.mrf.mxu1 }
 0x237   : > { %v1692_v63 = vadd.f32 %v1691_v38, %v1611_v45 }
 0x238   : > { %v6027_v32 = vpop.f32.mrf.mxu1  ;;  %6186 = vmatmul.mubr.msk.bf16.gmra.mxu1 %vm1115_vm4, %v3263_v35 }
 0x239   : > { %v1713_v55 = vadd.f32 %v6027_v32, %v6017_v26  ;;  %6201 = vmatprep.mubr.msk.bf16.mxu1 %vm1115_vm4, %v6970_v9 }
 0x23a   : > { %v1704_v34 = vpop.f32.mrf.mxu1 }
 0x23b   : > { %v1705_v49 = vadd.f32 %v1704_v34, %v1624_v20 }
 0x23c   : > { %v6028_v36 = vpop.f32.mrf.mxu1 }
 0x23d   : > { %v1716_v41 = vadd.f32 %v6028_v36, %v6018_v53  ;;  %v3668_v53 = vld [vmem:[#allocation3 + $0xb1] sm:$0xff] }
 0x23e   : > { %v1707_v48 = vpop.f32.mrf.mxu1 }
 0x23f   : > { %v1708_v46 = vadd.f32 %v1707_v48, %v1627_v10  ;;  %v7473_v40 = vpop.f32.mrf.mxu0 }
 0x240   : > { %v6033_v35 = vpop.f32.mrf.mxu1  ;;  %6202 = vmatmul.mubr.msk.bf16.vlgmr.msra.gmra.mxu1 %vm1115_vm4, %v8034_v56  ;;  %v3669_v56 = vpack.c.bf16 %v3662_v27, %v3661_v60 }
 0x241   : > { %v1815_v9 = vadd.f32 %v6033_v35, %v1697_v0  ;;  %6220 = vmatpush3.bf16.msra.mxu1 %v3688_v50  ;;  %6205 = vmatprep.mubr.msk.bf16.mxu1 %vm1115_vm4, %v8035_v62  ;;  %v8040_v62 = vpack.c.bf16 %v7199_v5, %v7197_v17  ;;  %v7482_v19 = vpop.f32.mrf.mxu0  ;;  %v3672_v0 = vpack.c.bf16 %v3668_v53, %v7270_v51 }
 0x242   : > { %v1782_v13 = vpop.f32.mrf.mxu1  ;;  %6418 = vmatprep.subr.msk.bf16.mxu1 %vm1570_vm3, %v5620_v28 }
 0x243   : > { %v1813_v39 = vadd.f32 %v1782_v13, %v1689_v8  ;;  %v7484_v29 = vpop.f32.mrf.mxu0 }
 0x244   : > { %v6034_v1 = vpop.f32.mrf.mxu1 }
 0x245   : > { %v1816_v58 = vadd.f32 %v6034_v1, %v1700_v15  ;;  %v7492_v45 = vpop.f32.mrf.mxu0 }
 0x246   : > { %v1785_v43 = vpop.f32.mrf.mxu1 }
 0x247   : > { %v7475_v52 = vadd.f32 %v1785_v43, %v1692_v63  ;;  %v7494_v44 = vpop.f32.mrf.mxu0 }
 0x248   : > { %v6037_v3 = vpop.f32.mrf.mxu1  ;;  %6206 = vmatmul.mubr.msk.bf16.gmra.mxu1 %vm1115_vm4, %v8040_v62 }
 0x249   : > { %v1819_v18 = vadd.f32 %v6037_v3, %v1713_v55  ;;  %6221 = vmatprep.mubr.msk.bf16.mxu1 %vm1115_vm4, %v3669_v56 }
 0x24a   : > { %v1798_v4 = vpop.f32.mrf.mxu1 }
 0x24b   : > { %v1817_v25 = vadd.f32 %v1798_v4, %v1705_v49 }
 0x24c   : > { %v6038_v22 = vpop.f32.mrf.mxu1 }
 0x24d   : > { %v1820_v2 = vadd.f32 %v6038_v22, %v1716_v41  ;;  %v3872_v41 = vld [vmem:[#allocation3 + $0xb3] sm:$0xff] }
 0x24e   : > { %v1801_v30 = vpop.f32.mrf.mxu1  ;;  %v3876_v35 = vpack.c.bf16 %v3872_v41, %v7312_v24 }
 0x24f   : > { %v7487_v17 = vadd.f32 %v1801_v30, %v1708_v46 }
 0x250   : > { %v6043_v5 = vpop.f32.mrf.mxu1  ;;  %6222 = vmatmul.mubr.msk.bf16.vlgmr.msra.gmra.mxu1 %vm1115_vm4, %v3670_v12 }
 0x251   : > { %v1917_v47 = vadd.f32 %v6043_v5, %v1815_v9  ;;  %6240 = vmatpush3.bf16.msra.mxu1 %v3892_v7  ;;  %6225 = vmatprep.mubr.msk.bf16.mxu1 %vm1115_vm4, %v8038_v23  ;;  %v7502_v23 = vpop.f32.mrf.mxu0 }
 0x252   : > { %v1884_v26 = vpop.f32.mrf.mxu1 }
 0x253   : > { %v1915_v20 = vadd.f32 %v1884_v26, %v1813_v39  ;;  %v7504_v32 = vpop.f32.mrf.mxu0 }
 0x254   : > { %v6044_v10 = vpop.f32.mrf.mxu1 }
 0x255   : > { %v1918_v16 = vadd.f32 %v6044_v10, %v1816_v58  ;;  %v7512_v49 = vpop.f32.mrf.mxu0 }
 0x256   : > { %v7496_v33 = vpop.f32.mrf.mxu1 }
 0x257   : > { %v7514_v46 = vpop.f32.mrf.mxu0 }
 0x258   : > { %v6047_v6 = vpop.f32.mrf.mxu1  ;;  %6226 = vmatmul.mubr.msk.bf16.gmra.mxu1 %vm1115_vm4, %v3672_v0 }
 0x259   : > { %v1921_v8 = vadd.f32 %v6047_v6, %v1819_v18  ;;  %6241 = vmatprep.mubr.msk.bf16.mxu1 %vm1115_vm4, %v7206_v14  ;;  %v7520_v13 = vpop.f32.mrf.mxu0 }
 0x25a   : > { %v1900_v37 = vpop.f32.mrf.mxu1 }
 0x25b   : > { %v1919_v15 = vadd.f32 %v1900_v37, %v1817_v25  ;;  %v7522_v58 = vpop.f32.mrf.mxu0 }
 0x25c   : > { %v6048_v38 = vpop.f32.mrf.mxu1 }
 0x25d   : > { %v1922_v63 = vadd.f32 %v6048_v38, %v1820_v2  ;;  %v7526_v3 = vpop.f32.mrf.mxu0 }
 0x25e   : > { %v7506_v55 = vpop.f32.mrf.mxu1 }
 0x25f   : > { %v7528_v25 = vpop.f32.mrf.mxu0 }
 0x260   : > { %v6053_v34 = vpop.f32.mrf.mxu1  ;;  %6242 = vmatmul.mubr.msk.bf16.vlgmr.msra.gmra.mxu1 %vm1115_vm4, %v7223_v59 }
 0x261   : > { %v2019_v51 = vadd.f32 %v6053_v34, %v1917_v47  ;;  %6245 = vmatprep.mubr.msk.bf16.mxu1 %vm1115_vm4, %v8039_v57  ;;  %v7530_v61 = vpop.f32.mrf.mxu0 }
 0x262   : > { %v1986_v14 = vpop.f32.mrf.mxu1 }
 0x263   : > { %v2017_v36 = vadd.f32 %v1986_v14, %v1915_v20  ;;  %v7532_v47 = vpop.f32.mrf.mxu0 }
 0x264   : > { %v6054_v48 = vpop.f32.mrf.mxu1 }
 0x265   : > { %v2020_v50 = vadd.f32 %v6054_v48, %v1918_v16  ;;  %v7534_v10 = vpop.f32.mrf.mxu0 }
 0x266   : > { %v7516_v28 = vpop.f32.mrf.mxu1 }
 0x267   : > { %v7536_v37 = vpop.f32.mrf.mxu0 }
 0x268   : > { %v6057_v9 = vpop.f32.mrf.mxu1  ;;  %6246 = vmatmul.mubr.msk.bf16.gmra.mxu1 %vm1115_vm4, %v3876_v35 }
 0x269   : > { %v2023_v59 = vadd.f32 %v6057_v9, %v1921_v8  ;;  %v7538_v34 = vpop.f32.mrf.mxu0 }
 0x26a   : > { %v2002_v57 = vpop.f32.mrf.mxu1 }
 0x26b   : > { %v2021_v39 = vadd.f32 %v2002_v57, %v1919_v15  ;;  %v7540_v48 = vpop.f32.mrf.mxu0 }
 0x26c   : > { %v6058_v1 = vpop.f32.mrf.mxu1 }
 0x26d   : > { %v2024_v27 = vadd.f32 %v6058_v1, %v1922_v63 }
 0x26e   : > { %v7524_v43 = vpop.f32.mrf.mxu1 }
 0x270   : > { %v6063_v60 = vpop.f32.mrf.mxu1 }
 0x271   : > { %v2122_v56 = vadd.f32 %v6063_v60, %v2019_v51 }
 0x272   : > { %v2089_v62 = vpop.f32.mrf.mxu1 }
 0x273   : > { %v2120_v24 = vadd.f32 %v2089_v62, %v2017_v36 }
 0x274   : > { %v6064_v18 = vpop.f32.mrf.mxu1 }
 0x275   : > { %v2123_v4 = vadd.f32 %v6064_v18, %v2020_v50 }
 0x276   : > { %v2092_v21 = vpop.f32.mrf.mxu1 }
 0x278   : > { %v6067_v22 = vpop.f32.mrf.mxu1 }
 0x279   : > { %v2126_v2 = vadd.f32 %v6067_v22, %v2023_v59  ;;  %v7542_v59 = vpop.f32.mrf.mxu0 }
 0x27a   : > { %v2105_v30 = vpop.f32.mrf.mxu1 }
 0x27b   : > { %v2124_v12 = vadd.f32 %v2105_v30, %v2021_v39  ;;  %v7544_v60 = vpop.f32.mrf.mxu0  ;;  %v1916_v30 = vadd.f32 %v7496_v33, %v7475_v52 }
 0x27c   : > { %v6068_v7 = vpop.f32.mrf.mxu1 }
 0x27d   : > { %v2127_v5 = vadd.f32 %v6068_v7, %v2024_v27  ;;  %v7546_v18 = vpop.f32.mrf.mxu0 }
 0x27e   : > { %v2108_v26 = vpop.f32.mrf.mxu1 }
 0x27f   : > { %v7550_v7 = vpop.f32.mrf.mxu0 }
 0x280   : > { %v6073_v20 = vpop.f32.mrf.mxu1 }
 0x281   : > { %v2224_v53 = vadd.f32 %v6073_v20, %v2122_v56  ;;  %v2018_v20 = vadd.f32 %v7516_v28, %v1916_v30 }
 0x282   : > { %v2191_v16 = vpop.f32.mrf.mxu1 }
 0x283   : > { %v2222_v0 = vadd.f32 %v2191_v16, %v2120_v24  ;;  %v2121_v16 = vadd.f32 %v2092_v21, %v2018_v20 }
 0x284   : > { %v6074_v6 = vpop.f32.mrf.mxu1 }
 0x285   : > { %v2225_v8 = vadd.f32 %v6074_v6, %v2123_v4  ;;  %v7553_v6 = vpop.f32.mrf.mxu0 }
 0x286   : > { %v2194_v15 = vpop.f32.mrf.mxu1 }
 0x287   : > { %v7557_v33 = vpop.f32.mrf.mxu0 }
 0x288   : > { %v6077_v38 = vpop.f32.mrf.mxu1 }
 0x289   : > { %v2228_v63 = vadd.f32 %v6077_v38, %v2126_v2  ;;  %v2223_v38 = vadd.f32 %v2194_v15, %v2121_v16 }
 0x28a   : > { %v2207_v51 = vpop.f32.mrf.mxu1 }
 0x28b   : > { %v2226_v14 = vadd.f32 %v2207_v51, %v2124_v12 }
 0x28c   : > { %v6078_v36 = vpop.f32.mrf.mxu1 }
 0x28d   : > { %v2229_v41 = vadd.f32 %v6078_v36, %v2127_v5 }
 0x28e   : > { %v2210_v50 = vpop.f32.mrf.mxu1 }
 0x290   : > { %v6083_v35 = vpop.f32.mrf.mxu1 }
 0x291   : > { %v2326_v9 = vadd.f32 %v6083_v35, %v2224_v53 }
 0x292   : > { %v2293_v57 = vpop.f32.mrf.mxu1 }
 0x293   : > { %v2324_v39 = vadd.f32 %v2293_v57, %v2222_v0 }
 0x294   : > { %v6084_v1 = vpop.f32.mrf.mxu1 }
 0x295   : > { %v2327_v27 = vadd.f32 %v6084_v1, %v2225_v8  ;;  %v7560_v1 = vpop.f32.mrf.mxu0 }
 0x296   : > { %v2296_v56 = vpop.f32.mrf.mxu1 }
 0x297   : > { %v2325_v36 = vadd.f32 %v2296_v56, %v2223_v38 }
 0x298   : > { %v6087_v62 = vpop.f32.mrf.mxu1 }
 0x299   : > { %v2330_v24 = vadd.f32 %v6087_v62, %v2228_v63 }
 0x29a   : > { %v2309_v4 = vpop.f32.mrf.mxu1 }
 0x29b   : > { %v2328_v22 = vadd.f32 %v2309_v4, %v2226_v14  ;;  %v1920_v14 = vadd.f32 %v7506_v55, %v7487_v17  ;;  %v7562_v17 = vpop.f32.mrf.mxu0 }
 0x29c   : > { %v6088_v2 = vpop.f32.mrf.mxu1  ;;  %8041 = vst [vmem:[#allocation9_spill] sm:$0xff] %v7562_v17 }
 0x29d   : > { %v2331_v12 = vadd.f32 %v6088_v2, %v2229_v41  ;;  %v2022_v35 = vadd.f32 %v7524_v43, %v1920_v14  ;;  %v6503_v43 = vld [vmem:[%s8002_s5 + $0x8] sm:$0xff]  }
 0x29e   : > { %v2312_v5 = vpop.f32.mrf.mxu1 }
 0x29f   : > { %v2125_v21 = vadd.f32 %v2108_v26, %v2022_v35  ;;  %v7567_v26 = vpop.f32.mrf.mxu0 }
 0x2a0   : > { %v6093_v53 = vpop.f32.mrf.mxu1  ;;  %8042 = vst [vmem:[#allocation11_spill] sm:$0xff] %v7567_v26 }
 0x2a1   : > { %v2428_v0 = vadd.f32 %v6093_v53, %v2326_v9  ;;  %v2227_v15 = vadd.f32 %v2210_v50, %v2125_v21  ;;  %v8015_v53 = vmov 0.0   ;;  %v7579_v16 = vpop.f32.mrf.mxu0 }
 0x2a2   : > { %v2395_v8 = vpop.f32.mrf.mxu1  ;;  %6259 = vmatprep.subr.bf16.mxu1 %v8015_v53  ;;  %6271 = vmatprep.subr.bf16.mxu0 %v8015_v53 }
 0x2a3   : > { %v2426_v63 = vadd.f32 %v2395_v8, %v2324_v39  ;;  %v2329_v2 = vadd.f32 %v2312_v5, %v2227_v15  ;;  %6260 = vmatpush3.bf16.msra.mxu1 %v6503_v43  ;;  %6261 = vmatprep.mubr.msk.bf16.mxu1 %vm6599_vm6, %v8015_v53 }
 0x2a4   : > { %v6094_v51 = vpop.f32.mrf.mxu1  ;;  %6265 = vmatprep.subr.bf16.mxu1 %v8015_v53  ;;  %6273 = vmatprep.mubr.msk.bf16.mxu0 %vm6599_vm6, %v8015_v53 }
 0x2a5   : > { %v2429_v52 = vadd.f32 %v6094_v51, %v2327_v27  ;;  %v7582_v51 = vpop.f32.mrf.mxu0 }
 0x2a6   : > { %v2398_v41 = vpop.f32.mrf.mxu1 }
 0x2a7   : > { %v2427_v28 = vadd.f32 %v2398_v41, %v2325_v36 }
 0x2a8   : > { %v6097_v57 = vpop.f32.mrf.mxu1 }
 0x2a9   : > { %v2432_v9 = vadd.f32 %v6097_v57, %v2330_v24  ;;  %v7584_v57 = vpop.f32.mrf.mxu0 }
 0x2aa   : > { %v2411_v62 = vpop.f32.mrf.mxu1  ;;  %8043 = vst [vmem:[#allocation8_spill] sm:$0xff] %v7584_v57 }
 0x2ab   : > { %v2430_v39 = vadd.f32 %v2411_v62, %v2328_v22  ;;  %v6504_v22 = vld [vmem:[%s8002_s5 + $0x10] sm:$0xff]  }
 0x2ac   : > { %v6098_v4 = vpop.f32.mrf.mxu1  ;;  %6272 = vmatpush3.bf16.msra.mxu0 %v6504_v22 }
 0x2ad   : > { %v2433_v30 = vadd.f32 %v6098_v4, %v2331_v12  ;;  %6283 = vmatprep.subr.bf16.mxu0 %v8015_v53 }
 0x2ae   : > { %v2414_v55 = vpop.f32.mrf.mxu1 }
 0x2af   : > { %v2431_v27 = vadd.f32 %v2414_v55, %v2329_v2 }
 0x2b0   : > { %v6103_v56 = vpop.f32.mrf.mxu1 }
 0x2b1   : > { %v2530_v20 = vadd.f32 %v6103_v56, %v2428_v0 }
 0x2b2   : > { %v2497_v24 = vpop.f32.mrf.mxu1 }
 0x2b3   : > { %v2528_v50 = vadd.f32 %v2497_v24, %v2426_v63  ;;  %v2633_v62 = vadd.f32 %v7450_v31, %v2530_v20 }
 0x2b4   : > { %v6104_v12 = vpop.f32.mrf.mxu1 }
 0x2b5   : > { %v2531_v5 = vadd.f32 %v6104_v12, %v2429_v52  ;;  %v2631_v2 = vadd.f32 %v7458_v54, %v2528_v50 }
 0x2b6   : > { %v2500_v0 = vpop.f32.mrf.mxu1 }
 0x2b7   : > { %v2529_v8 = vadd.f32 %v2500_v0, %v2427_v28  ;;  %v7590_v28 = vpop.f32.mrf.mxu0 }
 0x2b8   : > { %v6107_v38 = vpop.f32.mrf.mxu1  ;;  %8044 = vst [vmem:[#allocation10_spill] sm:$0xff] %v7590_v28 }
 0x2b9   : > { %v2534_v63 = vadd.f32 %v6107_v38, %v2432_v9  ;;  %v2632_v43 = vadd.f32 %v7471_v42, %v2529_v8 }
 0x2ba   : > { %v2513_v14 = vpop.f32.mrf.mxu1 }
 0x2bb   : > { %v2532_v36 = vadd.f32 %v2513_v14, %v2430_v39  ;;  %v2634_v39 = vadd.f32 %v7464_v11, %v2531_v5  ;;  %v2637_v24 = vadd.f32 %v7473_v40, %v2534_v63 }
 0x2bc   : > { %v6108_v41 = vpop.f32.mrf.mxu1 }
 0x2bd   : > { %v2535_v35 = vadd.f32 %v6108_v41, %v2433_v30  ;;  %v2635_v22 = vadd.f32 %v7482_v19, %v2532_v36 }
 0x2be   : > { %v2516_v52 = vpop.f32.mrf.mxu1 }
 0x2bf   : > { %v2533_v21 = vadd.f32 %v2516_v52, %v2431_v27  ;;  %v7598_v27 = vpop.f32.mrf.mxu0  ;;  %v2638_v0 = vadd.f32 %v7484_v29, %v2535_v35 }
 0x2c0   : > { %v6123_v15 = vpop.f32.mrf.mxu1  ;;  %8045 = vst [vmem:[#allocation12_spill] sm:$0xff] %v7598_v27 }
 0x2c1   : > { %v7587_v4 = vadd.f32 %v6123_v15, %v2633_v62  ;;  %v7606_v12 = vpop.f32.mrf.mxu0  ;;  %v2636_v38 = vadd.f32 %v7492_v45, %v2533_v21 }
 0x2c2   : > { %v2702_v9 = vpop.f32.mrf.mxu1  ;;  %8046 = vst [vmem:[#allocation13_spill] sm:$0xff] %v7606_v12 }
 0x2c3   : > { %v7592_v55 = vadd.f32 %v2702_v9, %v2631_v2  ;;  %v7614_v14 = vpop.f32.mrf.mxu0 }
 0x2c4   : > { %v6124_v56 = vpop.f32.mrf.mxu1  ;;  %8047 = vst [vmem:[#allocation14_spill] sm:$0xff] %v7614_v14 }
 0x2c5   : > { %v7595_v30 = vadd.f32 %v6124_v56, %v2634_v39  ;;  %v7618_v52 = vpop.f32.mrf.mxu0  ;;  %v2835_v57 = vadd.f32 %v7502_v23, %v7592_v55 }
 0x2c6   : > { %v2705_v31 = vpop.f32.mrf.mxu1  ;;  %8048 = vst [vmem:[#allocation15_spill] sm:$0xff] %v7618_v52 }
 0x2c7   : > { %v7600_v20 = vadd.f32 %v2705_v31, %v2632_v43  ;;  %v7620_v62 = vpop.f32.mrf.mxu0 }
 0x2c8   : > { %v6127_v54 = vpop.f32.mrf.mxu1  ;;  %8049 = vst [vmem:[#allocation16_spill] sm:$0xff] %v7620_v62 }
 0x2c9   : > { %v7603_v50 = vadd.f32 %v6127_v54, %v2637_v24  ;;  %v7622_v29 = vpop.f32.mrf.mxu0 }
 0x2ca   : > { %v2718_v11 = vpop.f32.mrf.mxu1  ;;  %8050 = vst [vmem:[#allocation17_spill] sm:$0xff] %v7622_v29 }
 0x2cb   : > { %v7608_v5 = vadd.f32 %v2718_v11, %v2635_v22  ;;  %v7624_v39 = vpop.f32.mrf.mxu0  ;;  %v2841_v23 = vadd.f32 %v7514_v46, %v7603_v50 }
 0x2cc   : > { %v6128_v42 = vpop.f32.mrf.mxu1  ;;  %8051 = vst [vmem:[#allocation18_spill] sm:$0xff] %v7624_v39 }
 0x2cd   : > { %v7611_v8 = vadd.f32 %v6128_v42, %v2638_v0  ;;  %v7628_v56 = vpop.f32.mrf.mxu0 }
 0x2ce   : > { %v2721_v40 = vpop.f32.mrf.mxu1  ;;  %8052 = vst [vmem:[#allocation19_spill] sm:$0xff] %v7628_v56 }
 0x2cf   : > { %v7616_v63 = vadd.f32 %v2721_v40, %v2636_v38  ;;  %v7630_v24 = vpop.f32.mrf.mxu0 }
 0x2d0   : > { %v6143_v41 = vpop.f32.mrf.mxu1  ;;  %8053 = vst [vmem:[#allocation20_spill] sm:$0xff] %v7630_v24 }
 0x2d1   : > { %v7632_v11 = vpop.f32.mrf.mxu0 }
 0x2d2   : > { %v2906_v19 = vpop.f32.mrf.mxu1  ;;  %8054 = vst [vmem:[#allocation21_spill] sm:$0xff] %v7632_v11 }
 0x2d3   : > { %v7636_v38 = vpop.f32.mrf.mxu0 }
 0x2d4   : > { %v6144_v36 = vpop.f32.mrf.mxu1  ;;  %8055 = vst [vmem:[#allocation22_spill] sm:$0xff] %v7636_v38 }
 0x2d5   : > { %v7640_v52 = vpop.f32.mrf.mxu0 }
 0x2d6   : > { %v2909_v15 = vpop.f32.mrf.mxu1  ;;  %8056 = vst [vmem:[#allocation23_spill] sm:$0xff] %v7640_v52  ;;  %v2837_v52 = vadd.f32 %v7494_v44, %v7587_v4  ;;  %v2836_v44 = vadd.f32 %v7512_v49, %v7600_v20  ;;  %v2842_v20 = vadd.f32 %v7522_v58, %v7611_v8 }
 0x2d7   : > { %v7642_v39 = vpop.f32.mrf.mxu0 }
 0x2d8   : > { %v6147_v2 = vpop.f32.mrf.mxu1  ;;  %8057 = vst [vmem:[#allocation24_spill] sm:$0xff] %v7642_v39  ;;  %v2939_v17 = vadd.f32 %v6143_v41, %v2837_v52  ;;  %v2938_v52 = vadd.f32 %v2909_v15, %v2836_v44 }
 0x2d9   : > { %v7646_v29 = vpop.f32.mrf.mxu0 }
 0x2da   : > { %v2922_v35 = vpop.f32.mrf.mxu1  ;;  %8059 = vst [vmem:[#allocation26_spill] sm:$0xff] %v7646_v29  ;;  %v3041_v4 = vadd.f32 %v7528_v25, %v2939_v17 }
 0x2db   : > { %v7652_v26 = vpop.f32.mrf.mxu0 }
 0x2dc   : > { %v6148_v9 = vpop.f32.mrf.mxu1  ;;  %8062 = vst [vmem:[#allocation29_spill] sm:$0xff] %v7652_v26 }
 0x2dd   : > { %v7658_v28 = vpop.f32.mrf.mxu0 }
 0x2de   : > { %v7626_v45 = vpop.f32.mrf.mxu1 }
 0x2df   : > { %v7666_v26 = vpop.f32.mrf.mxu0 }
 0x2e0   : > { %v6163_v21 = vpop.f32.mrf.mxu1 }
 0x2e2   : > { %v3111_v43 = vpop.f32.mrf.mxu1 }
 0x2e4   : > { %v6164_v31 = vpop.f32.mrf.mxu1 }
 0x2e6   : > { %v3114_v54 = vpop.f32.mrf.mxu1 }
 0x2e8   : > { %v6167_v22 = vpop.f32.mrf.mxu1 }
 0x2ea   : > { %v3127_v0 = vpop.f32.mrf.mxu1 }
 0x2ec   : > { %v7634_v42 = vpop.f32.mrf.mxu1 }
 0x2ee   : > { %v7638_v40 = vpop.f32.mrf.mxu1 }
 0x2f0   : > { %v6183_v53 = vpop.f32.mrf.mxu1 }
 0x2f2   : > { %v3315_v14 = vpop.f32.mrf.mxu1 }
 0x2f4   : > { %v6184_v56 = vpop.f32.mrf.mxu1 }
 0x2f6   : > { %v3318_v12 = vpop.f32.mrf.mxu1 }
 0x2f8   : > { %v7644_v24 = vpop.f32.mrf.mxu1 }
 0x2f9   : > { %8058 = vst [vmem:[#allocation25_spill] sm:$0xff] %v7644_v24 }
 0x2fa   : > { %v7648_v11 = vpop.f32.mrf.mxu1 }
 0x2fb   : > { %8060 = vst [vmem:[#allocation27_spill] sm:$0xff] %v7648_v11  ;;  %v2937_v11 = vadd.f32 %v2906_v19, %v2835_v57  ;;  %v3144_v57 = vadd.f32 %v6163_v21, %v3041_v4  ;;  %v2943_v19 = vadd.f32 %v6147_v2, %v2841_v23  ;;  %v8065_v23 = vld [vmem:[#allocation8_spill] sm:$0xff] }
 0x2fc   : > { %v7650_v27 = vpop.f32.mrf.mxu1 }
 0x2fd   : > { %8061 = vst [vmem:[#allocation28_spill] sm:$0xff] %v7650_v27  ;;  %v2838_v27 = vadd.f32 %v7504_v32, %v7595_v30  ;;  %v3039_v55 = vadd.f32 %v7530_v61, %v2937_v11  ;;  %v7678_v32 = vpop.f32.mrf.mxu0  ;;  %v2839_v30 = vadd.f32 %v7520_v13, %v7608_v5  ;;  %v3040_v61 = vadd.f32 %v7534_v10, %v2938_v52 }
 0x2fe   : > { %v7654_v38 = vpop.f32.mrf.mxu1  ;;  %v3246_v50 = vadd.f32 %v7544_v60, %v3144_v57  ;;  %v2944_v13 = vadd.f32 %v6148_v9, %v2842_v20  ;;  %v2840_v5 = vadd.f32 %v7526_v3, %v7616_v63 }
 0x2ff   : > { %8063 = vst [vmem:[#allocation30_spill] sm:$0xff] %v7654_v38  ;;  %v2940_v24 = vadd.f32 %v6144_v36, %v2838_v27  ;;  %v3142_v49 = vadd.f32 %v3111_v43, %v3039_v55  ;;  %v2941_v17 = vadd.f32 %v2922_v35, %v2839_v30  ;;  %v7691_v15 = vpop.f32.mrf.mxu0  ;;  %v3045_v35 = vadd.f32 %v7536_v37, %v2943_v19  ;;  %v8067_v55 = vld [vmem:[#allocation9_spill] sm:$0xff]  ;;  %v8069_v19 = vld [vmem:[#allocation16_spill] sm:$0xff] }
 0x300   : > { %v6203_v62 = vpop.f32.mrf.mxu1  ;;  %v3348_v21 = vadd.f32 %v6183_v53, %v3246_v50  ;;  %v2942_v8 = vadd.f32 %v7626_v45, %v2840_v5  ;;  %v3046_v63 = vadd.f32 %v7540_v48, %v2944_v13  ;;  %v8073_v5 = vld [vmem:[#allocation17_spill] sm:$0xff] }
 0x301   : > { %v3042_v25 = vadd.f32 %v7532_v47, %v2940_v24  ;;  %v3143_v47 = vadd.f32 %v3114_v54, %v3040_v61  ;;  %v3244_v58 = vadd.f32 %v7546_v18, %v3142_v49  ;;  %v3043_v10 = vadd.f32 %v7538_v34, %v2941_v17  ;;  %v7702_v24 = vpop.f32.mrf.mxu0  ;;  %v8071_v17 = vld [vmem:[#allocation11_spill] sm:$0xff]  ;;  %v8072_v61 = vld [vmem:[#allocation12_spill] sm:$0xff] }
 0x302   : > { %v3519_v39 = vpop.f32.mrf.mxu1  ;;  %v3148_v60 = vadd.f32 %v6167_v22, %v3045_v35  ;;  %v3450_v18 = vadd.f32 %v7579_v16, %v3348_v21  ;;  %v3149_v53 = vadd.f32 %v7634_v42, %v3046_v63  ;;  %v3044_v34 = vadd.f32 %v7542_v59, %v2942_v8  ;;  %v8066_v57 = vld [vmem:[#allocation27_spill] sm:$0xff] }
 0x303   : > { %v3145_v46 = vadd.f32 %v6164_v31, %v3042_v25  ;;  %v3346_v31 = vadd.f32 %v3315_v14, %v3244_v58  ;;  %v3146_v3 = vadd.f32 %v3127_v0, %v3043_v10  ;;  %v3245_v37 = vadd.f32 %v7553_v6, %v3143_v47  ;;  %v6253_v0 = vpop.f32.mrf.mxu0  ;;  %v8064_v6 = vld [vmem:[#allocation25_spill] sm:$0xff] }
 0x304   : > { %v7662_v29 = vpop.f32.mrf.mxu1  ;;  %v3250_v14 = vadd.f32 %v7557_v33, %v3148_v60  ;;  %v3147_v48 = vadd.f32 %v7638_v40, %v3044_v34  ;;  %v8070_v25 = vld [vmem:[#allocation28_spill] sm:$0xff] }
 0x305   : > { %v3247_v9 = vadd.f32 %v7550_v7, %v3145_v46  ;;  %v3347_v22 = vadd.f32 %v3318_v12, %v3245_v37  ;;  %v3552_v7 = vadd.f32 %v6203_v62, %v3450_v18  ;;  %v3448_v44 = vadd.f32 %v7582_v51, %v3346_v31  ;;  %v8068_v62 = vld [vmem:[#allocation10_spill] sm:$0xff]  ;;  %v4030_v40 = vpop.f32.mrf.mxu0  ;;  %v8079_v34 = vld [vmem:[#allocation24_spill] sm:$0xff] }
 0x306   : > { %v7668_v38 = vpop.f32.mrf.mxu1  ;;  %v3352_v52 = vadd.f32 %v8064_v6, %v3250_v14  ;;  %v3251_v12 = vadd.f32 %v8067_v55, %v3149_v53  ;;  %v3249_v20 = vadd.f32 %v8071_v17, %v3147_v48  ;;  %v8074_v35 = vld [vmem:[#allocation30_spill] sm:$0xff]  ;;  %v8086_v17 = vld [vmem:[#allocation23_spill] sm:$0xff] }
 0x307   : > { %v3349_v11 = vadd.f32 %v6184_v56, %v3247_v9  ;;  %v3248_v56 = vadd.f32 %v7560_v1, %v3146_v3  ;;  %v3550_v16 = vadd.f32 %v3519_v39, %v3448_v44  ;;  %v3449_v51 = vadd.f32 %v8068_v62, %v3347_v22  ;;  %v8076_v31 = vld [vmem:[#allocation18_spill] sm:$0xff]  ;;  %v6254_v3 = vpop.f32.mrf.mxu0 }
 0x308   : > { %v7673_v41 = vpop.f32.mrf.mxu1  ;;  %v3655_v49 = vadd.f32 %v8069_v19, %v3552_v7  ;;  %v3353_v1 = vadd.f32 %v8070_v25, %v3251_v12  ;;  %v3454_v50 = vadd.f32 %v8072_v61, %v3352_v52  ;;  %v3351_v21 = vadd.f32 %v8074_v35, %v3249_v20  ;;  %v8080_v7 = vld [vmem:[#allocation15_spill] sm:$0xff]  ;;  %v8082_v52 = vld [vmem:[#allocation26_spill] sm:$0xff] }
 0x309   : > { %v3451_v42 = vadd.f32 %v8065_v23, %v3349_v11  ;;  %v3350_v59 = vadd.f32 %v8066_v57, %v3248_v56  ;;  %v3551_v39 = vadd.f32 %v7668_v38, %v3449_v51  ;;  %v3653_v47 = vadd.f32 %v8073_v5, %v3550_v16  ;;  %v8077_v11 = vld [vmem:[#allocation14_spill] sm:$0xff] }
 0x30a   : > { %v7682_v27 = vpop.f32.mrf.mxu1  ;;  %v3556_v10 = vadd.f32 %v7673_v41, %v3454_v50  ;;  %v3455_v38 = vadd.f32 %v8077_v11, %v3353_v1  ;;  %v3453_v44 = vadd.f32 %v8080_v7, %v3351_v21  ;;  %v8085_v51 = vld [vmem:[#allocation22_spill] sm:$0xff] }
 0x30b   : > { %v3553_v33 = vadd.f32 %v7662_v29, %v3451_v42  ;;  %v8075_v29 = vld [vmem:[#allocation13_spill] sm:$0xff] }
 0x30c   : > { %v7687_v36 = vpop.f32.mrf.mxu1  ;;  %v3452_v58 = vadd.f32 %v8075_v29, %v3350_v59  ;;  %v8083_v42 = vld [vmem:[#allocation21_spill] sm:$0xff] }
 0x30d   : > { %v3656_v9 = vadd.f32 %v8076_v31, %v3553_v33  ;;  %v3557_v14 = vadd.f32 %v7687_v36, %v3455_v38  ;;  %v8084_v36 = vld [vmem:[#allocation29_spill] sm:$0xff] }
 0x30e   : > { %v7695_v2 = vpop.f32.mrf.mxu1  ;;  %v3554_v63 = vadd.f32 %v7682_v27, %v3452_v58  ;;  %v4033_v27 = vpop.f32.mrf.mxu0 }
 0x30f   : > { %v3555_v23 = vadd.f32 %v7695_v2, %v3453_v44 }
 0x310   : > { %v6223_v43 = vpop.f32.mrf.mxu1  ;;  %v6257_v62 = vpop.f32.mrf.mxu0 }
 0x311   : > { %v3757_v13 = vadd.f32 %v6223_v43, %v3655_v49  ;;  %v8078_v43 = vld [vmem:[#allocation19_spill] sm:$0xff]  ;;  %v3658_v20 = vadd.f32 %v8086_v17, %v3555_v23 }
 0x312   : > { %v3724_v54 = vpop.f32.mrf.mxu1  ;;  %v3654_v53 = vadd.f32 %v8078_v43, %v3551_v39 }
 0x313   : > { %v3755_v60 = vadd.f32 %v3724_v54, %v3653_v47  ;;  %v3859_v22 = vadd.f32 %v8079_v34, %v3757_v13  ;;  %v8081_v54 = vld [vmem:[#allocation20_spill] sm:$0xff]  ;;  %v4046_v13 = vpop.f32.mrf.mxu0 }
 0x314   : > { %v6224_v45 = vpop.f32.mrf.mxu1  ;;  %v3659_v56 = vadd.f32 %v8081_v54, %v3556_v10 }
 0x315   : > { %v3758_v18 = vadd.f32 %v6224_v45, %v3656_v9  ;;  %v3857_v16 = vadd.f32 %v8082_v52, %v3755_v60  ;;  %v3657_v45 = vadd.f32 %v8083_v42, %v3554_v63 }
 0x316   : > { %v3727_v4 = vpop.f32.mrf.mxu1 }
 0x317   : > { %v3756_v41 = vadd.f32 %v3727_v4, %v3654_v53  ;;  %v3860_v33 = vadd.f32 %v8084_v36, %v3758_v18  ;;  %v3660_v4 = vadd.f32 %v8085_v51, %v3557_v14 }
 0x318   : > { %v6227_v30 = vpop.f32.mrf.mxu1 }
 0x319   : > { %v3761_v59 = vadd.f32 %v6227_v30, %v3659_v56  ;;  %v3858_v2 = vadd.f32 %v7658_v28, %v3756_v41 }
 0x31a   : > { %v3740_v46 = vpop.f32.mrf.mxu1 }
 0x31b   : > { %v3759_v49 = vadd.f32 %v3740_v46, %v3657_v45  ;;  %v3863_v50 = vadd.f32 %v7666_v26, %v3761_v59  ;;  %v7758_v59 = vld [vmem:[%s8001_s4] sm:$0x1] }
 0x31c   : > { %v6228_v8 = vpop.f32.mrf.mxu1 }
 0x31d   : > { %v3762_v61 = vadd.f32 %v6228_v8, %v3660_v4  ;;  %v3861_v35 = vadd.f32 %v7678_v32, %v3759_v49  ;;  %v6258_v8 = vpop.f32.mrf.mxu0 }
 0x31e   : > { %v3743_v37 = vpop.f32.mrf.mxu1 }
 0x31f   : > { %v3760_v47 = vadd.f32 %v3743_v37, %v3658_v20  ;;  %v3864_v58 = vadd.f32 %v7691_v15, %v3762_v61  ;;  %v4049_v38 = vpop.f32.mrf.mxu0 }
 0x320   : > { %v6243_v48 = vpop.f32.mrf.mxu1 }
 0x321   : > { %v3961_v6 = vadd.f32 %v6243_v48, %v3859_v22  ;;  %v3862_v31 = vadd.f32 %v7702_v24, %v3760_v47 }
 0x322   : > { %v3928_v57 = vpop.f32.mrf.mxu1 }
 0x323   : > { %v4063_v55 = vadd.f32 %v6253_v0, %v3961_v6  ;;  %v3959_v12 = vadd.f32 %v3928_v57, %v3857_v16 }
 0x324   : > { %v6244_v19 = vpop.f32.mrf.mxu1 }
 0x325   : > { %4072 = vst.msk [vmem:[#allocation4 + $0x10] sm:$0xff] %vm4069_vm7, %v4063_v55  ;;  %v4061_v25 = vadd.f32 %v4030_v40, %v3959_v12  ;;  %v3962_v1 = vadd.f32 %v6244_v19, %v3860_v33 }
 0x326   : > { %v3931_v39 = vpop.f32.mrf.mxu1 }
 0x327   : > { %4070 = vst.msk [vmem:[#allocation4] sm:$0xff] %vm4069_vm7, %v4061_v25  ;;  %v4064_v0 = vadd.f32 %v6254_v3, %v3962_v1  ;;  %v3960_v30 = vadd.f32 %v3931_v39, %v3858_v2  ;;  %v6505_v2 = vld [vmem:[%s8002_s5] sm:$0xff]  }
 0x328   : > { %v6247_v5 = vpop.f32.mrf.mxu1 }
 0x329   : > { %4073 = vst.msk [vmem:[#allocation4 + $0x18] sm:$0xff] %vm4069_vm7, %v4064_v0  ;;  %v4062_v46 = vadd.f32 %v4033_v27, %v3960_v30  ;;  %v3965_v40 = vadd.f32 %v6247_v5, %v3863_v50  ;;  %v6506_v0 = vld [vmem:[%s8002_s5 + $0x20] sm:$0xff]  }
 0x32a   : > { %v3944_v28 = vpop.f32.mrf.mxu1 }
 0x32b   : > { %4071 = vst.msk [vmem:[#allocation4 + $0x8] sm:$0xff] %vm4069_vm7, %v4062_v46  ;;  %v4067_v21 = vadd.f32 %v6257_v62, %v3965_v40  ;;  %v3963_v29 = vadd.f32 %v3944_v28, %v3861_v35 }
 0x32c   : > { %v6248_v10 = vpop.f32.mrf.mxu1  ;;  %v4330_v34 = vld [vmem:[#allocation4 + $0x10] sm:$0x1]  ;;  %v4331_v22 = vld [vmem:[#allocation4 + $0x11] sm:$0x1]  ;;  %v4458_v5 = vld [vmem:[#allocation4 + $0x15] sm:$0x1] }
 0x32d   : > { %4076 = vst.msk [vmem:[#allocation4 + $0x30] sm:$0xff] %vm4069_vm7, %v4067_v21  ;;  %v4065_v26 = vadd.f32 %v4046_v13, %v3963_v29  ;;  %v3966_v60 = vadd.f32 %v6248_v10, %v3864_v58  ;;  %v4332_v12 = vmax.f32 %v4330_v34, %v4331_v22  ;;  %v4457_v13 = vld [vmem:[#allocation4 + $0x14] sm:$0x1]  ;;  %v8087_v21 = vmov 0.0  }
 0x32e   : > { %v3947_v9 = vpop.f32.mrf.mxu1  ;;  %v4092_v63 = vld [vmem:[#allocation4 + $0x2] sm:$0x1]  ;;  %v4093_v11 = vld [vmem:[#allocation4 + $0x3] sm:$0x1]  ;;  %v4203_v37 = vld [vmem:[#allocation4 + $0x4] sm:$0x1]  ;;  %v4459_v28 = vmax.f32 %v4457_v13, %v4458_v5 }
 0x32f   : > { %4074 = vst.msk [vmem:[#allocation4 + $0x20] sm:$0xff] %vm4069_vm7, %v4065_v26  ;;  %v4068_v3 = vadd.f32 %v6258_v8, %v3966_v60  ;;  %v3964_v32 = vadd.f32 %v3947_v9, %v3862_v31  ;;  %v4204_v18 = vld [vmem:[#allocation4 + $0x5] sm:$0x1]  ;;  %v4078_v43 = vld [vmem:[#allocation4] sm:$0x1]  ;;  %v4094_v41 = vmax.f32 %v4092_v63, %v4093_v11  ;;  %v6512_v5 = vld [vmem:[%s8002_s5 + $0x50] sm:$0xff]  }
 0x330   : > { %v4079_v53 = vld [vmem:[#allocation4 + $0x1] sm:$0x1]  ;;  %v4334_v14 = vld [vmem:[#allocation4 + $0x18] sm:$0x1]  ;;  %v4335_v7 = vld [vmem:[#allocation4 + $0x19] sm:$0x1]  ;;  %v4205_v16 = vmax.f32 %v4203_v37, %v4204_v18 }
 0x331   : > { %4077 = vst.msk [vmem:[#allocation4 + $0x38] sm:$0xff] %vm4069_vm7, %v4068_v3  ;;  %v4066_v15 = vadd.f32 %v4049_v38, %v3964_v32  ;;  %v4336_v42 = vmax.f32 %v4334_v14, %v4335_v7  ;;  %v4080_v57 = vmax.f32 %v4078_v43, %v4079_v53  ;;  %v4460_v25 = vld [vmem:[#allocation4 + $0x1c] sm:$0x1]  ;;  %v4461_v1 = vld [vmem:[#allocation4 + $0x1d] sm:$0x1]  ;;  %v6508_v38 = vld [vmem:[%s8002_s5 + $0x30] sm:$0xff]  }
 0x332   : > { %v4095_v24 = vld [vmem:[#allocation4 + $0xa] sm:$0x1]  ;;  %v4096_v44 = vld [vmem:[#allocation4 + $0xb] sm:$0x1]  ;;  %v4206_v48 = vld [vmem:[#allocation4 + $0xc] sm:$0x1]  ;;  %v4462_v40 = vmax.f32 %v4460_v25, %v4461_v1 }
 0x333   : > { %4075 = vst.msk [vmem:[#allocation4 + $0x28] sm:$0xff] %vm4069_vm7, %v4066_v15  ;;  %v4097_v54 = vmax.f32 %v4095_v24, %v4096_v44  ;;  %v4207_v56 = vld [vmem:[#allocation4 + $0xd] sm:$0x1]  ;;  %v4082_v6 = vld [vmem:[#allocation4 + $0x8] sm:$0x1]  ;;  %v4337_v51 = vmax.f32 %v4332_v12, %v4336_v42  ;;  %v6507_v3 = vld [vmem:[%s8002_s5 + $0x18] sm:$0xff]  }
 0x334   : > { %v4083_v52 = vld [vmem:[#allocation4 + $0x9] sm:$0x1]  ;;  %v4208_v27 = vmax.f32 %v4206_v48, %v4207_v56  ;;  %v4269_v4 = vld [vmem:[#allocation4 + $0xe] sm:$0x1]  ;;  %v4270_v19 = vld [vmem:[#allocation4 + $0xf] sm:$0x1]  ;;  %v4463_v10 = vmax.f32 %v4459_v28, %v4462_v40 }
 0x335   : > { %v4084_v23 = vmax.f32 %v4082_v6, %v4083_v52  ;;  %v4098_v45 = vmax.f32 %v4094_v41, %v4097_v54  ;;  %v4266_v20 = vld [vmem:[#allocation4 + $0x6] sm:$0x1]  ;;  %v4267_v39 = vld [vmem:[#allocation4 + $0x7] sm:$0x1]  ;;  %v4271_v50 = vmax.f32 %v4269_v4, %v4270_v19  ;;  %v4338_v46 = vadd.f32 %v4337_v51, %v7758_v59  ;;  %v4397_v26 = vld [vmem:[#allocation4 + $0x1a] sm:$0x1] }
 0x336   : > { %v4209_v55 = vmax.f32 %v4205_v16, %v4208_v27  ;;  %v4268_v35 = vmax.f32 %v4266_v20, %v4267_v39  ;;  %v4398_v60 = vld [vmem:[#allocation4 + $0x1b] sm:$0x1]  ;;  %v4394_v32 = vld [vmem:[#allocation4 + $0x12] sm:$0x1]  ;;  %v4395_v63 = vld [vmem:[#allocation4 + $0x13] sm:$0x1]  ;;  %v4464_v34 = vadd.f32 %v4463_v10, %v7758_v59 }
 0x337   : > { %v4099_v36 = vadd.f32 %v4098_v45, %v7758_v59  ;;  %v4085_v33 = vmax.f32 %v4080_v57, %v4084_v23  ;;  %v4339_v8 = vmax.f32 %v4338_v46, 0.0  ;;  %v4399_v18 = vmax.f32 %v4397_v26, %v4398_v60  ;;  %v4584_v43 = vld [vmem:[#allocation4 + $0x20] sm:$0x1]  ;;  %v4585_v15 = vld [vmem:[#allocation4 + $0x21] sm:$0x1]  ;;  %v6509_v16 = vld [vmem:[%s8002_s5 + $0x28] sm:$0xff]  }
 0x338   : > { %v4210_v62 = vadd.f32 %v4209_v55, %v7758_v59  ;;  %v4272_v58 = vmax.f32 %v4268_v35, %v4271_v50  ;;  %v4396_v14 = vmax.f32 %v4394_v32, %v4395_v63  ;;  %v4586_v7 = vmax.f32 %v4584_v43, %v4585_v15  ;;  %v4523_v54 = vld [vmem:[#allocation4 + $0x1e] sm:$0x1]  ;;  %v4524_v56 = vld [vmem:[#allocation4 + $0x1f] sm:$0x1]  ;;  %v4520_v27 = vld [vmem:[#allocation4 + $0x16] sm:$0x1] }
 0x339   : > { %v4100_v49 = vmax.f32 %v4099_v36, 0.0  ;;  %v4087_v30 = vadd.f32 %v7758_v59, %v4085_v33  ;;  %v4340_v53 = vpack.c.bf16 %v4339_v8, %v4339_v8  ;;  %v4465_v48 = vmax.f32 %v4464_v34, 0.0  ;;  %v4521_v23 = vld [vmem:[#allocation4 + $0x17] sm:$0x1]  ;;  %v6510_v45 = vld [vmem:[%s8002_s5 + $0x40] sm:$0xff]  }
 0x33a   : > { %v4211_v17 = vmax.f32 %v4210_v62, 0.0  ;;  %v4588_v31 = vld [vmem:[#allocation4 + $0x28] sm:$0x1]  ;;  %v4589_v9 = vld [vmem:[#allocation4 + $0x29] sm:$0x1]  ;;  %v4273_v37 = vadd.f32 %v4272_v58, %v7758_v59  ;;  %v4400_v44 = vmax.f32 %v4396_v14, %v4399_v18  ;;  %v4525_v55 = vmax.f32 %v4523_v54, %v4524_v56  ;;  %v6514_v15 = vld [vmem:[%s8002_s5 + $0x60] sm:$0xff]  }
 0x33b   : > { %v4101_v61 = vpack.c.bf16 %v4100_v49, %v4100_v49  ;;  %v4088_v29 = vmax.f32 %v4087_v30, 0.0  ;;  %v4590_v22 = vmax.f32 %v4588_v31, %v4589_v9  ;;  %v4714_v6 = vld [vmem:[#allocation4 + $0x2c] sm:$0x1]  ;;  %v4715_v52 = vld [vmem:[#allocation4 + $0x2d] sm:$0x1]  ;;  %v4466_v33 = vpack.c.bf16 %v4465_v48, %v4465_v48 }
 0x33c   : > { %v4212_v47 = vpack.c.bf16 %v4211_v17, %v4211_v17  ;;  %v4274_v24 = vmax.f32 %v4273_v37, 0.0  ;;  %v4401_v57 = vadd.f32 %v4400_v44, %v7758_v59  ;;  %v4711_v12 = vld [vmem:[#allocation4 + $0x24] sm:$0x1]  ;;  %v4712_v36 = vld [vmem:[#allocation4 + $0x25] sm:$0x1]  ;;  %v4716_v51 = vmax.f32 %v4714_v6, %v4715_v52 }
 0x33d   : > { %6262 = vmatmul.mubr.msk.bf16.vlgmr.msra.gmra.mxu1 %vm4069_vm7, %v4101_v61  ;;  %v4089_v11 = vpack.c.bf16 %v4088_v29, %v4088_v29  ;;  %v4591_v41 = vmax.f32 %v4586_v7, %v4590_v22  ;;  %v4522_v4 = vmax.f32 %v4520_v27, %v4521_v23  ;;  %v4713_v19 = vmax.f32 %v4711_v12, %v4712_v36  ;;  %v4651_v17 = vld [vmem:[#allocation4 + $0x2a] sm:$0x1]  ;;  %v4652_v20 = vld [vmem:[#allocation4 + $0x2b] sm:$0x1]  ;;  %v4842_v39 = vld [vmem:[#allocation4 + $0x38] sm:$0x1] }
 0x33e   : > { %6266 = vmatpush3.bf16.msra.mxu1 %v6505_v2  ;;  %6274 = vmatmul.mubr.msk.bf16.vlgmr.msra.gmra.mxu0 %vm4069_vm7, %v4212_v47  ;;  %v4275_v42 = vpack.c.bf16 %v4274_v24, %v4274_v24  ;;  %v4402_v49 = vmax.f32 %v4401_v57, 0.0  ;;  %v4843_v61 = vld [vmem:[#allocation4 + $0x39] sm:$0x1]  ;;  %v4648_v30 = vld [vmem:[#allocation4 + $0x22] sm:$0x1]  ;;  %v4653_v46 = vmax.f32 %v4651_v17, %v4652_v20 }
 0x33f   : > { %6284 = vmatpush3.bf16.msra.mxu0 %v6506_v0  ;;  %6267 = vmatprep.mubr.msk.bf16.mxu1 %vm6599_vm6, %v8087_v21  ;;  %v4592_v62 = vadd.f32 %v4591_v41, %v7758_v59  ;;  %v4526_v25 = vmax.f32 %v4522_v4, %v4525_v55  ;;  %v4717_v2 = vmax.f32 %v4713_v19, %v4716_v51  ;;  %v6511_v0 = vld [vmem:[%s8002_s5 + $0x38] sm:$0xff]   ;;  %v4649_v50 = vld [vmem:[#allocation4 + $0x23] sm:$0x1]  ;;  %v4838_v40 = vld [vmem:[#allocation4 + $0x30] sm:$0x1] }
 0x340   : > { %6277 = vmatprep.subr.bf16.mxu1 %v8087_v21  ;;  %6285 = vmatprep.mubr.msk.bf16.mxu0 %vm6599_vm6, %v8087_v21  ;;  %v4403_v13 = vpack.c.bf16 %v4402_v49, %v4402_v49  ;;  %v4839_v35 = vld [vmem:[#allocation4 + $0x31] sm:$0x1]  ;;  %v4844_v58 = vmax.f32 %v4842_v39, %v4843_v61  ;;  %v4650_v8 = vmax.f32 %v4648_v30, %v4649_v50  ;;  %v4778_v32 = vld [vmem:[#allocation4 + $0x2f] sm:$0x1]  ;;  %v4968_v63 = vld [vmem:[#allocation4 + $0x3c] sm:$0x1] }
 0x341   : > { %6295 = vmatprep.subr.bf16.mxu0 %v8087_v21  ;;  %v4593_v1 = vmax.f32 %v4592_v62, 0.0  ;;  %v4527_v47 = vadd.f32 %v4526_v25, %v7758_v59  ;;  %v4718_v29 = vadd.f32 %v4717_v2, %v7758_v59  ;;  %v4840_v10 = vmax.f32 %v4838_v40, %v4839_v35  ;;  %v4774_v37 = vld [vmem:[#allocation4 + $0x26] sm:$0x1]  ;;  %v4775_v18 = vld [vmem:[#allocation4 + $0x27] sm:$0x1]  ;;  %v6515_v23 = vld [vmem:[%s8002_s5 + $0x58] sm:$0xff]  }
 0x342   : > { %v4654_v60 = vmax.f32 %v4650_v8, %v4653_v46  ;;  %v4965_v22 = vld [vmem:[#allocation4 + $0x34] sm:$0x1]  ;;  %v4966_v14 = vld [vmem:[#allocation4 + $0x35] sm:$0x1]  ;;  %v4776_v48 = vmax.f32 %v4774_v37, %v4775_v18  ;;  %v4906_v27 = vld [vmem:[#allocation4 + $0x3b] sm:$0x1] }
 0x343   : > { %v4594_v28 = vpack.c.bf16 %v4593_v1, %v4593_v1  ;;  %v4528_v26 = vmax.f32 %v4527_v47, 0.0  ;;  %v4719_v31 = vmax.f32 %v4718_v29, 0.0  ;;  %v4845_v9 = vmax.f32 %v4840_v10, %v4844_v58  ;;  %v6516_v55 = vld [vmem:[%s8002_s5 + $0x70] sm:$0xff]   ;;  %v5031_v25 = vld [vmem:[#allocation4 + $0x3e] sm:$0x1]  ;;  %v6517_v2 = vld [vmem:[%s8002_s5 + $0x68] sm:$0xff]  }
 0x344   : > { %v4967_v41 = vmax.f32 %v4965_v22, %v4966_v14  ;;  %v5032_v1 = vld [vmem:[#allocation4 + $0x3f] sm:$0x1]  ;;  %v5028_v17 = vld [vmem:[#allocation4 + $0x36] sm:$0x1]  ;;  %v5029_v20 = vld [vmem:[#allocation4 + $0x37] sm:$0x1] }
 0x345   : > { %6268 = vmatmul.mubr.msk.bf16.vlgmr.msra.gmra.mxu1 %vm4069_vm7, %v4089_v11  ;;  %v4969_v11 = vld [vmem:[#allocation4 + $0x3d] sm:$0x1]  ;;  %v4529_v43 = vpack.c.bf16 %v4528_v26, %v4528_v26  ;;  %v4720_v7 = vpack.c.bf16 %v4719_v31, %v4719_v31  ;;  %v4846_v24 = vadd.f32 %v4845_v9, %v7758_v59  ;;  %v5030_v50 = vmax.f32 %v5028_v17, %v5029_v20  ;;  %v6521_v58 = vld [vmem:[%s8004_s7 + $0x28] sm:$0xff]   ;;  %v6522_v8 = vld [vmem:[%s8004_s7 + $0x20] sm:$0xff]  }
 0x346   : > { %6278 = vmatpush3.bf16.msra.mxu1 %v6507_v3  ;;  %6286 = vmatmul.mubr.msk.bf16.vlgmr.msra.gmra.mxu0 %vm4069_vm7, %v4340_v53  ;;  %v4777_v3 = vld [vmem:[#allocation4 + $0x2e] sm:$0x1]  ;;  %v4655_v53 = vadd.f32 %v4654_v60, %v7758_v59  ;;  %v4970_v44 = vmax.f32 %v4968_v63, %v4969_v11  ;;  %v6518_v47 = vld [vmem:[%s8002_s5 + $0x78] sm:$0xff]   ;;  %v6524_v26 = vld [vmem:[%s8004_s7 + $0x10] sm:$0xff]  }
 0x347   : > { %6296 = vmatpush3.bf16.msra.mxu0 %v6508_v38  ;;  %6279 = vmatprep.mubr.msk.bf16.mxu1 %vm6599_vm6, %v8087_v21  ;;  %v6513_v38 = vld [vmem:[%s8002_s5 + $0x48] sm:$0xff]   ;;  %v4779_v34 = vmax.f32 %v4777_v3, %v4778_v32  ;;  %v4847_v6 = vmax.f32 %v4846_v24, 0.0  ;;  %v6519_v29 = vld [vmem:[%s8004_s7 + $0x38] sm:$0xff]   ;;  %v6526_v31 = vld [vmem:[%s8004_s7] sm:$0xff]  }
 0x348   : > { %6289 = vmatprep.subr.bf16.mxu1 %v8087_v21  ;;  %6297 = vmatprep.mubr.msk.bf16.mxu0 %vm6599_vm6, %v8087_v21  ;;  %v4656_v54 = vmax.f32 %v4655_v53, 0.0  ;;  %v4971_v52 = vmax.f32 %v4967_v41, %v4970_v44  ;;  %v6523_v10 = vld [vmem:[%s8004_s7 + $0x18] sm:$0xff]   ;;  %v6525_v60 = vld [vmem:[%s8004_s7 + $0x8] sm:$0xff]   ;;  %v6528_v3 = vld [vmem:[%s8006_s9 + $0x30] sm:$0xff]  }
 0x349   : > { %6307 = vmatprep.subr.bf16.mxu0 %v8087_v21  ;;  %v4780_v56 = vmax.f32 %v4776_v48, %v4779_v34  ;;  %v6527_v9 = vld [vmem:[%s8006_s9 + $0x38] sm:$0xff]   ;;  %v6529_v32 = vld [vmem:[%s8006_s9 + $0x28] sm:$0xff]   ;;  %v6530_v63 = vld [vmem:[%s8006_s9 + $0x20] sm:$0xff]  }
 0x34a   : > { %v4657_v57 = vpack.c.bf16 %v4656_v54, %v4656_v54  ;;  %v4972_v62 = vadd.f32 %v4971_v52, %v7758_v59  ;;  %v6531_v11 = vld [vmem:[%s8006_s9 + $0x18] sm:$0xff]  }
 0x34b   : > { %v4781_v12 = vadd.f32 %v4780_v56, %v7758_v59 }
 0x34c   : > { %v4973_v49 = vmax.f32 %v4972_v62, 0.0 }
 0x34d   : > { %6280 = vmatmul.mubr.msk.bf16.vlgmr.msra.gmra.mxu1 %vm4069_vm7, %v4275_v42  ;;  %v4902_v42 = vld [vmem:[#allocation4 + $0x32] sm:$0x1]  ;;  %v4782_v4 = vmax.f32 %v4781_v12, 0.0 }
 0x34e   : > { %6290 = vmatpush3.bf16.msra.mxu1 %v6509_v16  ;;  %6298 = vmatmul.mubr.msk.bf16.vlgmr.msra.gmra.mxu0 %vm4069_vm7, %v4466_v33  ;;  %v4905_v16 = vld [vmem:[#allocation4 + $0x3a] sm:$0x1]  ;;  %v4848_v33 = vpack.c.bf16 %v4847_v6, %v4847_v6  ;;  %v4974_v30 = vpack.c.bf16 %v4973_v49, %v4973_v49 }
 0x34f   : > { %6308 = vmatpush3.bf16.msra.mxu0 %v6510_v45  ;;  %6291 = vmatprep.mubr.msk.bf16.mxu1 %vm6599_vm6, %v8087_v21  ;;  %v4903_v45 = vld [vmem:[#allocation4 + $0x33] sm:$0x1]  ;;  %v4907_v36 = vmax.f32 %v4905_v16, %v4906_v27  ;;  %v4783_v39 = vpack.c.bf16 %v4782_v4, %v4782_v4 }
 0x350   : > { %6301 = vmatprep.subr.bf16.mxu1 %v8087_v21  ;;  %6309 = vmatprep.mubr.msk.bf16.mxu0 %vm6599_vm6, %v8087_v21  ;;  %v4904_v51 = vmax.f32 %v4902_v42, %v4903_v45 }
 0x351   : > { %6319 = vmatprep.subr.bf16.mxu0 %v8087_v21 }
 0x352   : > { %v4908_v19 = vmax.f32 %v4904_v51, %v4907_v36 }
 0x354   : > { %v4909_v61 = vadd.f32 %v4908_v19, %v7758_v59 }
 0x355   : > { %6292 = vmatmul.mubr.msk.bf16.vlgmr.msra.gmra.mxu1 %vm4069_vm7, %v4403_v13 }
 0x356   : > { %6302 = vmatpush3.bf16.msra.mxu1 %v6511_v0  ;;  %6310 = vmatmul.mubr.msk.bf16.vlgmr.msra.gmra.mxu0 %vm4069_vm7, %v4594_v28  ;;  %v5033_v0 = vmax.f32 %v5031_v25, %v5032_v1  ;;  %v4910_v13 = vmax.f32 %v4909_v61, 0.0 }
 0x357   : > { %6320 = vmatpush3.bf16.msra.mxu0 %v6512_v5  ;;  %6303 = vmatprep.mubr.msk.bf16.mxu1 %vm6599_vm6, %v8087_v21 }
 0x358   : > { %6313 = vmatprep.subr.bf16.mxu1 %v8087_v21  ;;  %6321 = vmatprep.mubr.msk.bf16.mxu0 %vm6599_vm6, %v8087_v21  ;;  %v5034_v5 = vmax.f32 %v5030_v50, %v5033_v0  ;;  %v4911_v46 = vpack.c.bf16 %v4910_v13, %v4910_v13 }
 0x359   : > { %6331 = vmatprep.subr.bf16.mxu0 %v8087_v21 }
 0x35a   : > { %v5035_v40 = vadd.f32 %v5034_v5, %v7758_v59  ;;  %v6520_v59 = vld [vmem:[%s8004_s7 + $0x30] sm:$0xff]  }
 0x35c   : > { %v5036_v35 = vmax.f32 %v5035_v40, 0.0 }
 0x35d   : > { %6304 = vmatmul.mubr.msk.bf16.vlgmr.msra.gmra.mxu1 %vm4069_vm7, %v4529_v43 }
 0x35e   : > { %6314 = vmatpush3.bf16.msra.mxu1 %v6513_v38  ;;  %6322 = vmatmul.mubr.msk.bf16.vlgmr.msra.gmra.mxu0 %vm4069_vm7, %v4720_v7  ;;  %v5037_v28 = vpack.c.bf16 %v5036_v35, %v5036_v35  ;;  %v6532_v38 = vld [vmem:[%s8006_s9 + $0x10] sm:$0xff]  }
 0x35f   : > { %6332 = vmatpush3.bf16.msra.mxu0 %v6514_v15  ;;  %6315 = vmatprep.mubr.msk.bf16.mxu1 %vm6599_vm6, %v8087_v21 }
 0x360   : > { %6325 = vmatprep.subr.bf16.mxu1 %v8087_v21  ;;  %6333 = vmatprep.mubr.msk.bf16.mxu0 %vm6599_vm6, %v8087_v21 }
 0x361   : > { %6343 = vmatprep.subr.bf16.mxu0 %v8087_v21 }
 0x365   : > { %6316 = vmatmul.mubr.msk.bf16.vlgmr.msra.gmra.mxu1 %vm4069_vm7, %v4657_v57 }
 0x366   : > { %6326 = vmatpush3.bf16.msra.mxu1 %v6515_v23  ;;  %6334 = vmatmul.mubr.msk.bf16.vlgmr.msra.gmra.mxu0 %vm4069_vm7, %v4848_v33 }
 0x367   : > { %6344 = vmatpush3.bf16.msra.mxu0 %v6516_v55  ;;  %6327 = vmatprep.mubr.msk.bf16.mxu1 %vm6599_vm6, %v8087_v21 }
 0x368   : > { %6337 = vmatprep.subr.bf16.mxu1 %v8087_v21  ;;  %6345 = vmatprep.mubr.msk.bf16.mxu0 %vm6599_vm6, %v8087_v21 }
 0x369   : > { %6355 = vmatprep.subr.bf16.mxu0 %v8087_v21 }
 0x36d   : > { %6328 = vmatmul.mubr.msk.bf16.vlgmr.msra.gmra.mxu1 %vm4069_vm7, %v4783_v39 }
 0x36e   : > { %6338 = vmatpush3.bf16.msra.mxu1 %v6517_v2  ;;  %6346 = vmatmul.mubr.msk.bf16.vlgmr.msra.gmra.mxu0 %vm4069_vm7, %v4974_v30 }
 0x36f   : > { %6339 = vmatprep.mubr.msk.bf16.mxu1 %vm6599_vm6, %v8087_v21  ;;  %6349 = vmatprep.subr.bf16.mxu1 %v8087_v21 }
 0x370   : > { %6371 = vmatprep.mubr.msk.bf16.mxu0 %vm6599_vm6, %v8087_v21  ;;  %6356 = vmatpush3.bf16.msra.mxu0 %v6519_v29 }
 0x371   : > { %6357 = vmatprep.subr.bf16.mxu0 %v8087_v21 }
 0x374   : > { %6358 = vmatpush3.bf16.msra.mxu0 %v6520_v59 }
 0x375   : > { %6340 = vmatmul.mubr.msk.bf16.vlgmr.msra.gmra.mxu1 %vm4069_vm7, %v4911_v46  ;;  %6359 = vmatprep.subr.bf16.mxu0 %v8087_v21 }
 0x376   : > { %6350 = vmatpush3.bf16.msra.mxu1 %v6518_v47  ;;  %6351 = vmatprep.mubr.msk.bf16.mxu1 %vm6599_vm6, %v8087_v21 }
 0x377   : > { %6375 = vmatprep.subr.bf16.mxu1 %v8087_v21 }
 0x378   : > { %6360 = vmatpush3.bf16.msra.mxu0 %v6521_v58 }
 0x379   : > { %6361 = vmatprep.subr.bf16.mxu0 %v8087_v21 }
 0x37c   : > { %6362 = vmatpush3.bf16.msra.mxu0 %v6522_v8 }
 0x37d   : > { %6352 = vmatmul.mubr.msk.bf16.vlgmr.msra.gmra.mxu1 %vm4069_vm7, %v5037_v28  ;;  %6363 = vmatprep.subr.bf16.mxu0 %v8087_v21 }
 0x37e   : > { %6391 = vmatprep.mubr.msk.bf16.mxu1 %vm6599_vm6, %v8087_v21  ;;  %6376 = vmatpush3.bf16.msra.mxu1 %v6527_v9 }
 0x37f   : > { %6377 = vmatprep.subr.bf16.mxu1 %v8087_v21 }
 0x380   : > { %6364 = vmatpush3.bf16.msra.mxu0 %v6523_v10 }
 0x381   : > { %6365 = vmatprep.subr.bf16.mxu0 %v8087_v21 }
 0x382   : > { %6378 = vmatpush3.bf16.msra.mxu1 %v6528_v3 }
 0x383   : > { %6379 = vmatprep.subr.bf16.mxu1 %v8087_v21 }
 0x384   : > { %6366 = vmatpush3.bf16.msra.mxu0 %v6524_v26 }
 0x385   : > { %6367 = vmatprep.subr.bf16.mxu0 %v8087_v21 }
 0x386   : > { %6380 = vmatpush3.bf16.msra.mxu1 %v6529_v32 }
 0x387   : > { %6381 = vmatprep.subr.bf16.mxu1 %v8087_v21 }
 0x388   : > { %6368 = vmatpush3.bf16.msra.mxu0 %v6525_v60 }
 0x389   : > { %6369 = vmatprep.subr.bf16.mxu0 %v8087_v21 }
 0x38a   : > { %6382 = vmatpush3.bf16.msra.mxu1 %v6530_v63 }
 0x38b   : > { %6383 = vmatprep.subr.bf16.mxu1 %v8087_v21 }
 0x38c   : > { %6370 = vmatpush3.bf16.msra.mxu0 %v6526_v31 }
 0x38e   : > { %6384 = vmatpush3.bf16.msra.mxu1 %v6531_v11 }
 0x38f   : > { %6385 = vmatprep.subr.bf16.mxu1 %v8087_v21 }
 0x392   : > { %6386 = vmatpush3.bf16.msra.mxu1 %v6532_v38 }
 0x393   : > { %6387 = vmatprep.subr.bf16.mxu1 %v8087_v21 }
 0x3fd   : > { %v4148_v37 = vpop.f32.mrf.mxu1 }
 0x3fe   : > { %v4259_v18 = vpop.f32.mrf.mxu0 }
 0x3ff   : > { %v6263_v43 = vpop.f32.mrf.mxu1 }
 0x400   : > { %v6275_v15 = vpop.f32.mrf.mxu0 }
 0x401   : > { %v4151_v53 = vpop.f32.mrf.mxu1 }
 0x402   : > { %v4262_v34 = vpop.f32.mrf.mxu0 }
 0x403   : > { %v6264_v22 = vpop.f32.mrf.mxu1 }
 0x404   : > { %v6276_v14 = vpop.f32.mrf.mxu0 }
 0x405   : > { %v4197_v7 = vpop.f32.mrf.mxu1 }
 0x406   : > { %v4387_v24 = vpop.f32.mrf.mxu0  ;;  %v4198_v55 = vadd.f32 %v4197_v7, %v4148_v37 }
 0x407   : > { %v6269_v44 = vpop.f32.mrf.mxu1 }
 0x408   : > { %v6287_v48 = vpop.f32.mrf.mxu0  ;;  %v4265_v51 = vadd.f32 %v4259_v18, %v4198_v55 }
 0x409   : > { %v4200_v41 = vpop.f32.mrf.mxu1 }
 0x40a   : > { %v4390_v54 = vpop.f32.mrf.mxu0  ;;  %v5091_v41 = vld [vmem:[%s8003_s6] sm:$0x1] }
 0x40b   : > { %v6270_v56 = vpop.f32.mrf.mxu1 }
 0x40c   : > { %v6288_v6 = vpop.f32.mrf.mxu0 }
 0x40d   : > { %v4322_v52 = vpop.f32.mrf.mxu1 }
 0x40e   : > { %v4513_v16 = vpop.f32.mrf.mxu0  ;;  %v4328_v49 = vadd.f32 %v4322_v52, %v4265_v51 }
 0x40f   : > { %v6281_v27 = vpop.f32.mrf.mxu1 }
 0x410   : > { %v6299_v23 = vpop.f32.mrf.mxu0  ;;  %v4393_v20 = vadd.f32 %v4387_v24, %v4328_v49 }
 0x411   : > { %v4325_v42 = vpop.f32.mrf.mxu1 }
 0x412   : > { %v4516_v45 = vpop.f32.mrf.mxu0  ;;  %v6533_v42 = vld [vmem:[%s8006_s9 + $0x8] sm:$0xff]  }
 0x413   : > { %v6282_v57 = vpop.f32.mrf.mxu1  ;;  %6388 = vmatpush3.bf16.msra.mxu1 %v6533_v42  ;;  %v6534_v45 = vld [vmem:[%s8006_s9] sm:$0xff]  }
 0x414   : > { %v6300_v12 = vpop.f32.mrf.mxu0  ;;  %6389 = vmatprep.subr.bf16.mxu1 %v8087_v21  ;;  %v5111_v57 = vld [vmem:[%s8005_s8] sm:$0x1] }
 0x415   : > { %v4450_v36 = vpop.f32.mrf.mxu1 }
 0x416   : > { %v4641_v33 = vpop.f32.mrf.mxu0  ;;  %v4456_v0 = vadd.f32 %v4450_v36, %v4393_v20 }
 0x417   : > { %v6293_v62 = vpop.f32.mrf.mxu1  ;;  %6390 = vmatpush3.bf16.msra.mxu1 %v6534_v45 }
 0x418   : > { %v6311_v4 = vpop.f32.mrf.mxu0  ;;  %v4519_v47 = vadd.f32 %v4513_v16, %v4456_v0 }
 0x419   : > { %v4453_v19 = vpop.f32.mrf.mxu1 }
 0x41a   : > { %v4644_v25 = vpop.f32.mrf.mxu0  ;;  %v5218_v19 = vld [vmem:[%s8007_s10] sm:$0x1] }
 0x41b   : > { %v6294_v1 = vpop.f32.mrf.mxu1 }
 0x41c   : > { %v6312_v2 = vpop.f32.mrf.mxu0 }
 0x41d   : > { %v4576_v17 = vpop.f32.mrf.mxu1 }
 0x41e   : > { %v4767_v39 = vpop.f32.mrf.mxu0  ;;  %v4582_v35 = vadd.f32 %v4576_v17, %v4519_v47 }
 0x41f   : > { %v6305_v61 = vpop.f32.mrf.mxu1 }
 0x420   : > { %v6323_v30 = vpop.f32.mrf.mxu0  ;;  %v4647_v8 = vadd.f32 %v4641_v33, %v4582_v35 }
 0x421   : > { %v4579_v50 = vpop.f32.mrf.mxu1 }
 0x422   : > { %v4770_v13 = vpop.f32.mrf.mxu0 }
 0x423   : > { %v6306_v5 = vpop.f32.mrf.mxu1 }
 0x424   : > { %v6324_v46 = vpop.f32.mrf.mxu0 }
 0x425   : > { %v4704_v40 = vpop.f32.mrf.mxu1 }
 0x426   : > { %v4895_v28 = vpop.f32.mrf.mxu0  ;;  %v4710_v60 = vadd.f32 %v4704_v40, %v4647_v8 }
 0x427   : > { %v6317_v29 = vpop.f32.mrf.mxu1 }
 0x428   : > { %v6335_v59 = vpop.f32.mrf.mxu0  ;;  %v4773_v63 = vadd.f32 %v4767_v39, %v4710_v60 }
 0x429   : > { %v4707_v58 = vpop.f32.mrf.mxu1 }
 0x42a   : > { %v4898_v10 = vpop.f32.mrf.mxu0 }
 0x42b   : > { %v6318_v26 = vpop.f32.mrf.mxu1 }
 0x42c   : > { %v6336_v31 = vpop.f32.mrf.mxu0 }
 0x42d   : > { %v4830_v9 = vpop.f32.mrf.mxu1 }
 0x42e   : > { %v5021_v3 = vpop.f32.mrf.mxu0  ;;  %v4836_v37 = vadd.f32 %v4830_v9, %v4773_v63 }
 0x42f   : > { %v6329_v32 = vpop.f32.mrf.mxu1 }
 0x430   : > { %v6347_v11 = vpop.f32.mrf.mxu0  ;;  %v4901_v34 = vadd.f32 %v4895_v28, %v4836_v37 }
 0x431   : > { %v4833_v38 = vpop.f32.mrf.mxu1 }
 0x432   : > { %v5024_v18 = vpop.f32.mrf.mxu0 }
 0x433   : > { %v6330_v43 = vpop.f32.mrf.mxu1 }
 0x434   : > { %v6348_v15 = vpop.f32.mrf.mxu0 }
 0x435   : > { %v4958_v53 = vpop.f32.mrf.mxu1 }
 0x436   : > { %v4964_v14 = vadd.f32 %v4958_v53, %v4901_v34 }
 0x437   : > { %v6341_v22 = vpop.f32.mrf.mxu1 }
 0x438   : > { %v5027_v44 = vadd.f32 %v5021_v3, %v4964_v14 }
 0x439   : > { %v4961_v7 = vpop.f32.mrf.mxu1 }
 0x43b   : > { %v6342_v24 = vpop.f32.mrf.mxu1 }
 0x43d   : > { %v5084_v48 = vpop.f32.mrf.mxu1 }
 0x43e   : > { %v5090_v54 = vadd.f32 %v5084_v48, %v5027_v44 }
 0x43f   : > { %v6353_v56 = vpop.f32.mrf.mxu1 }
 0x440   : > { %v5092_v6 = vadd.f32 %v5091_v41, %v5090_v54 }
 0x441   : > { %v5087_v52 = vpop.f32.mrf.mxu1 }
 0x442   : > { %v5093_v16 = vmax.f32 %v5092_v6, 0.0 }
 0x443   : > { %v6354_v27 = vpop.f32.mrf.mxu1 }
 0x444   : > { %v5094_v23 = vpack.c.bf16 %v5093_v16, %v5093_v16 }
 0x446   : > { %6372 = vmatmul.mubr.bf16.vlgmr.msra.gmra.mxu0 %v5094_v23 }
 0x506   : > { %v5194_v55 = vpop.f32.mrf.mxu0 }
 0x507   : > { %v5195_v12 = vadd.f32 %v5194_v55, %v5111_v57 }
 0x508   : > { %v6373_v36 = vpop.f32.mrf.mxu0 }
 0x509   : > { %v5200_v33 = vmax.f32 %v5195_v12, 0.0 }
 0x50a   : > { %v5197_v62 = vpop.f32.mrf.mxu0 }
 0x50b   : > { %v5201_v51 = vpack.c.bf16 %v5200_v33, %v5200_v33 }
 0x50c   : > { %v6374_v4 = vpop.f32.mrf.mxu0 }
 0x50d   : > { %6392 = vmatmul.mubr.bf16.vlgmr.msra.gmra.mxu1 %v5201_v51 }
 0x5cd   : > { %v5301_v21 = vpop.f32.mrf.mxu1 }
 0x5ce   : > { %v5302_v49 = vadd.f32 %v5301_v21, %v5218_v19 }
 0x5cf   : > { %v6393_v25 = vpop.f32.mrf.mxu1 }
 0x5d0   : > { %5307 = vst [vmem:[%s379_s30] sm:$0x1] %v5302_v49 }
 0x5d1   : > { %v5304_v1 = vpop.f32.mrf.mxu1 }
 0x5d2   : > { %6548 = shalt.err (!%p6545_p3)
}
 0x5d3   : > { %s6549_s29 = scalar_lea.hbm %s7956_s15, 16  ;;  %s6553_s14 = scalar_lea.hbm %s8008_s11, 32 }
 0x5d4   : > { %p6550_p4 = scmp.ne.s32.totalorder %s7956_s15, %s6549_s29  ;;  %p6554_p9 = scmp.lt.s32.totalorder %s7956_s15, %s8008_s11 }
 0x5d5   : > { %p6555_p10 = scmp.lt.s32.totalorder %s6553_s14, %s6549_s29 }
 0x5d6   : > { %p6551_p7 = pnand %p6550_p4, %p6699_p5 }
 0x5d7   : > { %p6556_p11 = por %p6555_p10, %p6554_p9 }
 0x5d8   : > { %p6552_p8 = pneg %p6551_p7 }
 0x5da   : > { %p6557_p12 = pnand %p6556_p11, %p6552_p8 }
 0x5dc   : > { %6560 = shalt.err (!%p6557_p12)
}
 0x5dd   : > { %6420 = dma.vmem_to_hbm [thread:$0]  (%p6699_p5), %s7958_s12, 16, %s7956_s15, %s5309_s16   ;;  %v6394_v2 = vpop.f32.mrf.mxu1 }
 0x5de PF: > { %p6426_p13 = scmp.ge.s32.totalorder %s6595_s20, 2  ;;  %s5333_s24 = sand.u32 1, %s6583_s17  }
 0x5df   : > { %s5334_s0 = scalar_lea.sflag [#allocation6], %s5333_s24 }
 0x5e0   : > { %p6423_p0 = pnand %p6426_p13, %p6703_p6 }
 0x5e2   : > { %p6424_p1 = pneg %p6423_p0 }
 0x5e4   : > { %6578 = dma.done.wait (%p6424_p1), %s5334_s0, 16  }
 0x5e5   : > { %6580 = vsyncadd (%p6424_p1), %s5334_s0, 4294967280  ;;  %p21_p2 = scmp.ge.s32.totalorder %s6686_s23, 4   ;;  %s8088_s17 = smov %s6587_s18 }
 0x5e6   : > { %s8089_s18 = smov %s6591_s19  ;;  %s8090_s19 = smov %s6697_s26 }
 0x5e7   : > { %s8091_s20 = smov %s6686_s23  ;;  %23 = sbr.rel (!%p21_p2) target bundleno = 5 (0x5), region = 244 }
 0x5ec   :  { %5338 = vsyncpa [#allocation6], 1 }
 0x5ed   :  { %5340 = vsyncpa [#allocation6 + $0x1], 1 }

</bundles_post_ra>
